<compile_context>
chip_gen: v5e
topology: v5e:2x2
jax: 0.10.0
libtpu: 0.0.40
codegen_flags: <defaults>
</compile_context>

<pallas_src>
import functools

import jax
import jax.numpy as jnp
from jax.experimental import pallas as pl
from jax.experimental.pallas import tpu as pltpu

DIM = 32
N_HEADS = 4
HEAD_DIM = DIM // N_HEADS
FFN_HID = 64
LN_EPS = 1e-5  # torch.nn.LayerNorm default
MASK_NEG = -1e30

# ---- parameter-slab layout (per layer): SLAB_ROWS x 128 lanes, f32 ----
# every block starts at lane 0; row offsets of the big weights are 8-aligned.
R_WQKV = 0                      # rows [0, D)          lanes [0, 3D)   (scale folded into Wq)
R_WO = DIM                      # rows [D, 2D)         lanes [0, D)
R_W1 = 2 * DIM                  # rows [2D, 3D)        lanes [0, FFN_HID)
R_W2 = 3 * DIM                  # rows [3D, 3D+FFN)    lanes [0, D)
R_BQKV = 3 * DIM + FFN_HID      # 1 row               lanes [0, 3D)
R_C1 = R_BQKV + 1               # 1 row               lanes [0, FFN_HID)
R_VEC = R_C1 + 1                # 6 rows              lanes [0, D): g1, be1, bo, g2, be2, c2
SLAB_ROWS = R_VEC + 6           # = 168 (divisible by 8)
SLAB_LANES = 128


def _encoder_kernel(x_ref, bias_ref, p_ref, o_ref, *, n_layers, n_heads):
    D = x_ref.shape[-1]
    hd = D // n_heads

    x = x_ref[...].astype(jnp.float32)        # (M, D), M = B*S
    bias = bias_ref[...]                      # (M, M) additive mask bias (f32)

    def layer_norm(v, g, b):
        mu = jnp.mean(v, axis=-1, keepdims=True)
        var = jnp.mean(jnp.square(v - mu), axis=-1, keepdims=True)
        return (v - mu) * jax.lax.rsqrt(var + LN_EPS) * g + b

    for L in range(n_layers):                 # static unroll; weights VMEM-resident
        lay = p_ref.at[L]                     # (SLAB_ROWS, 128) ref view, no load

        wqkv = lay[R_WQKV:R_WQKV + D, 0:3 * D]            # (D, 3D)
        w1 = lay[R_W1:R_W1 + D, 0:FFN_HID]                # (D, FFN)
        w2 = lay[R_W2:R_W2 + FFN_HID, 0:D]                # (FFN, D)
        bqkv = lay[R_BQKV:R_BQKV + 1, 0:3 * D]            # (1, 3D)
        c1 = lay[R_C1:R_C1 + 1, 0:FFN_HID]                # (1, FFN)
        g1 = lay[R_VEC + 0:R_VEC + 1, 0:D]
        be1 = lay[R_VEC + 1:R_VEC + 2, 0:D]
        bo = lay[R_VEC + 2:R_VEC + 3, 0:D]
        g2 = lay[R_VEC + 3:R_VEC + 4, 0:D]
        be2 = lay[R_VEC + 4:R_VEC + 5, 0:D]
        c2 = lay[R_VEC + 5:R_VEC + 6, 0:D]

        # ---- MultiHead (pre-norm on Q=K=V=x), flattened over batch ----
        xn = layer_norm(x, g1, be1)
        qkv = jnp.dot(xn, wqkv, preferred_element_type=jnp.float32) + bqkv   # (M, 3D)

        ctx = jnp.zeros_like(x)               # accumulates concat(heads) @ Wo
        for h in range(n_heads):              # static unroll over 4 heads
            lo, hi = h * hd, (h + 1) * hd
            qh = qkv[:, lo:hi]                          # (M, hd)
            kh = qkv[:, D + lo:D + hi]                  # (M, hd)
            vh = qkv[:, 2 * D + lo:2 * D + hi]          # (M, hd)
            # scores: one (M, M) MXU push; bias kills cross-batch + padded keys
            s = jax.lax.dot_general(qh, kh, (((1,), (1,)), ((), ())),
                                    preferred_element_type=jnp.float32) + bias
            s_max = jnp.max(s, axis=-1, keepdims=True)
            e = jnp.exp(s - s_max)
            inv = pl.reciprocal(jnp.sum(e, axis=-1, keepdims=True), approx=False)
            p = e * inv
            oh = jnp.dot(p, vh, preferred_element_type=jnp.float32)          # (M, hd)
            # Fold the "concat heads" into the output projection directly.
            wo_h = lay[R_WO + lo:R_WO + hi, 0:D]                             # (hd, D)
            ctx = ctx + jnp.dot(oh, wo_h, preferred_element_type=jnp.float32)

        y = x + ctx + bo                      # residual (dropout == identity)

        # ---- FullyConnectedOutput (pre-norm FFN) ----
        yn = layer_norm(y, g2, be2)
        h1 = jnp.maximum(
            jnp.dot(yn, w1, preferred_element_type=jnp.float32) + c1, 0.0)
        x = y + jnp.dot(h1, w2, preferred_element_type=jnp.float32) + c2

    o_ref[...] = x.astype(o_ref.dtype)


def pack_encoder_params(layer_params):
    """Pack every layer's 16 params into one lane-dense (n_layers, 168, 128) slab."""
    scale = 1.0 / (float(HEAD_DIM) ** 0.5)
    slabs = []
    for (wq, bq, wk, bk, wv, bv, wo, bo, g1, be1,
         w1, c1, w2, c2, g2, be2) in layer_params:
        wqkv = jnp.concatenate([wq * scale, wk, wv], axis=1)   # (D, 3D), scale folded
        bqkv = jnp.concatenate([bq * scale, bk, bv], axis=1)   # (1, 3D)
        vec = jnp.concatenate([g1, be1, bo, g2, be2, c2], axis=0)  # (6, D)
        slab = jnp.zeros((SLAB_ROWS, SLAB_LANES), jnp.float32)
        slab = slab.at[R_WQKV:R_WQKV + DIM, 0:3 * DIM].set(wqkv)
        slab = slab.at[R_WO:R_WO + DIM, 0:DIM].set(wo)
        slab = slab.at[R_W1:R_W1 + DIM, 0:FFN_HID].set(w1)
        slab = slab.at[R_W2:R_W2 + FFN_HID, 0:DIM].set(w2)
        slab = slab.at[R_BQKV, 0:3 * DIM].set(bqkv[0])
        slab = slab.at[R_C1, 0:FFN_HID].set(c1[0])
        slab = slab.at[R_VEC:R_VEC + 6, 0:DIM].set(vec)
        slabs.append(slab)
    return jnp.stack(slabs, axis=0)                            # (n_layers, 168, 128)


def build_attn_bias(mask, B, S):
    """Additive (M, M) bias: -1e30 for cross-batch pairs and padded keys, 0 otherwise."""
    M = B * S
    bi = jnp.arange(M) // S                     # batch id per flattened position
    si = jnp.arange(M) % S                      # seq position per flattened position
    same_batch = bi[:, None] == bi[None, :]
    key_masked = mask[bi[:, None], si[:, None], si[None, :]] > 0.5
    keep = same_batch & jnp.logical_not(key_masked)
    return jnp.where(keep, 0.0, MASK_NEG).astype(jnp.float32)


def encoder_pallas(x, mask, layer_params):
    B, S, D = x.shape
    assert D == DIM and D % N_HEADS == 0
    n_layers = len(layer_params)
    M = B * S

    slab = pack_encoder_params(layer_params)        # one weight DMA
    bias = build_attn_bias(mask, B, S)              # precomputed additive mask bias
    x2 = x.reshape(M, D)                            # flatten batch into matmul M dim

    kernel = functools.partial(_encoder_kernel, n_layers=n_layers, n_heads=N_HEADS)

    # Whole problem per grid step: x2 (2 KiB) + bias (1 KiB) + slab (~258 KiB)
    # + output (2 KiB), double-buffered, is << the 32 MiB scoped VMEM default
    # on v5e/v6e/v7x.  If B or S grow, split the batch axis across the grid
    # (and keep the per-step footprint within v7x's 64 MiB physical VMEM).
    out = pl.pallas_call(
        kernel,
        out_shape=jax.ShapeDtypeStruct((M, D), x.dtype),
        grid=(1,),
        in_specs=[
            pl.BlockSpec((M, D), lambda b: (0, 0)),          # activations
            pl.BlockSpec((M, M), lambda b: (0, 0)),          # attention bias
            pl.BlockSpec(slab.shape, lambda b: (0, 0, 0)),   # single weight slab
        ],
        out_specs=pl.BlockSpec((M, D), lambda b: (0, 0)),
        compiler_params=pltpu.CompilerParams(vmem_limit_bytes=32 * 1024 * 1024),
    )(x2, bias, slab)
    return out.reshape(B, S, D)


# ---------------- deterministic parameter construction ----------------
def make_layer_params(key):
    ks = jax.random.split(key, 8)
    s = 0.1

    def lin(k, fan_in, fan_out):
        kw, kb = jax.random.split(k)
        w = jax.random.normal(kw, (fan_in, fan_out), jnp.float32) * s
        b = jax.random.normal(kb, (1, fan_out), jnp.float32) * s
        return w, b

    wq, bq = lin(ks[0], DIM, DIM)
    wk, bk = lin(ks[1], DIM, DIM)
    wv, bv = lin(ks[2], DIM, DIM)
    wo, bo = lin(ks[3], DIM, DIM)
    g1 = jnp.ones((1, DIM), jnp.float32)       # LayerNorm gamma
    be1 = jnp.zeros((1, DIM), jnp.float32)     # LayerNorm beta
    w1, c1 = lin(ks[4], DIM, FFN_HID)
    w2, c2 = lin(ks[5], FFN_HID, DIM)
    g2 = jnp.ones((1, DIM), jnp.float32)
    be2 = jnp.zeros((1, DIM), jnp.float32)
    return [wq, bq, wk, bk, wv, bv, wo, bo, g1, be1, w1, c1, w2, c2, g2, be2]


# ---------------- pure-JAX reference (for correctness check) ----------------
def _layer_ref(x, mask, params):
    (wq, bq, wk, bk, wv, bv, wo, bo, g1, be1, w1, c1, w2, c2, g2, be2) = params

    def ln(v, g, b):
        mu = jnp.mean(v, -1, keepdims=True)
        var = jnp.mean(jnp.square(v - mu), -1, keepdims=True)
        return (v - mu) / jnp.sqrt(var + LN_EPS) * g + b

    B, S, D = x.shape
    xn = ln(x, g1, be1)
    q = xn @ wq + bq
    k = xn @ wk + bk
    v = xn @ wv + bv
    qh = q.reshape(B, S, N_HEADS, HEAD_DIM).transpose(0, 2, 1, 3)
    kh = k.reshape(B, S, N_HEADS, HEAD_DIM).transpose(0, 2, 1, 3)
    vh = v.reshape(B, S, N_HEADS, HEAD_DIM).transpose(0, 2, 1, 3)
    s = jnp.einsum('bhqd,bhkd->bhqk', qh, kh) / (HEAD_DIM ** 0.5)
    s = jnp.where(mask[:, None, :, :] > 0.5, -jnp.inf, s)
    p = jax.nn.softmax(s, axis=-1)
    a = jnp.einsum('bhqk,bhkd->bhqd', p, vh).transpose(0, 2, 1, 3).reshape(B, S, D)
    y = x + (a @ wo + bo)
    yn = ln(y, g2, be2)
    return y + (jax.nn.relu(yn @ w1 + c1) @ w2 + c2)


def encoder_ref(x, mask, layer_params):
    for params in layer_params:
        x = _layer_ref(x, mask, params)
    return x


if __name__ == "__main__":
    B, S = 2, 8
    key = jax.random.PRNGKey(0)
    kx, kp = jax.random.split(key)

    x = jax.random.normal(kx, (B, S, DIM), jnp.float32)

    # Key-padding-style mask: mask[b, i, j] = 1.0 iff key position j is padding.
    valid_lens = jnp.array([S, 5], jnp.int32)
    key_is_pad = (jnp.arange(S)[None, :] >= valid_lens[:, None])      # (B, S)
    mask = jnp.broadcast_to(key_is_pad[:, None, :], (B, S, S)).astype(jnp.float32)

    layer_params = [make_layer_params(k) for k in jax.random.split(kp, 3)]

    out = encoder_pallas(x, mask, layer_params)
    out = jax.block_until_ready(out)

    ref = encoder_ref(x, mask, layer_params)
    assert out.shape == (B, S, DIM)
    # Pure f32 math + exact softmax reciprocal: tight tolerance.
    assert jnp.allclose(out, ref, atol=1e-4, rtol=1e-4), "mismatch vs reference"

    print("KERNEL_OK")
</pallas_src>

<mosaic_0001>
module attributes {stable_mosaic.version = 11 : i64} {
  func.func @_encoder_kernel(%arg0: i32, %arg1: memref<16x32xf32, #tpu.memory_space<vmem>>, %arg2: memref<16x16xf32, #tpu.memory_space<vmem>>, %arg3: memref<3x168x128xf32, #tpu.memory_space<vmem>>, %arg4: memref<16x32xf32, #tpu.memory_space<vmem>>) attributes {dimension_semantics = [#tpu.dimension_semantics<arbitrary>], iteration_bounds = array<i64: 1>, scalar_prefetch = 0 : i64, scratch_operands = 0 : i64, tpu.core_type = #tpu.core_type<tc>, window_params = [{pipeline_mode = #tpu.pipeline_mode<synchronous>, transform_indices = @transform_0, window_bounds = array<i64: 16, 32>}, {pipeline_mode = #tpu.pipeline_mode<synchronous>, transform_indices = @transform_1, window_bounds = array<i64: 16, 16>}, {pipeline_mode = #tpu.pipeline_mode<synchronous>, transform_indices = @transform_2, window_bounds = array<i64: 3, 168, 128>}, {pipeline_mode = #tpu.pipeline_mode<synchronous>, transform_indices = @transform_3, window_bounds = array<i64: 16, 32>}]} {
    %c0 = arith.constant 0 : index
    %c0_0 = arith.constant 0 : index
    %0 = vector.load %arg1[%c0, %c0_0] : memref<16x32xf32, #tpu.memory_space<vmem>>, vector<16x32xf32>
    %c0_1 = arith.constant 0 : index
    %c0_2 = arith.constant 0 : index
    %1 = vector.load %arg2[%c0_1, %c0_2] : memref<16x16xf32, #tpu.memory_space<vmem>>, vector<16x16xf32>
    %c0_i32 = arith.constant 0 : i32
    %c0_i32_3 = arith.constant 0 : i32
    %c0_i32_4 = arith.constant 0 : i32
    %2 = tpu.memref_slice %arg3[%c0_i32, %c0_i32_3, %c0_i32_4] : memref<3x168x128xf32, #tpu.memory_space<vmem>> -> memref<1x168x128xf32, #tpu.memory_space<vmem>>
    %3 = tpu.memref_squeeze %2 : memref<1x168x128xf32, #tpu.memory_space<vmem>> -> memref<168x128xf32, #tpu.memory_space<vmem>>
    %c0_5 = arith.constant 0 : index
    %c0_6 = arith.constant 0 : index
    %4 = vector.load %3[%c0_5, %c0_6] : memref<168x128xf32, #tpu.memory_space<vmem>>, vector<32x96xf32>
    %c0_i32_7 = arith.constant 0 : i32
    %c0_i32_8 = arith.constant 0 : i32
    %c0_i32_9 = arith.constant 0 : i32
    %5 = tpu.memref_slice %arg3[%c0_i32_7, %c0_i32_8, %c0_i32_9] : memref<3x168x128xf32, #tpu.memory_space<vmem>> -> memref<1x168x128xf32, #tpu.memory_space<vmem>>
    %6 = tpu.memref_squeeze %5 : memref<1x168x128xf32, #tpu.memory_space<vmem>> -> memref<168x128xf32, #tpu.memory_space<vmem>>
    %c64 = arith.constant 64 : index
    %c0_10 = arith.constant 0 : index
    %7 = vector.load %6[%c64, %c0_10] : memref<168x128xf32, #tpu.memory_space<vmem>>, vector<32x64xf32>
    %c0_i32_11 = arith.constant 0 : i32
    %c0_i32_12 = arith.constant 0 : i32
    %c0_i32_13 = arith.constant 0 : i32
    %8 = tpu.memref_slice %arg3[%c0_i32_11, %c0_i32_12, %c0_i32_13] : memref<3x168x128xf32, #tpu.memory_space<vmem>> -> memref<1x168x128xf32, #tpu.memory_space<vmem>>
    %9 = tpu.memref_squeeze %8 : memref<1x168x128xf32, #tpu.memory_space<vmem>> -> memref<168x128xf32, #tpu.memory_space<vmem>>
    %c96 = arith.constant 96 : index
    %c0_14 = arith.constant 0 : index
    %10 = vector.load %9[%c96, %c0_14] : memref<168x128xf32, #tpu.memory_space<vmem>>, vector<64x32xf32>
    %c0_i32_15 = arith.constant 0 : i32
    %c0_i32_16 = arith.constant 0 : i32
    %c0_i32_17 = arith.constant 0 : i32
    %11 = tpu.memref_slice %arg3[%c0_i32_15, %c0_i32_16, %c0_i32_17] : memref<3x168x128xf32, #tpu.memory_space<vmem>> -> memref<1x168x128xf32, #tpu.memory_space<vmem>>
    %12 = tpu.memref_squeeze %11 : memref<1x168x128xf32, #tpu.memory_space<vmem>> -> memref<168x128xf32, #tpu.memory_space<vmem>>
    %c160 = arith.constant 160 : index
    %c0_18 = arith.constant 0 : index
    %13 = vector.load %12[%c160, %c0_18] : memref<168x128xf32, #tpu.memory_space<vmem>>, vector<1x96xf32>
    %c0_i32_19 = arith.constant 0 : i32
    %c0_i32_20 = arith.constant 0 : i32
    %c0_i32_21 = arith.constant 0 : i32
    %14 = tpu.memref_slice %arg3[%c0_i32_19, %c0_i32_20, %c0_i32_21] : memref<3x168x128xf32, #tpu.memory_space<vmem>> -> memref<1x168x128xf32, #tpu.memory_space<vmem>>
    %15 = tpu.memref_squeeze %14 : memref<1x168x128xf32, #tpu.memory_space<vmem>> -> memref<168x128xf32, #tpu.memory_space<vmem>>
    %c161 = arith.constant 161 : index
    %c0_22 = arith.constant 0 : index
    %16 = vector.load %15[%c161, %c0_22] : memref<168x128xf32, #tpu.memory_space<vmem>>, vector<1x64xf32>
    %c0_i32_23 = arith.constant 0 : i32
    %c0_i32_24 = arith.constant 0 : i32
    %c0_i32_25 = arith.constant 0 : i32
    %17 = tpu.memref_slice %arg3[%c0_i32_23, %c0_i32_24, %c0_i32_25] : memref<3x168x128xf32, #tpu.memory_space<vmem>> -> memref<1x168x128xf32, #tpu.memory_space<vmem>>
    %18 = tpu.memref_squeeze %17 : memref<1x168x128xf32, #tpu.memory_space<vmem>> -> memref<168x128xf32, #tpu.memory_space<vmem>>
    %c162 = arith.constant 162 : index
    %c0_26 = arith.constant 0 : index
    %19 = vector.load %18[%c162, %c0_26] : memref<168x128xf32, #tpu.memory_space<vmem>>, vector<1x32xf32>
    %c0_i32_27 = arith.constant 0 : i32
    %c0_i32_28 = arith.constant 0 : i32
    %c0_i32_29 = arith.constant 0 : i32
    %20 = tpu.memref_slice %arg3[%c0_i32_27, %c0_i32_28, %c0_i32_29] : memref<3x168x128xf32, #tpu.memory_space<vmem>> -> memref<1x168x128xf32, #tpu.memory_space<vmem>>
    %21 = tpu.memref_squeeze %20 : memref<1x168x128xf32, #tpu.memory_space<vmem>> -> memref<168x128xf32, #tpu.memory_space<vmem>>
    %c163 = arith.constant 163 : index
    %c0_30 = arith.constant 0 : index
    %22 = vector.load %21[%c163, %c0_30] : memref<168x128xf32, #tpu.memory_space<vmem>>, vector<1x32xf32>
    %c0_i32_31 = arith.constant 0 : i32
    %c0_i32_32 = arith.constant 0 : i32
    %c0_i32_33 = arith.constant 0 : i32
    %23 = tpu.memref_slice %arg3[%c0_i32_31, %c0_i32_32, %c0_i32_33] : memref<3x168x128xf32, #tpu.memory_space<vmem>> -> memref<1x168x128xf32, #tpu.memory_space<vmem>>
    %24 = tpu.memref_squeeze %23 : memref<1x168x128xf32, #tpu.memory_space<vmem>> -> memref<168x128xf32, #tpu.memory_space<vmem>>
    %c164 = arith.constant 164 : index
    %c0_34 = arith.constant 0 : index
    %25 = vector.load %24[%c164, %c0_34] : memref<168x128xf32, #tpu.memory_space<vmem>>, vector<1x32xf32>
    %c0_i32_35 = arith.constant 0 : i32
    %c0_i32_36 = arith.constant 0 : i32
    %c0_i32_37 = arith.constant 0 : i32
    %26 = tpu.memref_slice %arg3[%c0_i32_35, %c0_i32_36, %c0_i32_37] : memref<3x168x128xf32, #tpu.memory_space<vmem>> -> memref<1x168x128xf32, #tpu.memory_space<vmem>>
    %27 = tpu.memref_squeeze %26 : memref<1x168x128xf32, #tpu.memory_space<vmem>> -> memref<168x128xf32, #tpu.memory_space<vmem>>
    %c165 = arith.constant 165 : index
    %c0_38 = arith.constant 0 : index
    %28 = vector.load %27[%c165, %c0_38] : memref<168x128xf32, #tpu.memory_space<vmem>>, vector<1x32xf32>
    %c0_i32_39 = arith.constant 0 : i32
    %c0_i32_40 = arith.constant 0 : i32
    %c0_i32_41 = arith.constant 0 : i32
    %29 = tpu.memref_slice %arg3[%c0_i32_39, %c0_i32_40, %c0_i32_41] : memref<3x168x128xf32, #tpu.memory_space<vmem>> -> memref<1x168x128xf32, #tpu.memory_space<vmem>>
    %30 = tpu.memref_squeeze %29 : memref<1x168x128xf32, #tpu.memory_space<vmem>> -> memref<168x128xf32, #tpu.memory_space<vmem>>
    %c166 = arith.constant 166 : index
    %c0_42 = arith.constant 0 : index
    %31 = vector.load %30[%c166, %c0_42] : memref<168x128xf32, #tpu.memory_space<vmem>>, vector<1x32xf32>
    %c0_i32_43 = arith.constant 0 : i32
    %c0_i32_44 = arith.constant 0 : i32
    %c0_i32_45 = arith.constant 0 : i32
    %32 = tpu.memref_slice %arg3[%c0_i32_43, %c0_i32_44, %c0_i32_45] : memref<3x168x128xf32, #tpu.memory_space<vmem>> -> memref<1x168x128xf32, #tpu.memory_space<vmem>>
    %33 = tpu.memref_squeeze %32 : memref<1x168x128xf32, #tpu.memory_space<vmem>> -> memref<168x128xf32, #tpu.memory_space<vmem>>
    %c167 = arith.constant 167 : index
    %c0_46 = arith.constant 0 : index
    %34 = vector.load %33[%c167, %c0_46] : memref<168x128xf32, #tpu.memory_space<vmem>>, vector<1x32xf32>
    %cst = arith.constant dense<0.000000e+00> : vector<16xf32>
    %35 = vector.multi_reduction <add>, %0, %cst [1] : vector<16x32xf32> to vector<16xf32>
    %36 = vector.shape_cast %35 : vector<16xf32> to vector<16x1xf32>
    %cst_47 = arith.constant 3.200000e+01 : f32
    %37 = vector.broadcast %cst_47 : f32 to vector<16x1xf32>
    %38 = arith.divf %36, %37 : vector<16x1xf32>
    %39 = vector.broadcast %38 : vector<16x1xf32> to vector<16x32xf32>
    %40 = arith.subf %0, %39 : vector<16x32xf32>
    %41 = arith.mulf %40, %40 : vector<16x32xf32>
    %cst_48 = arith.constant dense<0.000000e+00> : vector<16xf32>
    %42 = vector.multi_reduction <add>, %41, %cst_48 [1] : vector<16x32xf32> to vector<16xf32>
    %43 = vector.shape_cast %42 : vector<16xf32> to vector<16x1xf32>
    %cst_49 = arith.constant 3.200000e+01 : f32
    %44 = vector.broadcast %cst_49 : f32 to vector<16x1xf32>
    %45 = arith.divf %43, %44 : vector<16x1xf32>
    %46 = vector.broadcast %38 : vector<16x1xf32> to vector<16x32xf32>
    %47 = arith.subf %0, %46 : vector<16x32xf32>
    %cst_50 = arith.constant 9.99999974E-6 : f32
    %48 = vector.broadcast %cst_50 : f32 to vector<16x1xf32>
    %49 = arith.addf %45, %48 : vector<16x1xf32>
    %50 = math.rsqrt %49 : vector<16x1xf32>
    %51 = vector.broadcast %50 : vector<16x1xf32> to vector<16x32xf32>
    %52 = arith.mulf %47, %51 : vector<16x32xf32>
    %53 = vector.broadcast %19 : vector<1x32xf32> to vector<16x32xf32>
    %54 = arith.mulf %52, %53 : vector<16x32xf32>
    %55 = vector.broadcast %22 : vector<1x32xf32> to vector<16x32xf32>
    %56 = arith.addf %54, %55 : vector<16x32xf32>
    %cst_51 = arith.constant dense<0.000000e+00> : vector<16x96xf32>
    %57 = tpu.matmul %56, %4, %cst_51 {dimension_numbers = #tpu.dot_dimension_numbers<[1], [0], [0], [1], [0, 0, 1, 1], [], []>} : vector<16x32xf32>, vector<32x96xf32>, vector<16x96xf32> -> vector<16x96xf32>
    %58 = vector.broadcast %13 : vector<1x96xf32> to vector<16x96xf32>
    %59 = arith.addf %57, %58 : vector<16x96xf32>
    %cst_52 = arith.constant 0.000000e+00 : f32
    %60 = vector.broadcast %cst_52 : f32 to vector<16x32xf32>
    %61 = vector.extract_strided_slice %59 {offsets = [0, 0], sizes = [16, 8], strides = [1, 1]} : vector<16x96xf32> to vector<16x8xf32>
    %62 = vector.extract_strided_slice %59 {offsets = [0, 32], sizes = [16, 8], strides = [1, 1]} : vector<16x96xf32> to vector<16x8xf32>
    %63 = vector.extract_strided_slice %59 {offsets = [0, 64], sizes = [16, 8], strides = [1, 1]} : vector<16x96xf32> to vector<16x8xf32>
    %cst_53 = arith.constant dense<0.000000e+00> : vector<16x16xf32>
    %64 = tpu.matmul %61, %62, %cst_53 {dimension_numbers = #tpu.dot_dimension_numbers<[1], [1], [0], [0], [0, 0, 1, 0], [], []>} : vector<16x8xf32>, vector<16x8xf32>, vector<16x16xf32> -> vector<16x16xf32>
    %65 = arith.addf %64, %1 : vector<16x16xf32>
    %cst_54 = arith.constant dense<0xFF800000> : vector<16xf32>
    %66 = vector.multi_reduction <maximumf>, %65, %cst_54 [1] : vector<16x16xf32> to vector<16xf32>
    %67 = vector.shape_cast %66 : vector<16xf32> to vector<16x1xf32>
    %68 = vector.broadcast %67 : vector<16x1xf32> to vector<16x16xf32>
    %69 = arith.subf %65, %68 : vector<16x16xf32>
    %70 = math.exp %69 : vector<16x16xf32>
    %cst_55 = arith.constant dense<0.000000e+00> : vector<16xf32>
    %71 = vector.multi_reduction <add>, %70, %cst_55 [1] : vector<16x16xf32> to vector<16xf32>
    %72 = vector.shape_cast %71 : vector<16xf32> to vector<16x1xf32>
    %73 = tpu.reciprocal %72 : vector<16x1xf32> -> vector<16x1xf32>
    %74 = vector.broadcast %73 : vector<16x1xf32> to vector<16x16xf32>
    %75 = arith.mulf %70, %74 : vector<16x16xf32>
    %cst_56 = arith.constant dense<0.000000e+00> : vector<16x8xf32>
    %76 = tpu.matmul %75, %63, %cst_56 {dimension_numbers = #tpu.dot_dimension_numbers<[1], [0], [0], [1], [0, 0, 1, 1], [], []>} : vector<16x16xf32>, vector<16x8xf32>, vector<16x8xf32> -> vector<16x8xf32>
    %c0_i32_57 = arith.constant 0 : i32
    %c0_i32_58 = arith.constant 0 : i32
    %c0_i32_59 = arith.constant 0 : i32
    %77 = tpu.memref_slice %arg3[%c0_i32_57, %c0_i32_58, %c0_i32_59] : memref<3x168x128xf32, #tpu.memory_space<vmem>> -> memref<1x168x128xf32, #tpu.memory_space<vmem>>
    %78 = tpu.memref_squeeze %77 : memref<1x168x128xf32, #tpu.memory_space<vmem>> -> memref<168x128xf32, #tpu.memory_space<vmem>>
    %c32 = arith.constant 32 : index
    %c0_60 = arith.constant 0 : index
    %79 = vector.load %78[%c32, %c0_60] : memref<168x128xf32, #tpu.memory_space<vmem>>, vector<8x32xf32>
    %cst_61 = arith.constant dense<0.000000e+00> : vector<16x32xf32>
    %80 = tpu.matmul %76, %79, %cst_61 {dimension_numbers = #tpu.dot_dimension_numbers<[1], [0], [0], [1], [0, 0, 1, 1], [], []>} : vector<16x8xf32>, vector<8x32xf32>, vector<16x32xf32> -> vector<16x32xf32>
    %81 = arith.addf %60, %80 : vector<16x32xf32>
    %82 = vector.extract_strided_slice %59 {offsets = [0, 8], sizes = [16, 8], strides = [1, 1]} : vector<16x96xf32> to vector<16x8xf32>
    %83 = vector.extract_strided_slice %59 {offsets = [0, 40], sizes = [16, 8], strides = [1, 1]} : vector<16x96xf32> to vector<16x8xf32>
    %84 = vector.extract_strided_slice %59 {offsets = [0, 72], sizes = [16, 8], strides = [1, 1]} : vector<16x96xf32> to vector<16x8xf32>
    %cst_62 = arith.constant dense<0.000000e+00> : vector<16x16xf32>
    %85 = tpu.matmul %82, %83, %cst_62 {dimension_numbers = #tpu.dot_dimension_numbers<[1], [1], [0], [0], [0, 0, 1, 0], [], []>} : vector<16x8xf32>, vector<16x8xf32>, vector<16x16xf32> -> vector<16x16xf32>
    %86 = arith.addf %85, %1 : vector<16x16xf32>
    %cst_63 = arith.constant dense<0xFF800000> : vector<16xf32>
    %87 = vector.multi_reduction <maximumf>, %86, %cst_63 [1] : vector<16x16xf32> to vector<16xf32>
    %88 = vector.shape_cast %87 : vector<16xf32> to vector<16x1xf32>
    %89 = vector.broadcast %88 : vector<16x1xf32> to vector<16x16xf32>
    %90 = arith.subf %86, %89 : vector<16x16xf32>
    %91 = math.exp %90 : vector<16x16xf32>
    %cst_64 = arith.constant dense<0.000000e+00> : vector<16xf32>
    %92 = vector.multi_reduction <add>, %91, %cst_64 [1] : vector<16x16xf32> to vector<16xf32>
    %93 = vector.shape_cast %92 : vector<16xf32> to vector<16x1xf32>
    %94 = tpu.reciprocal %93 : vector<16x1xf32> -> vector<16x1xf32>
    %95 = vector.broadcast %94 : vector<16x1xf32> to vector<16x16xf32>
    %96 = arith.mulf %91, %95 : vector<16x16xf32>
    %cst_65 = arith.constant dense<0.000000e+00> : vector<16x8xf32>
    %97 = tpu.matmul %96, %84, %cst_65 {dimension_numbers = #tpu.dot_dimension_numbers<[1], [0], [0], [1], [0, 0, 1, 1], [], []>} : vector<16x16xf32>, vector<16x8xf32>, vector<16x8xf32> -> vector<16x8xf32>
    %c0_i32_66 = arith.constant 0 : i32
    %c0_i32_67 = arith.constant 0 : i32
    %c0_i32_68 = arith.constant 0 : i32
    %98 = tpu.memref_slice %arg3[%c0_i32_66, %c0_i32_67, %c0_i32_68] : memref<3x168x128xf32, #tpu.memory_space<vmem>> -> memref<1x168x128xf32, #tpu.memory_space<vmem>>
    %99 = tpu.memref_squeeze %98 : memref<1x168x128xf32, #tpu.memory_space<vmem>> -> memref<168x128xf32, #tpu.memory_space<vmem>>
    %c40 = arith.constant 40 : index
    %c0_69 = arith.constant 0 : index
    %100 = vector.load %99[%c40, %c0_69] : memref<168x128xf32, #tpu.memory_space<vmem>>, vector<8x32xf32>
    %cst_70 = arith.constant dense<0.000000e+00> : vector<16x32xf32>
    %101 = tpu.matmul %97, %100, %cst_70 {dimension_numbers = #tpu.dot_dimension_numbers<[1], [0], [0], [1], [0, 0, 1, 1], [], []>} : vector<16x8xf32>, vector<8x32xf32>, vector<16x32xf32> -> vector<16x32xf32>
    %102 = arith.addf %81, %101 : vector<16x32xf32>
    %103 = vector.extract_strided_slice %59 {offsets = [0, 16], sizes = [16, 8], strides = [1, 1]} : vector<16x96xf32> to vector<16x8xf32>
    %104 = vector.extract_strided_slice %59 {offsets = [0, 48], sizes = [16, 8], strides = [1, 1]} : vector<16x96xf32> to vector<16x8xf32>
    %105 = vector.extract_strided_slice %59 {offsets = [0, 80], sizes = [16, 8], strides = [1, 1]} : vector<16x96xf32> to vector<16x8xf32>
    %cst_71 = arith.constant dense<0.000000e+00> : vector<16x16xf32>
    %106 = tpu.matmul %103, %104, %cst_71 {dimension_numbers = #tpu.dot_dimension_numbers<[1], [1], [0], [0], [0, 0, 1, 0], [], []>} : vector<16x8xf32>, vector<16x8xf32>, vector<16x16xf32> -> vector<16x16xf32>
    %107 = arith.addf %106, %1 : vector<16x16xf32>
    %cst_72 = arith.constant dense<0xFF800000> : vector<16xf32>
    %108 = vector.multi_reduction <maximumf>, %107, %cst_72 [1] : vector<16x16xf32> to vector<16xf32>
    %109 = vector.shape_cast %108 : vector<16xf32> to vector<16x1xf32>
    %110 = vector.broadcast %109 : vector<16x1xf32> to vector<16x16xf32>
    %111 = arith.subf %107, %110 : vector<16x16xf32>
    %112 = math.exp %111 : vector<16x16xf32>
    %cst_73 = arith.constant dense<0.000000e+00> : vector<16xf32>
    %113 = vector.multi_reduction <add>, %112, %cst_73 [1] : vector<16x16xf32> to vector<16xf32>
    %114 = vector.shape_cast %113 : vector<16xf32> to vector<16x1xf32>
    %115 = tpu.reciprocal %114 : vector<16x1xf32> -> vector<16x1xf32>
    %116 = vector.broadcast %115 : vector<16x1xf32> to vector<16x16xf32>
    %117 = arith.mulf %112, %116 : vector<16x16xf32>
    %cst_74 = arith.constant dense<0.000000e+00> : vector<16x8xf32>
    %118 = tpu.matmul %117, %105, %cst_74 {dimension_numbers = #tpu.dot_dimension_numbers<[1], [0], [0], [1], [0, 0, 1, 1], [], []>} : vector<16x16xf32>, vector<16x8xf32>, vector<16x8xf32> -> vector<16x8xf32>
    %c0_i32_75 = arith.constant 0 : i32
    %c0_i32_76 = arith.constant 0 : i32
    %c0_i32_77 = arith.constant 0 : i32
    %119 = tpu.memref_slice %arg3[%c0_i32_75, %c0_i32_76, %c0_i32_77] : memref<3x168x128xf32, #tpu.memory_space<vmem>> -> memref<1x168x128xf32, #tpu.memory_space<vmem>>
    %120 = tpu.memref_squeeze %119 : memref<1x168x128xf32, #tpu.memory_space<vmem>> -> memref<168x128xf32, #tpu.memory_space<vmem>>
    %c48 = arith.constant 48 : index
    %c0_78 = arith.constant 0 : index
    %121 = vector.load %120[%c48, %c0_78] : memref<168x128xf32, #tpu.memory_space<vmem>>, vector<8x32xf32>
    %cst_79 = arith.constant dense<0.000000e+00> : vector<16x32xf32>
    %122 = tpu.matmul %118, %121, %cst_79 {dimension_numbers = #tpu.dot_dimension_numbers<[1], [0], [0], [1], [0, 0, 1, 1], [], []>} : vector<16x8xf32>, vector<8x32xf32>, vector<16x32xf32> -> vector<16x32xf32>
    %123 = arith.addf %102, %122 : vector<16x32xf32>
    %124 = vector.extract_strided_slice %59 {offsets = [0, 24], sizes = [16, 8], strides = [1, 1]} : vector<16x96xf32> to vector<16x8xf32>
    %125 = vector.extract_strided_slice %59 {offsets = [0, 56], sizes = [16, 8], strides = [1, 1]} : vector<16x96xf32> to vector<16x8xf32>
    %126 = vector.extract_strided_slice %59 {offsets = [0, 88], sizes = [16, 8], strides = [1, 1]} : vector<16x96xf32> to vector<16x8xf32>
    %cst_80 = arith.constant dense<0.000000e+00> : vector<16x16xf32>
    %127 = tpu.matmul %124, %125, %cst_80 {dimension_numbers = #tpu.dot_dimension_numbers<[1], [1], [0], [0], [0, 0, 1, 0], [], []>} : vector<16x8xf32>, vector<16x8xf32>, vector<16x16xf32> -> vector<16x16xf32>
    %128 = arith.addf %127, %1 : vector<16x16xf32>
    %cst_81 = arith.constant dense<0xFF800000> : vector<16xf32>
    %129 = vector.multi_reduction <maximumf>, %128, %cst_81 [1] : vector<16x16xf32> to vector<16xf32>
    %130 = vector.shape_cast %129 : vector<16xf32> to vector<16x1xf32>
    %131 = vector.broadcast %130 : vector<16x1xf32> to vector<16x16xf32>
    %132 = arith.subf %128, %131 : vector<16x16xf32>
    %133 = math.exp %132 : vector<16x16xf32>
    %cst_82 = arith.constant dense<0.000000e+00> : vector<16xf32>
    %134 = vector.multi_reduction <add>, %133, %cst_82 [1] : vector<16x16xf32> to vector<16xf32>
    %135 = vector.shape_cast %134 : vector<16xf32> to vector<16x1xf32>
    %136 = tpu.reciprocal %135 : vector<16x1xf32> -> vector<16x1xf32>
    %137 = vector.broadcast %136 : vector<16x1xf32> to vector<16x16xf32>
    %138 = arith.mulf %133, %137 : vector<16x16xf32>
    %cst_83 = arith.constant dense<0.000000e+00> : vector<16x8xf32>
    %139 = tpu.matmul %138, %126, %cst_83 {dimension_numbers = #tpu.dot_dimension_numbers<[1], [0], [0], [1], [0, 0, 1, 1], [], []>} : vector<16x16xf32>, vector<16x8xf32>, vector<16x8xf32> -> vector<16x8xf32>
    %c0_i32_84 = arith.constant 0 : i32
    %c0_i32_85 = arith.constant 0 : i32
    %c0_i32_86 = arith.constant 0 : i32
    %140 = tpu.memref_slice %arg3[%c0_i32_84, %c0_i32_85, %c0_i32_86] : memref<3x168x128xf32, #tpu.memory_space<vmem>> -> memref<1x168x128xf32, #tpu.memory_space<vmem>>
    %141 = tpu.memref_squeeze %140 : memref<1x168x128xf32, #tpu.memory_space<vmem>> -> memref<168x128xf32, #tpu.memory_space<vmem>>
    %c56 = arith.constant 56 : index
    %c0_87 = arith.constant 0 : index
    %142 = vector.load %141[%c56, %c0_87] : memref<168x128xf32, #tpu.memory_space<vmem>>, vector<8x32xf32>
    %cst_88 = arith.constant dense<0.000000e+00> : vector<16x32xf32>
    %143 = tpu.matmul %139, %142, %cst_88 {dimension_numbers = #tpu.dot_dimension_numbers<[1], [0], [0], [1], [0, 0, 1, 1], [], []>} : vector<16x8xf32>, vector<8x32xf32>, vector<16x32xf32> -> vector<16x32xf32>
    %144 = arith.addf %123, %143 : vector<16x32xf32>
    %145 = arith.addf %0, %144 : vector<16x32xf32>
    %146 = vector.broadcast %25 : vector<1x32xf32> to vector<16x32xf32>
    %147 = arith.addf %145, %146 : vector<16x32xf32>
    %cst_89 = arith.constant dense<0.000000e+00> : vector<16xf32>
    %148 = vector.multi_reduction <add>, %147, %cst_89 [1] : vector<16x32xf32> to vector<16xf32>
    %149 = vector.shape_cast %148 : vector<16xf32> to vector<16x1xf32>
    %cst_90 = arith.constant 3.200000e+01 : f32
    %150 = vector.broadcast %cst_90 : f32 to vector<16x1xf32>
    %151 = arith.divf %149, %150 : vector<16x1xf32>
    %152 = vector.broadcast %151 : vector<16x1xf32> to vector<16x32xf32>
    %153 = arith.subf %147, %152 : vector<16x32xf32>
    %154 = arith.mulf %153, %153 : vector<16x32xf32>
    %cst_91 = arith.constant dense<0.000000e+00> : vector<16xf32>
    %155 = vector.multi_reduction <add>, %154, %cst_91 [1] : vector<16x32xf32> to vector<16xf32>
    %156 = vector.shape_cast %155 : vector<16xf32> to vector<16x1xf32>
    %cst_92 = arith.constant 3.200000e+01 : f32
    %157 = vector.broadcast %cst_92 : f32 to vector<16x1xf32>
    %158 = arith.divf %156, %157 : vector<16x1xf32>
    %159 = vector.broadcast %151 : vector<16x1xf32> to vector<16x32xf32>
    %160 = arith.subf %147, %159 : vector<16x32xf32>
    %cst_93 = arith.constant 9.99999974E-6 : f32
    %161 = vector.broadcast %cst_93 : f32 to vector<16x1xf32>
    %162 = arith.addf %158, %161 : vector<16x1xf32>
    %163 = math.rsqrt %162 : vector<16x1xf32>
    %164 = vector.broadcast %163 : vector<16x1xf32> to vector<16x32xf32>
    %165 = arith.mulf %160, %164 : vector<16x32xf32>
    %166 = vector.broadcast %28 : vector<1x32xf32> to vector<16x32xf32>
    %167 = arith.mulf %165, %166 : vector<16x32xf32>
    %168 = vector.broadcast %31 : vector<1x32xf32> to vector<16x32xf32>
    %169 = arith.addf %167, %168 : vector<16x32xf32>
    %cst_94 = arith.constant dense<0.000000e+00> : vector<16x64xf32>
    %170 = tpu.matmul %169, %7, %cst_94 {dimension_numbers = #tpu.dot_dimension_numbers<[1], [0], [0], [1], [0, 0, 1, 1], [], []>} : vector<16x32xf32>, vector<32x64xf32>, vector<16x64xf32> -> vector<16x64xf32>
    %171 = vector.broadcast %16 : vector<1x64xf32> to vector<16x64xf32>
    %172 = arith.addf %170, %171 : vector<16x64xf32>
    %cst_95 = arith.constant 0.000000e+00 : f32
    %173 = vector.broadcast %cst_95 : f32 to vector<16x64xf32>
    %174 = arith.maximumf %172, %173 : vector<16x64xf32>
    %cst_96 = arith.constant dense<0.000000e+00> : vector<16x32xf32>
    %175 = tpu.matmul %174, %10, %cst_96 {dimension_numbers = #tpu.dot_dimension_numbers<[1], [0], [0], [1], [0, 0, 1, 1], [], []>} : vector<16x64xf32>, vector<64x32xf32>, vector<16x32xf32> -> vector<16x32xf32>
    %176 = arith.addf %147, %175 : vector<16x32xf32>
    %177 = vector.broadcast %34 : vector<1x32xf32> to vector<16x32xf32>
    %178 = arith.addf %176, %177 : vector<16x32xf32>
    %c1_i32 = arith.constant 1 : i32
    %c0_i32_97 = arith.constant 0 : i32
    %c0_i32_98 = arith.constant 0 : i32
    %179 = tpu.memref_slice %arg3[%c1_i32, %c0_i32_97, %c0_i32_98] : memref<3x168x128xf32, #tpu.memory_space<vmem>> -> memref<1x168x128xf32, #tpu.memory_space<vmem>>
    %180 = tpu.memref_squeeze %179 : memref<1x168x128xf32, #tpu.memory_space<vmem>> -> memref<168x128xf32, #tpu.memory_space<vmem>>
    %c0_99 = arith.constant 0 : index
    %c0_100 = arith.constant 0 : index
    %181 = vector.load %180[%c0_99, %c0_100] : memref<168x128xf32, #tpu.memory_space<vmem>>, vector<32x96xf32>
    %c1_i32_101 = arith.constant 1 : i32
    %c0_i32_102 = arith.constant 0 : i32
    %c0_i32_103 = arith.constant 0 : i32
    %182 = tpu.memref_slice %arg3[%c1_i32_101, %c0_i32_102, %c0_i32_103] : memref<3x168x128xf32, #tpu.memory_space<vmem>> -> memref<1x168x128xf32, #tpu.memory_space<vmem>>
    %183 = tpu.memref_squeeze %182 : memref<1x168x128xf32, #tpu.memory_space<vmem>> -> memref<168x128xf32, #tpu.memory_space<vmem>>
    %c64_104 = arith.constant 64 : index
    %c0_105 = arith.constant 0 : index
    %184 = vector.load %183[%c64_104, %c0_105] : memref<168x128xf32, #tpu.memory_space<vmem>>, vector<32x64xf32>
    %c1_i32_106 = arith.constant 1 : i32
    %c0_i32_107 = arith.constant 0 : i32
    %c0_i32_108 = arith.constant 0 : i32
    %185 = tpu.memref_slice %arg3[%c1_i32_106, %c0_i32_107, %c0_i32_108] : memref<3x168x128xf32, #tpu.memory_space<vmem>> -> memref<1x168x128xf32, #tpu.memory_space<vmem>>
    %186 = tpu.memref_squeeze %185 : memref<1x168x128xf32, #tpu.memory_space<vmem>> -> memref<168x128xf32, #tpu.memory_space<vmem>>
    %c96_109 = arith.constant 96 : index
    %c0_110 = arith.constant 0 : index
    %187 = vector.load %186[%c96_109, %c0_110] : memref<168x128xf32, #tpu.memory_space<vmem>>, vector<64x32xf32>
    %c1_i32_111 = arith.constant 1 : i32
    %c0_i32_112 = arith.constant 0 : i32
    %c0_i32_113 = arith.constant 0 : i32
    %188 = tpu.memref_slice %arg3[%c1_i32_111, %c0_i32_112, %c0_i32_113] : memref<3x168x128xf32, #tpu.memory_space<vmem>> -> memref<1x168x128xf32, #tpu.memory_space<vmem>>
    %189 = tpu.memref_squeeze %188 : memref<1x168x128xf32, #tpu.memory_space<vmem>> -> memref<168x128xf32, #tpu.memory_space<vmem>>
    %c160_114 = arith.constant 160 : index
    %c0_115 = arith.constant 0 : index
    %190 = vector.load %189[%c160_114, %c0_115] : memref<168x128xf32, #tpu.memory_space<vmem>>, vector<1x96xf32>
    %c1_i32_116 = arith.constant 1 : i32
    %c0_i32_117 = arith.constant 0 : i32
    %c0_i32_118 = arith.constant 0 : i32
    %191 = tpu.memref_slice %arg3[%c1_i32_116, %c0_i32_117, %c0_i32_118] : memref<3x168x128xf32, #tpu.memory_space<vmem>> -> memref<1x168x128xf32, #tpu.memory_space<vmem>>
    %192 = tpu.memref_squeeze %191 : memref<1x168x128xf32, #tpu.memory_space<vmem>> -> memref<168x128xf32, #tpu.memory_space<vmem>>
    %c161_119 = arith.constant 161 : index
    %c0_120 = arith.constant 0 : index
    %193 = vector.load %192[%c161_119, %c0_120] : memref<168x128xf32, #tpu.memory_space<vmem>>, vector<1x64xf32>
    %c1_i32_121 = arith.constant 1 : i32
    %c0_i32_122 = arith.constant 0 : i32
    %c0_i32_123 = arith.constant 0 : i32
    %194 = tpu.memref_slice %arg3[%c1_i32_121, %c0_i32_122, %c0_i32_123] : memref<3x168x128xf32, #tpu.memory_space<vmem>> -> memref<1x168x128xf32, #tpu.memory_space<vmem>>
    %195 = tpu.memref_squeeze %194 : memref<1x168x128xf32, #tpu.memory_space<vmem>> -> memref<168x128xf32, #tpu.memory_space<vmem>>
    %c162_124 = arith.constant 162 : index
    %c0_125 = arith.constant 0 : index
    %196 = vector.load %195[%c162_124, %c0_125] : memref<168x128xf32, #tpu.memory_space<vmem>>, vector<1x32xf32>
    %c1_i32_126 = arith.constant 1 : i32
    %c0_i32_127 = arith.constant 0 : i32
    %c0_i32_128 = arith.constant 0 : i32
    %197 = tpu.memref_slice %arg3[%c1_i32_126, %c0_i32_127, %c0_i32_128] : memref<3x168x128xf32, #tpu.memory_space<vmem>> -> memref<1x168x128xf32, #tpu.memory_space<vmem>>
    %198 = tpu.memref_squeeze %197 : memref<1x168x128xf32, #tpu.memory_space<vmem>> -> memref<168x128xf32, #tpu.memory_space<vmem>>
    %c163_129 = arith.constant 163 : index
    %c0_130 = arith.constant 0 : index
    %199 = vector.load %198[%c163_129, %c0_130] : memref<168x128xf32, #tpu.memory_space<vmem>>, vector<1x32xf32>
    %c1_i32_131 = arith.constant 1 : i32
    %c0_i32_132 = arith.constant 0 : i32
    %c0_i32_133 = arith.constant 0 : i32
    %200 = tpu.memref_slice %arg3[%c1_i32_131, %c0_i32_132, %c0_i32_133] : memref<3x168x128xf32, #tpu.memory_space<vmem>> -> memref<1x168x128xf32, #tpu.memory_space<vmem>>
    %201 = tpu.memref_squeeze %200 : memref<1x168x128xf32, #tpu.memory_space<vmem>> -> memref<168x128xf32, #tpu.memory_space<vmem>>
    %c164_134 = arith.constant 164 : index
    %c0_135 = arith.constant 0 : index
    %202 = vector.load %201[%c164_134, %c0_135] : memref<168x128xf32, #tpu.memory_space<vmem>>, vector<1x32xf32>
    %c1_i32_136 = arith.constant 1 : i32
    %c0_i32_137 = arith.constant 0 : i32
    %c0_i32_138 = arith.constant 0 : i32
    %203 = tpu.memref_slice %arg3[%c1_i32_136, %c0_i32_137, %c0_i32_138] : memref<3x168x128xf32, #tpu.memory_space<vmem>> -> memref<1x168x128xf32, #tpu.memory_space<vmem>>
    %204 = tpu.memref_squeeze %203 : memref<1x168x128xf32, #tpu.memory_space<vmem>> -> memref<168x128xf32, #tpu.memory_space<vmem>>
    %c165_139 = arith.constant 165 : index
    %c0_140 = arith.constant 0 : index
    %205 = vector.load %204[%c165_139, %c0_140] : memref<168x128xf32, #tpu.memory_space<vmem>>, vector<1x32xf32>
    %c1_i32_141 = arith.constant 1 : i32
    %c0_i32_142 = arith.constant 0 : i32
    %c0_i32_143 = arith.constant 0 : i32
    %206 = tpu.memref_slice %arg3[%c1_i32_141, %c0_i32_142, %c0_i32_143] : memref<3x168x128xf32, #tpu.memory_space<vmem>> -> memref<1x168x128xf32, #tpu.memory_space<vmem>>
    %207 = tpu.memref_squeeze %206 : memref<1x168x128xf32, #tpu.memory_space<vmem>> -> memref<168x128xf32, #tpu.memory_space<vmem>>
    %c166_144 = arith.constant 166 : index
    %c0_145 = arith.constant 0 : index
    %208 = vector.load %207[%c166_144, %c0_145] : memref<168x128xf32, #tpu.memory_space<vmem>>, vector<1x32xf32>
    %c1_i32_146 = arith.constant 1 : i32
    %c0_i32_147 = arith.constant 0 : i32
    %c0_i32_148 = arith.constant 0 : i32
    %209 = tpu.memref_slice %arg3[%c1_i32_146, %c0_i32_147, %c0_i32_148] : memref<3x168x128xf32, #tpu.memory_space<vmem>> -> memref<1x168x128xf32, #tpu.memory_space<vmem>>
    %210 = tpu.memref_squeeze %209 : memref<1x168x128xf32, #tpu.memory_space<vmem>> -> memref<168x128xf32, #tpu.memory_space<vmem>>
    %c167_149 = arith.constant 167 : index
    %c0_150 = arith.constant 0 : index
    %211 = vector.load %210[%c167_149, %c0_150] : memref<168x128xf32, #tpu.memory_space<vmem>>, vector<1x32xf32>
    %cst_151 = arith.constant dense<0.000000e+00> : vector<16xf32>
    %212 = vector.multi_reduction <add>, %178, %cst_151 [1] : vector<16x32xf32> to vector<16xf32>
    %213 = vector.shape_cast %212 : vector<16xf32> to vector<16x1xf32>
    %cst_152 = arith.constant 3.200000e+01 : f32
    %214 = vector.broadcast %cst_152 : f32 to vector<16x1xf32>
    %215 = arith.divf %213, %214 : vector<16x1xf32>
    %216 = vector.broadcast %215 : vector<16x1xf32> to vector<16x32xf32>
    %217 = arith.subf %178, %216 : vector<16x32xf32>
    %218 = arith.mulf %217, %217 : vector<16x32xf32>
    %cst_153 = arith.constant dense<0.000000e+00> : vector<16xf32>
    %219 = vector.multi_reduction <add>, %218, %cst_153 [1] : vector<16x32xf32> to vector<16xf32>
    %220 = vector.shape_cast %219 : vector<16xf32> to vector<16x1xf32>
    %cst_154 = arith.constant 3.200000e+01 : f32
    %221 = vector.broadcast %cst_154 : f32 to vector<16x1xf32>
    %222 = arith.divf %220, %221 : vector<16x1xf32>
    %223 = vector.broadcast %215 : vector<16x1xf32> to vector<16x32xf32>
    %224 = arith.subf %178, %223 : vector<16x32xf32>
    %cst_155 = arith.constant 9.99999974E-6 : f32
    %225 = vector.broadcast %cst_155 : f32 to vector<16x1xf32>
    %226 = arith.addf %222, %225 : vector<16x1xf32>
    %227 = math.rsqrt %226 : vector<16x1xf32>
    %228 = vector.broadcast %227 : vector<16x1xf32> to vector<16x32xf32>
    %229 = arith.mulf %224, %228 : vector<16x32xf32>
    %230 = vector.broadcast %196 : vector<1x32xf32> to vector<16x32xf32>
    %231 = arith.mulf %229, %230 : vector<16x32xf32>
    %232 = vector.broadcast %199 : vector<1x32xf32> to vector<16x32xf32>
    %233 = arith.addf %231, %232 : vector<16x32xf32>
    %cst_156 = arith.constant dense<0.000000e+00> : vector<16x96xf32>
    %234 = tpu.matmul %233, %181, %cst_156 {dimension_numbers = #tpu.dot_dimension_numbers<[1], [0], [0], [1], [0, 0, 1, 1], [], []>} : vector<16x32xf32>, vector<32x96xf32>, vector<16x96xf32> -> vector<16x96xf32>
    %235 = vector.broadcast %190 : vector<1x96xf32> to vector<16x96xf32>
    %236 = arith.addf %234, %235 : vector<16x96xf32>
    %cst_157 = arith.constant 0.000000e+00 : f32
    %237 = vector.broadcast %cst_157 : f32 to vector<16x32xf32>
    %238 = vector.extract_strided_slice %236 {offsets = [0, 0], sizes = [16, 8], strides = [1, 1]} : vector<16x96xf32> to vector<16x8xf32>
    %239 = vector.extract_strided_slice %236 {offsets = [0, 32], sizes = [16, 8], strides = [1, 1]} : vector<16x96xf32> to vector<16x8xf32>
    %240 = vector.extract_strided_slice %236 {offsets = [0, 64], sizes = [16, 8], strides = [1, 1]} : vector<16x96xf32> to vector<16x8xf32>
    %cst_158 = arith.constant dense<0.000000e+00> : vector<16x16xf32>
    %241 = tpu.matmul %238, %239, %cst_158 {dimension_numbers = #tpu.dot_dimension_numbers<[1], [1], [0], [0], [0, 0, 1, 0], [], []>} : vector<16x8xf32>, vector<16x8xf32>, vector<16x16xf32> -> vector<16x16xf32>
    %242 = arith.addf %241, %1 : vector<16x16xf32>
    %cst_159 = arith.constant dense<0xFF800000> : vector<16xf32>
    %243 = vector.multi_reduction <maximumf>, %242, %cst_159 [1] : vector<16x16xf32> to vector<16xf32>
    %244 = vector.shape_cast %243 : vector<16xf32> to vector<16x1xf32>
    %245 = vector.broadcast %244 : vector<16x1xf32> to vector<16x16xf32>
    %246 = arith.subf %242, %245 : vector<16x16xf32>
    %247 = math.exp %246 : vector<16x16xf32>
    %cst_160 = arith.constant dense<0.000000e+00> : vector<16xf32>
    %248 = vector.multi_reduction <add>, %247, %cst_160 [1] : vector<16x16xf32> to vector<16xf32>
    %249 = vector.shape_cast %248 : vector<16xf32> to vector<16x1xf32>
    %250 = tpu.reciprocal %249 : vector<16x1xf32> -> vector<16x1xf32>
    %251 = vector.broadcast %250 : vector<16x1xf32> to vector<16x16xf32>
    %252 = arith.mulf %247, %251 : vector<16x16xf32>
    %cst_161 = arith.constant dense<0.000000e+00> : vector<16x8xf32>
    %253 = tpu.matmul %252, %240, %cst_161 {dimension_numbers = #tpu.dot_dimension_numbers<[1], [0], [0], [1], [0, 0, 1, 1], [], []>} : vector<16x16xf32>, vector<16x8xf32>, vector<16x8xf32> -> vector<16x8xf32>
    %c1_i32_162 = arith.constant 1 : i32
    %c0_i32_163 = arith.constant 0 : i32
    %c0_i32_164 = arith.constant 0 : i32
    %254 = tpu.memref_slice %arg3[%c1_i32_162, %c0_i32_163, %c0_i32_164] : memref<3x168x128xf32, #tpu.memory_space<vmem>> -> memref<1x168x128xf32, #tpu.memory_space<vmem>>
    %255 = tpu.memref_squeeze %254 : memref<1x168x128xf32, #tpu.memory_space<vmem>> -> memref<168x128xf32, #tpu.memory_space<vmem>>
    %c32_165 = arith.constant 32 : index
    %c0_166 = arith.constant 0 : index
    %256 = vector.load %255[%c32_165, %c0_166] : memref<168x128xf32, #tpu.memory_space<vmem>>, vector<8x32xf32>
    %cst_167 = arith.constant dense<0.000000e+00> : vector<16x32xf32>
    %257 = tpu.matmul %253, %256, %cst_167 {dimension_numbers = #tpu.dot_dimension_numbers<[1], [0], [0], [1], [0, 0, 1, 1], [], []>} : vector<16x8xf32>, vector<8x32xf32>, vector<16x32xf32> -> vector<16x32xf32>
    %258 = arith.addf %237, %257 : vector<16x32xf32>
    %259 = vector.extract_strided_slice %236 {offsets = [0, 8], sizes = [16, 8], strides = [1, 1]} : vector<16x96xf32> to vector<16x8xf32>
    %260 = vector.extract_strided_slice %236 {offsets = [0, 40], sizes = [16, 8], strides = [1, 1]} : vector<16x96xf32> to vector<16x8xf32>
    %261 = vector.extract_strided_slice %236 {offsets = [0, 72], sizes = [16, 8], strides = [1, 1]} : vector<16x96xf32> to vector<16x8xf32>
    %cst_168 = arith.constant dense<0.000000e+00> : vector<16x16xf32>
    %262 = tpu.matmul %259, %260, %cst_168 {dimension_numbers = #tpu.dot_dimension_numbers<[1], [1], [0], [0], [0, 0, 1, 0], [], []>} : vector<16x8xf32>, vector<16x8xf32>, vector<16x16xf32> -> vector<16x16xf32>
    %263 = arith.addf %262, %1 : vector<16x16xf32>
    %cst_169 = arith.constant dense<0xFF800000> : vector<16xf32>
    %264 = vector.multi_reduction <maximumf>, %263, %cst_169 [1] : vector<16x16xf32> to vector<16xf32>
    %265 = vector.shape_cast %264 : vector<16xf32> to vector<16x1xf32>
    %266 = vector.broadcast %265 : vector<16x1xf32> to vector<16x16xf32>
    %267 = arith.subf %263, %266 : vector<16x16xf32>
    %268 = math.exp %267 : vector<16x16xf32>
    %cst_170 = arith.constant dense<0.000000e+00> : vector<16xf32>
    %269 = vector.multi_reduction <add>, %268, %cst_170 [1] : vector<16x16xf32> to vector<16xf32>
    %270 = vector.shape_cast %269 : vector<16xf32> to vector<16x1xf32>
    %271 = tpu.reciprocal %270 : vector<16x1xf32> -> vector<16x1xf32>
    %272 = vector.broadcast %271 : vector<16x1xf32> to vector<16x16xf32>
    %273 = arith.mulf %268, %272 : vector<16x16xf32>
    %cst_171 = arith.constant dense<0.000000e+00> : vector<16x8xf32>
    %274 = tpu.matmul %273, %261, %cst_171 {dimension_numbers = #tpu.dot_dimension_numbers<[1], [0], [0], [1], [0, 0, 1, 1], [], []>} : vector<16x16xf32>, vector<16x8xf32>, vector<16x8xf32> -> vector<16x8xf32>
    %c1_i32_172 = arith.constant 1 : i32
    %c0_i32_173 = arith.constant 0 : i32
    %c0_i32_174 = arith.constant 0 : i32
    %275 = tpu.memref_slice %arg3[%c1_i32_172, %c0_i32_173, %c0_i32_174] : memref<3x168x128xf32, #tpu.memory_space<vmem>> -> memref<1x168x128xf32, #tpu.memory_space<vmem>>
    %276 = tpu.memref_squeeze %275 : memref<1x168x128xf32, #tpu.memory_space<vmem>> -> memref<168x128xf32, #tpu.memory_space<vmem>>
    %c40_175 = arith.constant 40 : index
    %c0_176 = arith.constant 0 : index
    %277 = vector.load %276[%c40_175, %c0_176] : memref<168x128xf32, #tpu.memory_space<vmem>>, vector<8x32xf32>
    %cst_177 = arith.constant dense<0.000000e+00> : vector<16x32xf32>
    %278 = tpu.matmul %274, %277, %cst_177 {dimension_numbers = #tpu.dot_dimension_numbers<[1], [0], [0], [1], [0, 0, 1, 1], [], []>} : vector<16x8xf32>, vector<8x32xf32>, vector<16x32xf32> -> vector<16x32xf32>
    %279 = arith.addf %258, %278 : vector<16x32xf32>
    %280 = vector.extract_strided_slice %236 {offsets = [0, 16], sizes = [16, 8], strides = [1, 1]} : vector<16x96xf32> to vector<16x8xf32>
    %281 = vector.extract_strided_slice %236 {offsets = [0, 48], sizes = [16, 8], strides = [1, 1]} : vector<16x96xf32> to vector<16x8xf32>
    %282 = vector.extract_strided_slice %236 {offsets = [0, 80], sizes = [16, 8], strides = [1, 1]} : vector<16x96xf32> to vector<16x8xf32>
    %cst_178 = arith.constant dense<0.000000e+00> : vector<16x16xf32>
    %283 = tpu.matmul %280, %281, %cst_178 {dimension_numbers = #tpu.dot_dimension_numbers<[1], [1], [0], [0], [0, 0, 1, 0], [], []>} : vector<16x8xf32>, vector<16x8xf32>, vector<16x16xf32> -> vector<16x16xf32>
    %284 = arith.addf %283, %1 : vector<16x16xf32>
    %cst_179 = arith.constant dense<0xFF800000> : vector<16xf32>
    %285 = vector.multi_reduction <maximumf>, %284, %cst_179 [1] : vector<16x16xf32> to vector<16xf32>
    %286 = vector.shape_cast %285 : vector<16xf32> to vector<16x1xf32>
    %287 = vector.broadcast %286 : vector<16x1xf32> to vector<16x16xf32>
    %288 = arith.subf %284, %287 : vector<16x16xf32>
    %289 = math.exp %288 : vector<16x16xf32>
    %cst_180 = arith.constant dense<0.000000e+00> : vector<16xf32>
    %290 = vector.multi_reduction <add>, %289, %cst_180 [1] : vector<16x16xf32> to vector<16xf32>
    %291 = vector.shape_cast %290 : vector<16xf32> to vector<16x1xf32>
    %292 = tpu.reciprocal %291 : vector<16x1xf32> -> vector<16x1xf32>
    %293 = vector.broadcast %292 : vector<16x1xf32> to vector<16x16xf32>
    %294 = arith.mulf %289, %293 : vector<16x16xf32>
    %cst_181 = arith.constant dense<0.000000e+00> : vector<16x8xf32>
    %295 = tpu.matmul %294, %282, %cst_181 {dimension_numbers = #tpu.dot_dimension_numbers<[1], [0], [0], [1], [0, 0, 1, 1], [], []>} : vector<16x16xf32>, vector<16x8xf32>, vector<16x8xf32> -> vector<16x8xf32>
    %c1_i32_182 = arith.constant 1 : i32
    %c0_i32_183 = arith.constant 0 : i32
    %c0_i32_184 = arith.constant 0 : i32
    %296 = tpu.memref_slice %arg3[%c1_i32_182, %c0_i32_183, %c0_i32_184] : memref<3x168x128xf32, #tpu.memory_space<vmem>> -> memref<1x168x128xf32, #tpu.memory_space<vmem>>
    %297 = tpu.memref_squeeze %296 : memref<1x168x128xf32, #tpu.memory_space<vmem>> -> memref<168x128xf32, #tpu.memory_space<vmem>>
    %c48_185 = arith.constant 48 : index
    %c0_186 = arith.constant 0 : index
    %298 = vector.load %297[%c48_185, %c0_186] : memref<168x128xf32, #tpu.memory_space<vmem>>, vector<8x32xf32>
    %cst_187 = arith.constant dense<0.000000e+00> : vector<16x32xf32>
    %299 = tpu.matmul %295, %298, %cst_187 {dimension_numbers = #tpu.dot_dimension_numbers<[1], [0], [0], [1], [0, 0, 1, 1], [], []>} : vector<16x8xf32>, vector<8x32xf32>, vector<16x32xf32> -> vector<16x32xf32>
    %300 = arith.addf %279, %299 : vector<16x32xf32>
    %301 = vector.extract_strided_slice %236 {offsets = [0, 24], sizes = [16, 8], strides = [1, 1]} : vector<16x96xf32> to vector<16x8xf32>
    %302 = vector.extract_strided_slice %236 {offsets = [0, 56], sizes = [16, 8], strides = [1, 1]} : vector<16x96xf32> to vector<16x8xf32>
    %303 = vector.extract_strided_slice %236 {offsets = [0, 88], sizes = [16, 8], strides = [1, 1]} : vector<16x96xf32> to vector<16x8xf32>
    %cst_188 = arith.constant dense<0.000000e+00> : vector<16x16xf32>
    %304 = tpu.matmul %301, %302, %cst_188 {dimension_numbers = #tpu.dot_dimension_numbers<[1], [1], [0], [0], [0, 0, 1, 0], [], []>} : vector<16x8xf32>, vector<16x8xf32>, vector<16x16xf32> -> vector<16x16xf32>
    %305 = arith.addf %304, %1 : vector<16x16xf32>
    %cst_189 = arith.constant dense<0xFF800000> : vector<16xf32>
    %306 = vector.multi_reduction <maximumf>, %305, %cst_189 [1] : vector<16x16xf32> to vector<16xf32>
    %307 = vector.shape_cast %306 : vector<16xf32> to vector<16x1xf32>
    %308 = vector.broadcast %307 : vector<16x1xf32> to vector<16x16xf32>
    %309 = arith.subf %305, %308 : vector<16x16xf32>
    %310 = math.exp %309 : vector<16x16xf32>
    %cst_190 = arith.constant dense<0.000000e+00> : vector<16xf32>
    %311 = vector.multi_reduction <add>, %310, %cst_190 [1] : vector<16x16xf32> to vector<16xf32>
    %312 = vector.shape_cast %311 : vector<16xf32> to vector<16x1xf32>
    %313 = tpu.reciprocal %312 : vector<16x1xf32> -> vector<16x1xf32>
    %314 = vector.broadcast %313 : vector<16x1xf32> to vector<16x16xf32>
    %315 = arith.mulf %310, %314 : vector<16x16xf32>
    %cst_191 = arith.constant dense<0.000000e+00> : vector<16x8xf32>
    %316 = tpu.matmul %315, %303, %cst_191 {dimension_numbers = #tpu.dot_dimension_numbers<[1], [0], [0], [1], [0, 0, 1, 1], [], []>} : vector<16x16xf32>, vector<16x8xf32>, vector<16x8xf32> -> vector<16x8xf32>
    %c1_i32_192 = arith.constant 1 : i32
    %c0_i32_193 = arith.constant 0 : i32
    %c0_i32_194 = arith.constant 0 : i32
    %317 = tpu.memref_slice %arg3[%c1_i32_192, %c0_i32_193, %c0_i32_194] : memref<3x168x128xf32, #tpu.memory_space<vmem>> -> memref<1x168x128xf32, #tpu.memory_space<vmem>>
    %318 = tpu.memref_squeeze %317 : memref<1x168x128xf32, #tpu.memory_space<vmem>> -> memref<168x128xf32, #tpu.memory_space<vmem>>
    %c56_195 = arith.constant 56 : index
    %c0_196 = arith.constant 0 : index
    %319 = vector.load %318[%c56_195, %c0_196] : memref<168x128xf32, #tpu.memory_space<vmem>>, vector<8x32xf32>
    %cst_197 = arith.constant dense<0.000000e+00> : vector<16x32xf32>
    %320 = tpu.matmul %316, %319, %cst_197 {dimension_numbers = #tpu.dot_dimension_numbers<[1], [0], [0], [1], [0, 0, 1, 1], [], []>} : vector<16x8xf32>, vector<8x32xf32>, vector<16x32xf32> -> vector<16x32xf32>
    %321 = arith.addf %300, %320 : vector<16x32xf32>
    %322 = arith.addf %178, %321 : vector<16x32xf32>
    %323 = vector.broadcast %202 : vector<1x32xf32> to vector<16x32xf32>
    %324 = arith.addf %322, %323 : vector<16x32xf32>
    %cst_198 = arith.constant dense<0.000000e+00> : vector<16xf32>
    %325 = vector.multi_reduction <add>, %324, %cst_198 [1] : vector<16x32xf32> to vector<16xf32>
    %326 = vector.shape_cast %325 : vector<16xf32> to vector<16x1xf32>
    %cst_199 = arith.constant 3.200000e+01 : f32
    %327 = vector.broadcast %cst_199 : f32 to vector<16x1xf32>
    %328 = arith.divf %326, %327 : vector<16x1xf32>
    %329 = vector.broadcast %328 : vector<16x1xf32> to vector<16x32xf32>
    %330 = arith.subf %324, %329 : vector<16x32xf32>
    %331 = arith.mulf %330, %330 : vector<16x32xf32>
    %cst_200 = arith.constant dense<0.000000e+00> : vector<16xf32>
    %332 = vector.multi_reduction <add>, %331, %cst_200 [1] : vector<16x32xf32> to vector<16xf32>
    %333 = vector.shape_cast %332 : vector<16xf32> to vector<16x1xf32>
    %cst_201 = arith.constant 3.200000e+01 : f32
    %334 = vector.broadcast %cst_201 : f32 to vector<16x1xf32>
    %335 = arith.divf %333, %334 : vector<16x1xf32>
    %336 = vector.broadcast %328 : vector<16x1xf32> to vector<16x32xf32>
    %337 = arith.subf %324, %336 : vector<16x32xf32>
    %cst_202 = arith.constant 9.99999974E-6 : f32
    %338 = vector.broadcast %cst_202 : f32 to vector<16x1xf32>
    %339 = arith.addf %335, %338 : vector<16x1xf32>
    %340 = math.rsqrt %339 : vector<16x1xf32>
    %341 = vector.broadcast %340 : vector<16x1xf32> to vector<16x32xf32>
    %342 = arith.mulf %337, %341 : vector<16x32xf32>
    %343 = vector.broadcast %205 : vector<1x32xf32> to vector<16x32xf32>
    %344 = arith.mulf %342, %343 : vector<16x32xf32>
    %345 = vector.broadcast %208 : vector<1x32xf32> to vector<16x32xf32>
    %346 = arith.addf %344, %345 : vector<16x32xf32>
    %cst_203 = arith.constant dense<0.000000e+00> : vector<16x64xf32>
    %347 = tpu.matmul %346, %184, %cst_203 {dimension_numbers = #tpu.dot_dimension_numbers<[1], [0], [0], [1], [0, 0, 1, 1], [], []>} : vector<16x32xf32>, vector<32x64xf32>, vector<16x64xf32> -> vector<16x64xf32>
    %348 = vector.broadcast %193 : vector<1x64xf32> to vector<16x64xf32>
    %349 = arith.addf %347, %348 : vector<16x64xf32>
    %cst_204 = arith.constant 0.000000e+00 : f32
    %350 = vector.broadcast %cst_204 : f32 to vector<16x64xf32>
    %351 = arith.maximumf %349, %350 : vector<16x64xf32>
    %cst_205 = arith.constant dense<0.000000e+00> : vector<16x32xf32>
    %352 = tpu.matmul %351, %187, %cst_205 {dimension_numbers = #tpu.dot_dimension_numbers<[1], [0], [0], [1], [0, 0, 1, 1], [], []>} : vector<16x64xf32>, vector<64x32xf32>, vector<16x32xf32> -> vector<16x32xf32>
    %353 = arith.addf %324, %352 : vector<16x32xf32>
    %354 = vector.broadcast %211 : vector<1x32xf32> to vector<16x32xf32>
    %355 = arith.addf %353, %354 : vector<16x32xf32>
    %c2_i32 = arith.constant 2 : i32
    %c0_i32_206 = arith.constant 0 : i32
    %c0_i32_207 = arith.constant 0 : i32
    %356 = tpu.memref_slice %arg3[%c2_i32, %c0_i32_206, %c0_i32_207] : memref<3x168x128xf32, #tpu.memory_space<vmem>> -> memref<1x168x128xf32, #tpu.memory_space<vmem>>
    %357 = tpu.memref_squeeze %356 : memref<1x168x128xf32, #tpu.memory_space<vmem>> -> memref<168x128xf32, #tpu.memory_space<vmem>>
    %c0_208 = arith.constant 0 : index
    %c0_209 = arith.constant 0 : index
    %358 = vector.load %357[%c0_208, %c0_209] : memref<168x128xf32, #tpu.memory_space<vmem>>, vector<32x96xf32>
    %c2_i32_210 = arith.constant 2 : i32
    %c0_i32_211 = arith.constant 0 : i32
    %c0_i32_212 = arith.constant 0 : i32
    %359 = tpu.memref_slice %arg3[%c2_i32_210, %c0_i32_211, %c0_i32_212] : memref<3x168x128xf32, #tpu.memory_space<vmem>> -> memref<1x168x128xf32, #tpu.memory_space<vmem>>
    %360 = tpu.memref_squeeze %359 : memref<1x168x128xf32, #tpu.memory_space<vmem>> -> memref<168x128xf32, #tpu.memory_space<vmem>>
    %c64_213 = arith.constant 64 : index
    %c0_214 = arith.constant 0 : index
    %361 = vector.load %360[%c64_213, %c0_214] : memref<168x128xf32, #tpu.memory_space<vmem>>, vector<32x64xf32>
    %c2_i32_215 = arith.constant 2 : i32
    %c0_i32_216 = arith.constant 0 : i32
    %c0_i32_217 = arith.constant 0 : i32
    %362 = tpu.memref_slice %arg3[%c2_i32_215, %c0_i32_216, %c0_i32_217] : memref<3x168x128xf32, #tpu.memory_space<vmem>> -> memref<1x168x128xf32, #tpu.memory_space<vmem>>
    %363 = tpu.memref_squeeze %362 : memref<1x168x128xf32, #tpu.memory_space<vmem>> -> memref<168x128xf32, #tpu.memory_space<vmem>>
    %c96_218 = arith.constant 96 : index
    %c0_219 = arith.constant 0 : index
    %364 = vector.load %363[%c96_218, %c0_219] : memref<168x128xf32, #tpu.memory_space<vmem>>, vector<64x32xf32>
    %c2_i32_220 = arith.constant 2 : i32
    %c0_i32_221 = arith.constant 0 : i32
    %c0_i32_222 = arith.constant 0 : i32
    %365 = tpu.memref_slice %arg3[%c2_i32_220, %c0_i32_221, %c0_i32_222] : memref<3x168x128xf32, #tpu.memory_space<vmem>> -> memref<1x168x128xf32, #tpu.memory_space<vmem>>
    %366 = tpu.memref_squeeze %365 : memref<1x168x128xf32, #tpu.memory_space<vmem>> -> memref<168x128xf32, #tpu.memory_space<vmem>>
    %c160_223 = arith.constant 160 : index
    %c0_224 = arith.constant 0 : index
    %367 = vector.load %366[%c160_223, %c0_224] : memref<168x128xf32, #tpu.memory_space<vmem>>, vector<1x96xf32>
    %c2_i32_225 = arith.constant 2 : i32
    %c0_i32_226 = arith.constant 0 : i32
    %c0_i32_227 = arith.constant 0 : i32
    %368 = tpu.memref_slice %arg3[%c2_i32_225, %c0_i32_226, %c0_i32_227] : memref<3x168x128xf32, #tpu.memory_space<vmem>> -> memref<1x168x128xf32, #tpu.memory_space<vmem>>
    %369 = tpu.memref_squeeze %368 : memref<1x168x128xf32, #tpu.memory_space<vmem>> -> memref<168x128xf32, #tpu.memory_space<vmem>>
    %c161_228 = arith.constant 161 : index
    %c0_229 = arith.constant 0 : index
    %370 = vector.load %369[%c161_228, %c0_229] : memref<168x128xf32, #tpu.memory_space<vmem>>, vector<1x64xf32>
    %c2_i32_230 = arith.constant 2 : i32
    %c0_i32_231 = arith.constant 0 : i32
    %c0_i32_232 = arith.constant 0 : i32
    %371 = tpu.memref_slice %arg3[%c2_i32_230, %c0_i32_231, %c0_i32_232] : memref<3x168x128xf32, #tpu.memory_space<vmem>> -> memref<1x168x128xf32, #tpu.memory_space<vmem>>
    %372 = tpu.memref_squeeze %371 : memref<1x168x128xf32, #tpu.memory_space<vmem>> -> memref<168x128xf32, #tpu.memory_space<vmem>>
    %c162_233 = arith.constant 162 : index
    %c0_234 = arith.constant 0 : index
    %373 = vector.load %372[%c162_233, %c0_234] : memref<168x128xf32, #tpu.memory_space<vmem>>, vector<1x32xf32>
    %c2_i32_235 = arith.constant 2 : i32
    %c0_i32_236 = arith.constant 0 : i32
    %c0_i32_237 = arith.constant 0 : i32
    %374 = tpu.memref_slice %arg3[%c2_i32_235, %c0_i32_236, %c0_i32_237] : memref<3x168x128xf32, #tpu.memory_space<vmem>> -> memref<1x168x128xf32, #tpu.memory_space<vmem>>
    %375 = tpu.memref_squeeze %374 : memref<1x168x128xf32, #tpu.memory_space<vmem>> -> memref<168x128xf32, #tpu.memory_space<vmem>>
    %c163_238 = arith.constant 163 : index
    %c0_239 = arith.constant 0 : index
    %376 = vector.load %375[%c163_238, %c0_239] : memref<168x128xf32, #tpu.memory_space<vmem>>, vector<1x32xf32>
    %c2_i32_240 = arith.constant 2 : i32
    %c0_i32_241 = arith.constant 0 : i32
    %c0_i32_242 = arith.constant 0 : i32
    %377 = tpu.memref_slice %arg3[%c2_i32_240, %c0_i32_241, %c0_i32_242] : memref<3x168x128xf32, #tpu.memory_space<vmem>> -> memref<1x168x128xf32, #tpu.memory_space<vmem>>
    %378 = tpu.memref_squeeze %377 : memref<1x168x128xf32, #tpu.memory_space<vmem>> -> memref<168x128xf32, #tpu.memory_space<vmem>>
    %c164_243 = arith.constant 164 : index
    %c0_244 = arith.constant 0 : index
    %379 = vector.load %378[%c164_243, %c0_244] : memref<168x128xf32, #tpu.memory_space<vmem>>, vector<1x32xf32>
    %c2_i32_245 = arith.constant 2 : i32
    %c0_i32_246 = arith.constant 0 : i32
    %c0_i32_247 = arith.constant 0 : i32
    %380 = tpu.memref_slice %arg3[%c2_i32_245, %c0_i32_246, %c0_i32_247] : memref<3x168x128xf32, #tpu.memory_space<vmem>> -> memref<1x168x128xf32, #tpu.memory_space<vmem>>
    %381 = tpu.memref_squeeze %380 : memref<1x168x128xf32, #tpu.memory_space<vmem>> -> memref<168x128xf32, #tpu.memory_space<vmem>>
    %c165_248 = arith.constant 165 : index
    %c0_249 = arith.constant 0 : index
    %382 = vector.load %381[%c165_248, %c0_249] : memref<168x128xf32, #tpu.memory_space<vmem>>, vector<1x32xf32>
    %c2_i32_250 = arith.constant 2 : i32
    %c0_i32_251 = arith.constant 0 : i32
    %c0_i32_252 = arith.constant 0 : i32
    %383 = tpu.memref_slice %arg3[%c2_i32_250, %c0_i32_251, %c0_i32_252] : memref<3x168x128xf32, #tpu.memory_space<vmem>> -> memref<1x168x128xf32, #tpu.memory_space<vmem>>
    %384 = tpu.memref_squeeze %383 : memref<1x168x128xf32, #tpu.memory_space<vmem>> -> memref<168x128xf32, #tpu.memory_space<vmem>>
    %c166_253 = arith.constant 166 : index
    %c0_254 = arith.constant 0 : index
    %385 = vector.load %384[%c166_253, %c0_254] : memref<168x128xf32, #tpu.memory_space<vmem>>, vector<1x32xf32>
    %c2_i32_255 = arith.constant 2 : i32
    %c0_i32_256 = arith.constant 0 : i32
    %c0_i32_257 = arith.constant 0 : i32
    %386 = tpu.memref_slice %arg3[%c2_i32_255, %c0_i32_256, %c0_i32_257] : memref<3x168x128xf32, #tpu.memory_space<vmem>> -> memref<1x168x128xf32, #tpu.memory_space<vmem>>
    %387 = tpu.memref_squeeze %386 : memref<1x168x128xf32, #tpu.memory_space<vmem>> -> memref<168x128xf32, #tpu.memory_space<vmem>>
    %c167_258 = arith.constant 167 : index
    %c0_259 = arith.constant 0 : index
    %388 = vector.load %387[%c167_258, %c0_259] : memref<168x128xf32, #tpu.memory_space<vmem>>, vector<1x32xf32>
    %cst_260 = arith.constant dense<0.000000e+00> : vector<16xf32>
    %389 = vector.multi_reduction <add>, %355, %cst_260 [1] : vector<16x32xf32> to vector<16xf32>
    %390 = vector.shape_cast %389 : vector<16xf32> to vector<16x1xf32>
    %cst_261 = arith.constant 3.200000e+01 : f32
    %391 = vector.broadcast %cst_261 : f32 to vector<16x1xf32>
    %392 = arith.divf %390, %391 : vector<16x1xf32>
    %393 = vector.broadcast %392 : vector<16x1xf32> to vector<16x32xf32>
    %394 = arith.subf %355, %393 : vector<16x32xf32>
    %395 = arith.mulf %394, %394 : vector<16x32xf32>
    %cst_262 = arith.constant dense<0.000000e+00> : vector<16xf32>
    %396 = vector.multi_reduction <add>, %395, %cst_262 [1] : vector<16x32xf32> to vector<16xf32>
    %397 = vector.shape_cast %396 : vector<16xf32> to vector<16x1xf32>
    %cst_263 = arith.constant 3.200000e+01 : f32
    %398 = vector.broadcast %cst_263 : f32 to vector<16x1xf32>
    %399 = arith.divf %397, %398 : vector<16x1xf32>
    %400 = vector.broadcast %392 : vector<16x1xf32> to vector<16x32xf32>
    %401 = arith.subf %355, %400 : vector<16x32xf32>
    %cst_264 = arith.constant 9.99999974E-6 : f32
    %402 = vector.broadcast %cst_264 : f32 to vector<16x1xf32>
    %403 = arith.addf %399, %402 : vector<16x1xf32>
    %404 = math.rsqrt %403 : vector<16x1xf32>
    %405 = vector.broadcast %404 : vector<16x1xf32> to vector<16x32xf32>
    %406 = arith.mulf %401, %405 : vector<16x32xf32>
    %407 = vector.broadcast %373 : vector<1x32xf32> to vector<16x32xf32>
    %408 = arith.mulf %406, %407 : vector<16x32xf32>
    %409 = vector.broadcast %376 : vector<1x32xf32> to vector<16x32xf32>
    %410 = arith.addf %408, %409 : vector<16x32xf32>
    %cst_265 = arith.constant dense<0.000000e+00> : vector<16x96xf32>
    %411 = tpu.matmul %410, %358, %cst_265 {dimension_numbers = #tpu.dot_dimension_numbers<[1], [0], [0], [1], [0, 0, 1, 1], [], []>} : vector<16x32xf32>, vector<32x96xf32>, vector<16x96xf32> -> vector<16x96xf32>
    %412 = vector.broadcast %367 : vector<1x96xf32> to vector<16x96xf32>
    %413 = arith.addf %411, %412 : vector<16x96xf32>
    %cst_266 = arith.constant 0.000000e+00 : f32
    %414 = vector.broadcast %cst_266 : f32 to vector<16x32xf32>
    %415 = vector.extract_strided_slice %413 {offsets = [0, 0], sizes = [16, 8], strides = [1, 1]} : vector<16x96xf32> to vector<16x8xf32>
    %416 = vector.extract_strided_slice %413 {offsets = [0, 32], sizes = [16, 8], strides = [1, 1]} : vector<16x96xf32> to vector<16x8xf32>
    %417 = vector.extract_strided_slice %413 {offsets = [0, 64], sizes = [16, 8], strides = [1, 1]} : vector<16x96xf32> to vector<16x8xf32>
    %cst_267 = arith.constant dense<0.000000e+00> : vector<16x16xf32>
    %418 = tpu.matmul %415, %416, %cst_267 {dimension_numbers = #tpu.dot_dimension_numbers<[1], [1], [0], [0], [0, 0, 1, 0], [], []>} : vector<16x8xf32>, vector<16x8xf32>, vector<16x16xf32> -> vector<16x16xf32>
    %419 = arith.addf %418, %1 : vector<16x16xf32>
    %cst_268 = arith.constant dense<0xFF800000> : vector<16xf32>
    %420 = vector.multi_reduction <maximumf>, %419, %cst_268 [1] : vector<16x16xf32> to vector<16xf32>
    %421 = vector.shape_cast %420 : vector<16xf32> to vector<16x1xf32>
    %422 = vector.broadcast %421 : vector<16x1xf32> to vector<16x16xf32>
    %423 = arith.subf %419, %422 : vector<16x16xf32>
    %424 = math.exp %423 : vector<16x16xf32>
    %cst_269 = arith.constant dense<0.000000e+00> : vector<16xf32>
    %425 = vector.multi_reduction <add>, %424, %cst_269 [1] : vector<16x16xf32> to vector<16xf32>
    %426 = vector.shape_cast %425 : vector<16xf32> to vector<16x1xf32>
    %427 = tpu.reciprocal %426 : vector<16x1xf32> -> vector<16x1xf32>
    %428 = vector.broadcast %427 : vector<16x1xf32> to vector<16x16xf32>
    %429 = arith.mulf %424, %428 : vector<16x16xf32>
    %cst_270 = arith.constant dense<0.000000e+00> : vector<16x8xf32>
    %430 = tpu.matmul %429, %417, %cst_270 {dimension_numbers = #tpu.dot_dimension_numbers<[1], [0], [0], [1], [0, 0, 1, 1], [], []>} : vector<16x16xf32>, vector<16x8xf32>, vector<16x8xf32> -> vector<16x8xf32>
    %c2_i32_271 = arith.constant 2 : i32
    %c0_i32_272 = arith.constant 0 : i32
    %c0_i32_273 = arith.constant 0 : i32
    %431 = tpu.memref_slice %arg3[%c2_i32_271, %c0_i32_272, %c0_i32_273] : memref<3x168x128xf32, #tpu.memory_space<vmem>> -> memref<1x168x128xf32, #tpu.memory_space<vmem>>
    %432 = tpu.memref_squeeze %431 : memref<1x168x128xf32, #tpu.memory_space<vmem>> -> memref<168x128xf32, #tpu.memory_space<vmem>>
    %c32_274 = arith.constant 32 : index
    %c0_275 = arith.constant 0 : index
    %433 = vector.load %432[%c32_274, %c0_275] : memref<168x128xf32, #tpu.memory_space<vmem>>, vector<8x32xf32>
    %cst_276 = arith.constant dense<0.000000e+00> : vector<16x32xf32>
    %434 = tpu.matmul %430, %433, %cst_276 {dimension_numbers = #tpu.dot_dimension_numbers<[1], [0], [0], [1], [0, 0, 1, 1], [], []>} : vector<16x8xf32>, vector<8x32xf32>, vector<16x32xf32> -> vector<16x32xf32>
    %435 = arith.addf %414, %434 : vector<16x32xf32>
    %436 = vector.extract_strided_slice %413 {offsets = [0, 8], sizes = [16, 8], strides = [1, 1]} : vector<16x96xf32> to vector<16x8xf32>
    %437 = vector.extract_strided_slice %413 {offsets = [0, 40], sizes = [16, 8], strides = [1, 1]} : vector<16x96xf32> to vector<16x8xf32>
    %438 = vector.extract_strided_slice %413 {offsets = [0, 72], sizes = [16, 8], strides = [1, 1]} : vector<16x96xf32> to vector<16x8xf32>
    %cst_277 = arith.constant dense<0.000000e+00> : vector<16x16xf32>
    %439 = tpu.matmul %436, %437, %cst_277 {dimension_numbers = #tpu.dot_dimension_numbers<[1], [1], [0], [0], [0, 0, 1, 0], [], []>} : vector<16x8xf32>, vector<16x8xf32>, vector<16x16xf32> -> vector<16x16xf32>
    %440 = arith.addf %439, %1 : vector<16x16xf32>
    %cst_278 = arith.constant dense<0xFF800000> : vector<16xf32>
    %441 = vector.multi_reduction <maximumf>, %440, %cst_278 [1] : vector<16x16xf32> to vector<16xf32>
    %442 = vector.shape_cast %441 : vector<16xf32> to vector<16x1xf32>
    %443 = vector.broadcast %442 : vector<16x1xf32> to vector<16x16xf32>
    %444 = arith.subf %440, %443 : vector<16x16xf32>
    %445 = math.exp %444 : vector<16x16xf32>
    %cst_279 = arith.constant dense<0.000000e+00> : vector<16xf32>
    %446 = vector.multi_reduction <add>, %445, %cst_279 [1] : vector<16x16xf32> to vector<16xf32>
    %447 = vector.shape_cast %446 : vector<16xf32> to vector<16x1xf32>
    %448 = tpu.reciprocal %447 : vector<16x1xf32> -> vector<16x1xf32>
    %449 = vector.broadcast %448 : vector<16x1xf32> to vector<16x16xf32>
    %450 = arith.mulf %445, %449 : vector<16x16xf32>
    %cst_280 = arith.constant dense<0.000000e+00> : vector<16x8xf32>
    %451 = tpu.matmul %450, %438, %cst_280 {dimension_numbers = #tpu.dot_dimension_numbers<[1], [0], [0], [1], [0, 0, 1, 1], [], []>} : vector<16x16xf32>, vector<16x8xf32>, vector<16x8xf32> -> vector<16x8xf32>
    %c2_i32_281 = arith.constant 2 : i32
    %c0_i32_282 = arith.constant 0 : i32
    %c0_i32_283 = arith.constant 0 : i32
    %452 = tpu.memref_slice %arg3[%c2_i32_281, %c0_i32_282, %c0_i32_283] : memref<3x168x128xf32, #tpu.memory_space<vmem>> -> memref<1x168x128xf32, #tpu.memory_space<vmem>>
    %453 = tpu.memref_squeeze %452 : memref<1x168x128xf32, #tpu.memory_space<vmem>> -> memref<168x128xf32, #tpu.memory_space<vmem>>
    %c40_284 = arith.constant 40 : index
    %c0_285 = arith.constant 0 : index
    %454 = vector.load %453[%c40_284, %c0_285] : memref<168x128xf32, #tpu.memory_space<vmem>>, vector<8x32xf32>
    %cst_286 = arith.constant dense<0.000000e+00> : vector<16x32xf32>
    %455 = tpu.matmul %451, %454, %cst_286 {dimension_numbers = #tpu.dot_dimension_numbers<[1], [0], [0], [1], [0, 0, 1, 1], [], []>} : vector<16x8xf32>, vector<8x32xf32>, vector<16x32xf32> -> vector<16x32xf32>
    %456 = arith.addf %435, %455 : vector<16x32xf32>
    %457 = vector.extract_strided_slice %413 {offsets = [0, 16], sizes = [16, 8], strides = [1, 1]} : vector<16x96xf32> to vector<16x8xf32>
    %458 = vector.extract_strided_slice %413 {offsets = [0, 48], sizes = [16, 8], strides = [1, 1]} : vector<16x96xf32> to vector<16x8xf32>
    %459 = vector.extract_strided_slice %413 {offsets = [0, 80], sizes = [16, 8], strides = [1, 1]} : vector<16x96xf32> to vector<16x8xf32>
    %cst_287 = arith.constant dense<0.000000e+00> : vector<16x16xf32>
    %460 = tpu.matmul %457, %458, %cst_287 {dimension_numbers = #tpu.dot_dimension_numbers<[1], [1], [0], [0], [0, 0, 1, 0], [], []>} : vector<16x8xf32>, vector<16x8xf32>, vector<16x16xf32> -> vector<16x16xf32>
    %461 = arith.addf %460, %1 : vector<16x16xf32>
    %cst_288 = arith.constant dense<0xFF800000> : vector<16xf32>
    %462 = vector.multi_reduction <maximumf>, %461, %cst_288 [1] : vector<16x16xf32> to vector<16xf32>
    %463 = vector.shape_cast %462 : vector<16xf32> to vector<16x1xf32>
    %464 = vector.broadcast %463 : vector<16x1xf32> to vector<16x16xf32>
    %465 = arith.subf %461, %464 : vector<16x16xf32>
    %466 = math.exp %465 : vector<16x16xf32>
    %cst_289 = arith.constant dense<0.000000e+00> : vector<16xf32>
    %467 = vector.multi_reduction <add>, %466, %cst_289 [1] : vector<16x16xf32> to vector<16xf32>
    %468 = vector.shape_cast %467 : vector<16xf32> to vector<16x1xf32>
    %469 = tpu.reciprocal %468 : vector<16x1xf32> -> vector<16x1xf32>
    %470 = vector.broadcast %469 : vector<16x1xf32> to vector<16x16xf32>
    %471 = arith.mulf %466, %470 : vector<16x16xf32>
    %cst_290 = arith.constant dense<0.000000e+00> : vector<16x8xf32>
    %472 = tpu.matmul %471, %459, %cst_290 {dimension_numbers = #tpu.dot_dimension_numbers<[1], [0], [0], [1], [0, 0, 1, 1], [], []>} : vector<16x16xf32>, vector<16x8xf32>, vector<16x8xf32> -> vector<16x8xf32>
    %c2_i32_291 = arith.constant 2 : i32
    %c0_i32_292 = arith.constant 0 : i32
    %c0_i32_293 = arith.constant 0 : i32
    %473 = tpu.memref_slice %arg3[%c2_i32_291, %c0_i32_292, %c0_i32_293] : memref<3x168x128xf32, #tpu.memory_space<vmem>> -> memref<1x168x128xf32, #tpu.memory_space<vmem>>
    %474 = tpu.memref_squeeze %473 : memref<1x168x128xf32, #tpu.memory_space<vmem>> -> memref<168x128xf32, #tpu.memory_space<vmem>>
    %c48_294 = arith.constant 48 : index
    %c0_295 = arith.constant 0 : index
    %475 = vector.load %474[%c48_294, %c0_295] : memref<168x128xf32, #tpu.memory_space<vmem>>, vector<8x32xf32>
    %cst_296 = arith.constant dense<0.000000e+00> : vector<16x32xf32>
    %476 = tpu.matmul %472, %475, %cst_296 {dimension_numbers = #tpu.dot_dimension_numbers<[1], [0], [0], [1], [0, 0, 1, 1], [], []>} : vector<16x8xf32>, vector<8x32xf32>, vector<16x32xf32> -> vector<16x32xf32>
    %477 = arith.addf %456, %476 : vector<16x32xf32>
    %478 = vector.extract_strided_slice %413 {offsets = [0, 24], sizes = [16, 8], strides = [1, 1]} : vector<16x96xf32> to vector<16x8xf32>
    %479 = vector.extract_strided_slice %413 {offsets = [0, 56], sizes = [16, 8], strides = [1, 1]} : vector<16x96xf32> to vector<16x8xf32>
    %480 = vector.extract_strided_slice %413 {offsets = [0, 88], sizes = [16, 8], strides = [1, 1]} : vector<16x96xf32> to vector<16x8xf32>
    %cst_297 = arith.constant dense<0.000000e+00> : vector<16x16xf32>
    %481 = tpu.matmul %478, %479, %cst_297 {dimension_numbers = #tpu.dot_dimension_numbers<[1], [1], [0], [0], [0, 0, 1, 0], [], []>} : vector<16x8xf32>, vector<16x8xf32>, vector<16x16xf32> -> vector<16x16xf32>
    %482 = arith.addf %481, %1 : vector<16x16xf32>
    %cst_298 = arith.constant dense<0xFF800000> : vector<16xf32>
    %483 = vector.multi_reduction <maximumf>, %482, %cst_298 [1] : vector<16x16xf32> to vector<16xf32>
    %484 = vector.shape_cast %483 : vector<16xf32> to vector<16x1xf32>
    %485 = vector.broadcast %484 : vector<16x1xf32> to vector<16x16xf32>
    %486 = arith.subf %482, %485 : vector<16x16xf32>
    %487 = math.exp %486 : vector<16x16xf32>
    %cst_299 = arith.constant dense<0.000000e+00> : vector<16xf32>
    %488 = vector.multi_reduction <add>, %487, %cst_299 [1] : vector<16x16xf32> to vector<16xf32>
    %489 = vector.shape_cast %488 : vector<16xf32> to vector<16x1xf32>
    %490 = tpu.reciprocal %489 : vector<16x1xf32> -> vector<16x1xf32>
    %491 = vector.broadcast %490 : vector<16x1xf32> to vector<16x16xf32>
    %492 = arith.mulf %487, %491 : vector<16x16xf32>
    %cst_300 = arith.constant dense<0.000000e+00> : vector<16x8xf32>
    %493 = tpu.matmul %492, %480, %cst_300 {dimension_numbers = #tpu.dot_dimension_numbers<[1], [0], [0], [1], [0, 0, 1, 1], [], []>} : vector<16x16xf32>, vector<16x8xf32>, vector<16x8xf32> -> vector<16x8xf32>
    %c2_i32_301 = arith.constant 2 : i32
    %c0_i32_302 = arith.constant 0 : i32
    %c0_i32_303 = arith.constant 0 : i32
    %494 = tpu.memref_slice %arg3[%c2_i32_301, %c0_i32_302, %c0_i32_303] : memref<3x168x128xf32, #tpu.memory_space<vmem>> -> memref<1x168x128xf32, #tpu.memory_space<vmem>>
    %495 = tpu.memref_squeeze %494 : memref<1x168x128xf32, #tpu.memory_space<vmem>> -> memref<168x128xf32, #tpu.memory_space<vmem>>
    %c56_304 = arith.constant 56 : index
    %c0_305 = arith.constant 0 : index
    %496 = vector.load %495[%c56_304, %c0_305] : memref<168x128xf32, #tpu.memory_space<vmem>>, vector<8x32xf32>
    %cst_306 = arith.constant dense<0.000000e+00> : vector<16x32xf32>
    %497 = tpu.matmul %493, %496, %cst_306 {dimension_numbers = #tpu.dot_dimension_numbers<[1], [0], [0], [1], [0, 0, 1, 1], [], []>} : vector<16x8xf32>, vector<8x32xf32>, vector<16x32xf32> -> vector<16x32xf32>
    %498 = arith.addf %477, %497 : vector<16x32xf32>
    %499 = arith.addf %355, %498 : vector<16x32xf32>
    %500 = vector.broadcast %379 : vector<1x32xf32> to vector<16x32xf32>
    %501 = arith.addf %499, %500 : vector<16x32xf32>
    %cst_307 = arith.constant dense<0.000000e+00> : vector<16xf32>
    %502 = vector.multi_reduction <add>, %501, %cst_307 [1] : vector<16x32xf32> to vector<16xf32>
    %503 = vector.shape_cast %502 : vector<16xf32> to vector<16x1xf32>
    %cst_308 = arith.constant 3.200000e+01 : f32
    %504 = vector.broadcast %cst_308 : f32 to vector<16x1xf32>
    %505 = arith.divf %503, %504 : vector<16x1xf32>
    %506 = vector.broadcast %505 : vector<16x1xf32> to vector<16x32xf32>
    %507 = arith.subf %501, %506 : vector<16x32xf32>
    %508 = arith.mulf %507, %507 : vector<16x32xf32>
    %cst_309 = arith.constant dense<0.000000e+00> : vector<16xf32>
    %509 = vector.multi_reduction <add>, %508, %cst_309 [1] : vector<16x32xf32> to vector<16xf32>
    %510 = vector.shape_cast %509 : vector<16xf32> to vector<16x1xf32>
    %cst_310 = arith.constant 3.200000e+01 : f32
    %511 = vector.broadcast %cst_310 : f32 to vector<16x1xf32>
    %512 = arith.divf %510, %511 : vector<16x1xf32>
    %513 = vector.broadcast %505 : vector<16x1xf32> to vector<16x32xf32>
    %514 = arith.subf %501, %513 : vector<16x32xf32>
    %cst_311 = arith.constant 9.99999974E-6 : f32
    %515 = vector.broadcast %cst_311 : f32 to vector<16x1xf32>
    %516 = arith.addf %512, %515 : vector<16x1xf32>
    %517 = math.rsqrt %516 : vector<16x1xf32>
    %518 = vector.broadcast %517 : vector<16x1xf32> to vector<16x32xf32>
    %519 = arith.mulf %514, %518 : vector<16x32xf32>
    %520 = vector.broadcast %382 : vector<1x32xf32> to vector<16x32xf32>
    %521 = arith.mulf %519, %520 : vector<16x32xf32>
    %522 = vector.broadcast %385 : vector<1x32xf32> to vector<16x32xf32>
    %523 = arith.addf %521, %522 : vector<16x32xf32>
    %cst_312 = arith.constant dense<0.000000e+00> : vector<16x64xf32>
    %524 = tpu.matmul %523, %361, %cst_312 {dimension_numbers = #tpu.dot_dimension_numbers<[1], [0], [0], [1], [0, 0, 1, 1], [], []>} : vector<16x32xf32>, vector<32x64xf32>, vector<16x64xf32> -> vector<16x64xf32>
    %525 = vector.broadcast %370 : vector<1x64xf32> to vector<16x64xf32>
    %526 = arith.addf %524, %525 : vector<16x64xf32>
    %cst_313 = arith.constant 0.000000e+00 : f32
    %527 = vector.broadcast %cst_313 : f32 to vector<16x64xf32>
    %528 = arith.maximumf %526, %527 : vector<16x64xf32>
    %cst_314 = arith.constant dense<0.000000e+00> : vector<16x32xf32>
    %529 = tpu.matmul %528, %364, %cst_314 {dimension_numbers = #tpu.dot_dimension_numbers<[1], [0], [0], [1], [0, 0, 1, 1], [], []>} : vector<16x64xf32>, vector<64x32xf32>, vector<16x32xf32> -> vector<16x32xf32>
    %530 = arith.addf %501, %529 : vector<16x32xf32>
    %531 = vector.broadcast %388 : vector<1x32xf32> to vector<16x32xf32>
    %532 = arith.addf %530, %531 : vector<16x32xf32>
    %c0_315 = arith.constant 0 : index
    %c0_316 = arith.constant 0 : index
    %533 = vector.load %arg4[%c0_315, %c0_316] : memref<16x32xf32, #tpu.memory_space<vmem>>, vector<16x32xf32>
    tpu.vector_store %arg4[%c0_315, %c0_316], %532 {strides = array<i32>} : memref<16x32xf32, #tpu.memory_space<vmem>>, vector<16x32xf32>,
    return
  }
  func.func @transform_0(%arg0: i32) -> (i32, i32) {
    %c0_i32 = arith.constant 0 : i32
    %c0_i32_0 = arith.constant 0 : i32
    %c0_i32_1 = arith.constant 0 : i32
    return %c0_i32, %c0_i32_0 : i32, i32
  }
  func.func @transform_1(%arg0: i32) -> (i32, i32) {
    %c0_i32 = arith.constant 0 : i32
    %c0_i32_0 = arith.constant 0 : i32
    %c0_i32_1 = arith.constant 0 : i32
    return %c0_i32, %c0_i32_0 : i32, i32
  }
  func.func @transform_2(%arg0: i32) -> (i32, i32, i32) {
    %c0_i32 = arith.constant 0 : i32
    %c0_i32_0 = arith.constant 0 : i32
    %c0_i32_1 = arith.constant 0 : i32
    %c0_i32_2 = arith.constant 0 : i32
    return %c0_i32, %c0_i32_0, %c0_i32_1 : i32, i32, i32
  }
  func.func @transform_3(%arg0: i32) -> (i32, i32) {
    %c0_i32 = arith.constant 0 : i32
    %c0_i32_0 = arith.constant 0 : i32
    %c0_i32_1 = arith.constant 0 : i32
    return %c0_i32, %c0_i32_0 : i32, i32
  }
}

</mosaic_0001>

<bundles_post_ra>
// kernel: tpu_custom_call.1
= control target key start
LH: loop header
LB: loop body
LE: loop exit
PB: predicated region body
PF: predicated region fallthrough
CT: control target
= control target key end

     0   :  { %8 = vsyncpa [#allocation3], 0  ;;  %s3576_s0 = inlined_call_operand.hbm [shape: f32[16,32], index: 0, kind: input, shape index: {}]   ;;  %s3577_s1 = inlined_call_operand.hbm [shape: f32[16,16], index: 1, kind: input, shape index: {}]   ;;  %s3578_s2 = inlined_call_operand.hbm [shape: f32[3,168,128], index: 2, kind: input, shape index: {}]   ;;  %s3579_s3 = inlined_call_operand.hbm [shape: f32[16,32], index: 3, kind: output, shape index: {}]  }
   0x1   :  { %9 = vsyncpa [#allocation6], 0 }
   0x2   :  { %10 = vsyncpa [#allocation4], 0  ;;  %s28_s14 = sshll.u32 %s3577_s1, 4  ;;  %s3052_s15 = smov [#allocation5]   ;;  %s29_s14 = int_to_ptr.hbm [resolvable:$true] %s28_s14 }
   0x3   :  { %s30_s16 = sshll.u32 %s3052_s15, 4  ;;  %s15_s19 = sshll.u32 %s3576_s0, 4  ;;  %s31_s16 = int_to_ptr.vmem [resolvable:$true] %s30_s16  ;;  %s16_s19 = int_to_ptr.hbm [resolvable:$true] %s15_s19 }
   0x4   :  { %s3053_s20 = smov 128   ;;  %s3054_s21 = smov 8  }
   0x5   :  { %36 = dma.hbm_to_vmem [thread:$0]  %s29_s14, 256, %s31_s16, [#allocation6], %s3053_s20, %s3053_s20, %s3054_s21  }
   0x6   :  { %s3055_s22 = smov [#allocation2]   ;;  %s41_s1 = sshll.u32 %s3578_s2, 4  ;;  %s42_s1 = int_to_ptr.hbm [resolvable:$true] %s41_s1 }
   0x7   :  { %s17_s23 = sshll.u32 %s3055_s22, 4  ;;  %s3056_s0 = smov [#allocation7]   ;;  %s18_s23 = int_to_ptr.vmem [resolvable:$true] %s17_s23 }
   0x8   :  { %23 = dma.hbm_to_vmem [thread:$0]  %s16_s19, 256, %s18_s23, [#allocation3], %s3053_s20, %s3053_s20, %s3054_s21  }
   0x9   :  { %s43_s26 = sshll.u32 %s3056_s0, 4  ;;  %s44_s26 = int_to_ptr.vmem [resolvable:$true] %s43_s26 }
   0xa   :  { %49 = dma.hbm_to_vmem [thread:$0]  %s42_s1, 8064, %s44_s26, [#allocation6], %s3053_s20, %s3053_s20, %s3054_s21  }
   0xb   :  { %3046 = dma.done.wait [#allocation3], 256  }
   0xc   :  { %3047 = vsyncadd [#allocation3], 4294967040 }
   0xd   :  { %3048 = dma.done.wait [#allocation6], 8320  }
   0xe   :  { %3049 = vsyncadd [#allocation6], 4294958976  ;;  %vm90_vm0 = vcmask 261120   ;;  %v3108_v0 = vld [vmem:[#allocation2] sm:$0xff]  ;;  %v3110_v1 = vld [vmem:[#allocation2 + $0x8] sm:$0xff]  ;;  %v3057_v4 = vmov 32.0  }
   0xf   :  { %v91_v2 = vsel %vm90_vm0, %v3108_v0, 0.0  ;;  %v94_v3 = vsel %vm90_vm0, %v3110_v1, 0.0  ;;  %2824 = vrcp.f32 %v3057_v4  ;;  %v69_v21 = vld [vmem:[#allocation7 + $0x18] sm:$0xff]  ;;  %v68_v22 = vld [vmem:[#allocation7 + $0x10] sm:$0xff]  ;;  %v67_v23 = vld [vmem:[#allocation7 + $0x8] sm:$0xff]  ;;  %s3058_s2 = smov 96  }
  0x10   :  { %92 = vadd.xlane.f32.xlu0 %v91_v2  ;;  %167 = vmatpush.msra.mxu0 %v69_v21  ;;  %v66_v24 = vld [vmem:[#allocation7] sm:$0xff]  ;;  %vm184_vm8 = vcmask 64512   ;;  %v3134_v60 = vld [vmem:[#allocation5] sm:$0xff]  ;;  %vm216_vm9 = vcmask 130048   ;;  %v3138_v2 = vld [vmem:[#allocation5 + $0x8] sm:$0xff]  ;;  %s3059_s27 = smov 64  }
  0x11   :  { %v2800_v39 = vld [vmem:[#allocation7 + $0xa2] ss:$0 sm:$0xff]  ;;  %v2801_v43 = vld [vmem:[#allocation7 + $0xa3] ss:$0 sm:$0xff]  ;;  %v2802_v54 = vld [vmem:[#allocation7 + $0xa0] ss:$0 sm:$0xff] }
  0x12   :  { %168 = vmatpush.msra.mxu0 %v68_v22  ;;  %s3060_s28 = smov 88   ;;  %s3061_s29 = smov 120   ;;  %v300_v22 = vld [vmem:[#allocation7 + $0x20] sm:$0xff] }
  0x13   :  { %s3062_s30 = smov 80   ;;  %s3063_s4 = smov 112  }
  0x14   :  { %169 = vmatpush.msra.mxu0 %v67_v23  ;;  %s3064_s5 = smov 104   ;;  %s3065_s6 = smov 72  }
  0x15   :  { %v2825_v5 = vpop.eup %2824  ;;  %s3066_s7 = smov 56   ;;  %s3067_s8 = smov 48  }
  0x16   :  { %v98_v6 = vmul.f32 32.0, %v2825_v5  ;;  %vm102_vm1 = vweird.f32 %v2825_v5  ;;  %170 = vmatpush.msra.mxu0 %v66_v24  ;;  %s3068_s9 = smov 40   ;;  %s3069_s10 = smov [#allocation8]  }
  0x17   :  { %s2590_s11 = sshll.u32 %s3069_s10, 4  ;;  %s2592_s14 = sshll.u32 %s3579_s3, 4  ;;  %s2591_s11 = int_to_ptr.vmem [resolvable:$true] %s2590_s11  ;;  %s2593_s14 = int_to_ptr.hbm [resolvable:$true] %s2592_s14 }
  0x18   :  { %95 = vadd.xlane.f32.xlu0 %v94_v3  ;;  %v99_v7 = vsub.f32 1.0, %v98_v6 }
  0x1a   :  { %v100_v8 = vmul.f32 %v2825_v5, %v99_v7 }
  0x1c   :  { %v101_v9 = vadd.f32 %v2825_v5, %v100_v8 }
  0x1e   :  { %v3116_v10 = vsel %vm102_vm1, %v2825_v5, %v101_v9 }
  0x83   :  { %v93_v11 = vpop.xlane.xlu0 %92 }
  0x84   :  { %v104_v12 = vmul.f32 %v3116_v10, %v93_v11 }
  0x86   :  { %v106_v13 = vsub.f32 %v3108_v0, %v104_v12 }
  0x88   :  { %v108_v14 = vmul.f32 %v106_v13, %v106_v13 }
  0x8a   :  { %v110_v15 = vsel %vm90_vm0, %v108_v14, 0.0 }
  0x8b   :  { %111 = vadd.xlane.f32.xlu1 %v110_v15  ;;  %v96_v16 = vpop.xlane.xlu0 %95 }
  0x8c   :  { %v105_v17 = vmul.f32 %v3116_v10, %v96_v16 }
  0x8e   :  { %v107_v18 = vsub.f32 %v3110_v1, %v105_v17 }
  0x90   :  { %v109_v19 = vmul.f32 %v107_v18, %v107_v18 }
  0x92   :  { %v113_v20 = vsel %vm90_vm0, %v109_v19, 0.0 }
  0x93   :  { %114 = vadd.xlane.f32.xlu1 %v113_v20 }
  0xfe   :  { %v112_v25 = vpop.xlane.xlu1 %111 }
  0xff   :  { %v116_v26 = vmul.f32 %v112_v25, %v3116_v10 }
 0x101   :  { %v118_v27 = vadd.f32 1e-05, %v116_v26 }
 0x103   :  { %2826 = vrsqrt.f32 %v118_v27  ;;  %vm126_vm3 = vweird.f32 %v118_v27 }
 0x106   :  { %v115_v28 = vpop.xlane.xlu1 %114 }
 0x107   :  { %v117_v29 = vmul.f32 %v115_v28, %v3116_v10 }
 0x109   :  { %v2827_v30 = vpop.eup %2826  ;;  %v119_v31 = vadd.f32 1e-05, %v117_v29 }
 0x10a   :  { %v121_v32 = vmul.f32 %v2827_v30, %v118_v27  ;;  %vm127_vm2 = vweird.f32 %v2827_v30 }
 0x10b   :  { %2828 = vrsqrt.f32 %v119_v31  ;;  %vm128_vm4 = vmor %vm126_vm3, %vm127_vm2  ;;  %vm136_vm6 = vweird.f32 %v119_v31 }
 0x10c   :  { %v122_v33 = vmul.f32 %v2827_v30, %v121_v32 }
 0x10e   :  { %v123_v34 = vmul.f32 0.5, %v122_v33 }
 0x110   :  { %v124_v35 = vsub.f32 1.5, %v123_v34 }
 0x111   :  { %v2829_v36 = vpop.eup %2828 }
 0x112   :  { %v125_v37 = vmul.f32 %v2827_v30, %v124_v35  ;;  %v131_v38 = vmul.f32 %v2829_v36, %v119_v31  ;;  %vm137_vm5 = vweird.f32 %v2829_v36 }
 0x113   :  { %vm138_vm7 = vmor %vm136_vm6, %vm137_vm5 }
 0x114   :  { %v129_v40 = vsel %vm128_vm4, %v2827_v30, %v125_v37  ;;  %v132_v41 = vmul.f32 %v2829_v36, %v131_v38 }
 0x115   :  { %v140_v42 = vmul.f32 %v129_v40, %v106_v13 }
 0x116   :  { %v133_v44 = vmul.f32 0.5, %v132_v41 }
 0x117   :  { %v143_v45 = vmul.f32 %v2800_v39, %v140_v42 }
 0x118   :  { %v134_v46 = vsub.f32 1.5, %v133_v44 }
 0x119   :  { %v146_v47 = vadd.f32 %v2801_v43, %v143_v45 }
 0x11a   :  { %v135_v48 = vmul.f32 %v2829_v36, %v134_v46 }
 0x11b   :  { %2606 = vmatmul.msk.f32.vlgmr.msra.gmra.mxu0 %vm90_vm0, %v146_v47 }
 0x11c   :  { %v139_v49 = vsel %vm138_vm7, %v2829_v36, %v135_v48 }
 0x11d   :  { %v141_v50 = vmul.f32 %v139_v49, %v107_v18 }
 0x11f   :  { %v144_v51 = vmul.f32 %v2800_v39, %v141_v50 }
 0x121   :  { %v147_v52 = vadd.f32 %v2801_v43, %v144_v51 }
 0x123   :  { %2607 = vmatmul.msk.f32.gmra.mxu0 %vm90_vm0, %v147_v52 }
 0x198   :  { %v172_v53 = vpop.f32.mrf.mxu0 }
 0x199   :  { %v173_v57 = vadd.f32 %v2802_v54, %v172_v53 }
 0x1a0   :  { %v175_v55 = vpop.f32.mrf.mxu0 }
 0x1a1   :  { %v176_v56 = vadd.f32 %v2802_v54, %v175_v55 }
 0x1a3   :  { %182 = vrot.lane.b32.xlu2 %v176_v56, %s3058_s2  ;;  %v3142_v6 = vpack.i.bf16 %v173_v57, %v176_v56 }
 0x1ab   :  { %180 = vrot.lane.b32.xlu2 %v173_v57, %s3058_s2 }
 0x1fd   :  { %v183_v58 = vpop.permute.xlu2 %182 }
 0x1fe   :  { %2608 = vmatpush.xpose.msk.msra.mxu1 %vm184_vm8, %v183_v58 }
 0x205   :  { %v181_v59 = vpop.permute.xlu2 %180 }
 0x206   :  { %2609 = vmatpush.xpose.msk.msra.mxu1 %vm184_vm8, %v181_v59 }
 0x209   :  { %2610 = vmatmul.msk.f32.vlgmr.msra.gmra.mxu1 %vm184_vm8, %v173_v57 }
 0x20a   :  { %474 = vmatpush.msrb.mxu1 %v300_v22 }
 0x211   :  { %2611 = vmatmul.msk.f32.gmra.mxu1 %vm184_vm8, %v176_v56 }
 0x286   :  { %v210_v61 = vpop.f32.mrf.mxu1 }
 0x287   :  { %v211_v62 = vadd.f32 %v210_v61, %v3134_v60 }
 0x289   :  { %v217_v63 = vsel %vm216_vm9, %v211_v62, -inf }
 0x28a   :  { %218 = vmax.xlane.f32.xlu0 %v217_v63 }
 0x28e   :  { %v213_v3 = vpop.f32.mrf.mxu1 }
 0x28f   :  { %v214_v4 = vadd.f32 %v213_v3, %v3138_v2 }
 0x291   :  { %v220_v5 = vsel %vm216_vm9, %v214_v4, -inf }
 0x292   :  { %221 = vmax.xlane.f32.xlu1 %v220_v5 }
 0x2ab   :  { %2741 = vrot.lane.b32.xlu1 %v3142_v6, %s3059_s27 }
 0x2b3   :  { %305 = vrot.lane.b32.xlu1 %v173_v57, %s3060_s28 }
 0x2bb   :  { %303 = vrot.lane.b32.xlu1 %v176_v56, %s3061_s29 }
 0x2c3   :  { %486 = vrot.lane.b32.xlu1 %v173_v57, %s3062_s30 }
 0x2cb   :  { %482 = vrot.lane.b32.xlu1 %v173_v57, %s3063_s4 }
 0x2d3   :  { %484 = vrot.lane.b32.xlu1 %v176_v56, %s3063_s4 }
 0x2fd   :  { %v219_v7 = vpop.xlane.xlu0 %218 }
 0x2fe   :  { %v223_v8 = vsub.f32 %v211_v62, %v219_v7 }
 0x300   :  { %v225_v9 = vmul.f32 1.442695, %v223_v8 }
 0x302   :  { %2830 = vpow2.f32 %v225_v9 }
 0x305   :  { %v222_v11 = vpop.xlane.xlu1 %221 }
 0x306   :  { %v224_v12 = vsub.f32 %v214_v4, %v222_v11 }
 0x308   :  { %v2831_v13 = vpop.eup %2830  ;;  %v227_v14 = vmul.f32 1.442695, %v224_v12 }
 0x309   :  { %v229_v15 = vsel %vm216_vm9, %v2831_v13, 0.0 }
 0x30a   :  { %2832 = vpow2.f32 %v227_v14  ;;  %230 = vadd.xlane.f32.xlu2 %v229_v15 }
 0x310   :  { %v2833_v16 = vpop.eup %2832 }
 0x311   :  { %v232_v17 = vsel %vm216_vm9, %v2833_v16, 0.0 }
 0x312   :  { %233 = vadd.xlane.f32.xlu0 %v232_v17 }
 0x31d   :  { %v2742_v18 = vpop.permute.xlu1 %2741 }
 0x31e   :  { %v2743_v19 = vunpack.i.l.bf16 %v2742_v18  ;;  %v2744_v20 = vunpack.i.h.bf16 %v2742_v18 }
 0x320   :  { %291 = vmatpush.msrb.mxu0 %v2743_v19  ;;  %2720 = vmatpush.msra.mxu2 %v2743_v19 }
 0x322   :  { %292 = vmatpush.msrb.mxu0 %v2744_v20  ;;  %2721 = vmatpush.msra.mxu2 %v2744_v20 }
 0x323   :  { %488 = vrot.lane.b32.xlu2 %v176_v56, %s3062_s30 }
 0x325   :  { %v306_v33 = vpop.permute.xlu1 %305 }
 0x326   :  { %307 = vrot.lane.b32.xlu0 %v176_v56, %s3060_s28 }
 0x32b   :  { %638 = vrot.lane.b32.xlu2 %v176_v56, %s3064_s5 }
 0x32d   :  { %v304_v46 = vpop.permute.xlu1 %303 }
 0x32e   :  { %301 = vrot.lane.b32.xlu0 %v173_v57, %s3061_s29 }
 0x335   :  { %v487_v51 = vpop.permute.xlu1 %486 }
 0x336   :  { %642 = vrot.lane.b32.xlu0 %v176_v56, %s3065_s6 }
 0x33d   :  { %v483_v53 = vpop.permute.xlu1 %482 }
 0x33e   :  { %640 = vrot.lane.b32.xlu0 %v173_v57, %s3065_s6 }
 0x345   :  { %v485_v55 = vpop.permute.xlu1 %484 }
 0x346   :  { %636 = vrot.lane.b32.xlu0 %v173_v57, %s3064_s5 }
 0x37d   :  { %v231_v21 = vpop.xlane.xlu2 %230 }
 0x37e   :  { %2834 = vrcp.f32 %v231_v21  ;;  %v246_v27 = vand.u32 2147483648, %v231_v21  ;;  %v244_v29 = vand.u32 2147483647, %v231_v21  ;;  %vm240_vm11 = vweird.f32 %v231_v21 }
 0x380   :  { %v247_v32 = vor.u32 1.1754944e-38, %v246_v27  ;;  %vm245_vm13 = vcmp.eq.f32.partialorder %v244_v29, 8.507059e+37 }
 0x384   :  { %v2835_v23 = vpop.eup %2834 }
 0x385   :  { %v236_v24 = vmul.f32 %v2835_v23, %v231_v21  ;;  %v234_v25 = vpop.xlane.xlu0 %233  ;;  %vm241_vm10 = vweird.f32 %v2835_v23  ;;  %v489_v49 = vpop.permute.xlu2 %488 }
 0x386   :  { %2836 = vrcp.f32 %v234_v25  ;;  %vm242_vm12 = vmor %vm240_vm11, %vm241_vm10  ;;  %v260_v39 = vand.u32 2147483648, %v234_v25  ;;  %v258_v41 = vand.u32 2147483647, %v234_v25  ;;  %vm254_vm15 = vweird.f32 %v234_v25 }
 0x387   :  { %v237_v26 = vsub.f32 1.0, %v236_v24 }
 0x388   :  { %v261_v43 = vor.u32 1.1754944e-38, %v260_v39  ;;  %vm259_vm2 = vcmp.eq.f32.partialorder %v258_v41, 8.507059e+37 }
 0x389   :  { %v238_v28 = vmul.f32 %v2835_v23, %v237_v26 }
 0x38b   :  { %v239_v30 = vadd.f32 %v2835_v23, %v238_v28 }
 0x38c   :  { %v2837_v31 = vpop.eup %2836 }
 0x38d   :  { %v250_v34 = vmul.f32 %v2837_v31, %v234_v25  ;;  %v243_v35 = vsel %vm242_vm12, %v2835_v23, %v239_v30  ;;  %vm255_vm14 = vweird.f32 %v2837_v31  ;;  %v639_v63 = vpop.permute.xlu2 %638 }
 0x38e   :  { %v248_v36 = vsel %vm245_vm13, %v247_v32, %v243_v35  ;;  %vm256_vm1 = vmor %vm254_vm15, %vm255_vm14 }
 0x38f   :  { %v251_v37 = vsub.f32 1.0, %v250_v34  ;;  %v263_v38 = vmul.f32 %v2831_v13, %v248_v36 }
 0x391   :  { %v252_v40 = vmul.f32 %v2837_v31, %v251_v37  ;;  %2612 = vmatmul.msk.f32.vlgmr.msrb.gmra.mxu0 %vm216_vm9, %v263_v38 }
 0x393   :  { %v253_v42 = vadd.f32 %v2837_v31, %v252_v40 }
 0x395   :  { %v257_v44 = vsel %vm256_vm1, %v2837_v31, %v253_v42 }
 0x396   :  { %v262_v45 = vsel %vm259_vm2, %v261_v43, %v257_v44 }
 0x397   :  { %v264_v47 = vmul.f32 %v2833_v16, %v262_v45 }
 0x398   :  { %v308_v48 = vpop.permute.xlu0 %307 }
 0x399   :  { %2613 = vmatmul.msk.f32.vlgmr.msra.gmra.mxu2 %vm216_vm9, %v264_v47  ;;  %2614 = vmatpush.xpose.msk.msra.mxu3 %vm184_vm8, %v308_v48 }
 0x39d   :  { %2615 = vmatpush.xpose.msk.msra.mxu3 %vm184_vm8, %v306_v33 }
 0x3a0   :  { %v302_v50 = vpop.permute.xlu0 %301 }
 0x3a1   :  { %2624 = vmatpush.xpose.msk.msrb.mxu3 %vm184_vm8, %v489_v49 }
 0x3a2   :  { %2616 = vmatmul.msk.f32.vlgmr.msra.gmra.mxu3 %vm184_vm8, %v302_v50 }
 0x3a5   :  { %2625 = vmatpush.xpose.msk.msrb.mxu3 %vm184_vm8, %v487_v51 }
 0x3a8   :  { %v643_v52 = vpop.permute.xlu0 %642 }
 0x3a9   :  { %2632 = vmatpush.xpose.msk.msra.mxu1 %vm184_vm8, %v643_v52 }
 0x3aa   :  { %2617 = vmatmul.msk.f32.gmra.mxu3 %vm184_vm8, %v304_v46 }
 0x3b0   :  { %v641_v54 = vpop.permute.xlu0 %640 }
 0x3b1   :  { %2633 = vmatpush.xpose.msk.msra.mxu1 %vm184_vm8, %v641_v54 }
 0x3b2   :  { %2626 = vmatmul.msk.f32.vlgmr.msrb.gmra.mxu3 %vm184_vm8, %v483_v53 }
 0x3b8   :  { %v637_v58 = vpop.permute.xlu0 %636 }
 0x3ba   :  { %2627 = vmatmul.msk.f32.gmra.mxu3 %vm184_vm8, %v485_v55 }
 0x40e   :  { %v294_v56 = vpop.f32.mrf.mxu0 }
 0x40f   :  { %2622 = vmatmul.msk.f32.vlgmr.msrb.gmra.mxu1 %vm184_vm8, %v294_v56 }
 0x41c   :  { %v297_v57 = vpop.f32.mrf.mxu2 }
 0x41d   :  { %2623 = vmatmul.msk.f32.gmra.mxu1 %vm184_vm8, %v297_v57 }
 0x425   :  { %v334_v59 = vpop.f32.mrf.mxu3  ;;  %2634 = vmatmul.msk.f32.vlgmr.msra.gmra.mxu1 %vm184_vm8, %v637_v58 }
 0x426   :  { %v335_v61 = vadd.f32 %v334_v59, %v3134_v60 }
 0x428   :  { %v340_v62 = vsel %vm216_vm9, %v335_v61, -inf }
 0x429   :  { %341 = vmax.xlane.f32.xlu0 %v340_v62 }
 0x42d   :  { %v337_v3 = vpop.f32.mrf.mxu3  ;;  %2635 = vmatmul.msk.f32.gmra.mxu1 %vm184_vm8, %v639_v63 }
 0x42e   :  { %v338_v4 = vadd.f32 %v337_v3, %v3138_v2 }
 0x430   :  { %v343_v5 = vsel %vm216_vm9, %v338_v4, -inf }
 0x431   :  { %344 = vmax.xlane.f32.xlu1 %v343_v5 }
 0x435   :  { %v515_v7 = vpop.f32.mrf.mxu3 }
 0x436   :  { %v516_v8 = vadd.f32 %v515_v7, %v3134_v60 }
 0x438   :  { %v521_v9 = vsel %vm216_vm9, %v516_v8, -inf }
 0x439   :  { %522 = vmax.xlane.f32.xlu0 %v521_v9 }
 0x43d   :  { %v518_v11 = vpop.f32.mrf.mxu3 }
 0x43e   :  { %v519_v12 = vadd.f32 %v518_v11, %v3138_v2 }
 0x440   :  { %v524_v13 = vsel %vm216_vm9, %v519_v12, -inf }
 0x441   :  { %525 = vmax.xlane.f32.xlu1 %v524_v13 }
 0x48c   :  { %v3184_v14 = vpop.f32.mrf.mxu1 }
 0x49a   :  { %v3186_v15 = vpop.f32.mrf.mxu1 }
 0x49c   :  { %v342_v16 = vpop.xlane.xlu0 %341 }
 0x49d   :  { %v346_v17 = vsub.f32 %v335_v61, %v342_v16 }
 0x49f   :  { %v348_v18 = vmul.f32 1.442695, %v346_v17 }
 0x4a1   :  { %2838 = vpow2.f32 %v348_v18 }
 0x4a2   :  { %v669_v19 = vpop.f32.mrf.mxu1 }
 0x4a3   :  { %v670_v20 = vadd.f32 %v669_v19, %v3134_v60 }
 0x4a4   :  { %v345_v21 = vpop.xlane.xlu1 %344 }
 0x4a5   :  { %v347_v22 = vsub.f32 %v338_v4, %v345_v21  ;;  %v675_v23 = vsel %vm216_vm9, %v670_v20, -inf }
 0x4a6   :  { %676 = vmax.xlane.f32.xlu2 %v675_v23 }
 0x4a7   :  { %v3190_v24 = vpop.eup %2838  ;;  %v350_v26 = vmul.f32 1.442695, %v347_v22 }
 0x4a8   :  { %v352_v25 = vsel %vm216_vm9, %v3190_v24, 0.0 }
 0x4a9   :  { %353 = vadd.xlane.f32.xlu0 %v352_v25  ;;  %2840 = vpow2.f32 %v350_v26 }
 0x4aa   :  { %v672_v27 = vpop.f32.mrf.mxu1 }
 0x4ab   :  { %v673_v28 = vadd.f32 %v672_v27, %v3138_v2 }
 0x4ac   :  { %v523_v29 = vpop.xlane.xlu0 %522 }
 0x4ad   :  { %v527_v30 = vsub.f32 %v516_v8, %v523_v29  ;;  %v678_v60 = vsel %vm216_vm9, %v673_v28, -inf }
 0x4ae   :  { %679 = vmax.xlane.f32.xlu2 %v678_v60 }
 0x4af   :  { %v529_v31 = vmul.f32 1.442695, %v527_v30  ;;  %v3196_v32 = vpop.eup %2840 }
 0x4b0   :  { %v355_v35 = vsel %vm216_vm9, %v3196_v32, 0.0 }
 0x4b1   :  { %2842 = vpow2.f32 %v529_v31 }
 0x4b4   :  { %v526_v33 = vpop.xlane.xlu1 %525 }
 0x4b5   :  { %v528_v34 = vsub.f32 %v519_v12, %v526_v33 }
 0x4b6   :  { %356 = vadd.xlane.f32.xlu2 %v355_v35 }
 0x4b7   :  { %v3200_v36 = vpop.eup %2842  ;;  %v531_v37 = vmul.f32 1.442695, %v528_v34 }
 0x4b8   :  { %v533_v2 = vsel %vm216_vm9, %v3200_v36, 0.0 }
 0x4b9   :  { %2844 = vpow2.f32 %v531_v37  ;;  %534 = vadd.xlane.f32.xlu0 %v533_v2 }
 0x4bf   :  { %v3204_v38 = vpop.eup %2844 }
 0x4c0   :  { %v536_v39 = vsel %vm216_vm9, %v3204_v38, 0.0 }
 0x4c1   :  { %537 = vadd.xlane.f32.xlu0 %v536_v39 }
 0x4ce   :  { %2746 = vrot.lane.b32.xlu2 %v3142_v6, %s3066_s7 }
 0x4d5   :  { %2756 = vrot.lane.b32.xlu0 %v3142_v6, %s3067_s8 }
 0x519   :  { %v677_v40 = vpop.xlane.xlu2 %676 }
 0x51a   :  { %v681_v41 = vsub.f32 %v670_v20, %v677_v40 }
 0x51c   :  { %v354_v42 = vpop.xlane.xlu0 %353  ;;  %v683_v43 = vmul.f32 1.442695, %v681_v41 }
 0x51d   :  { %2846 = vrcp.f32 %v354_v42  ;;  %v369_v57 = vand.u32 2147483648, %v354_v42  ;;  %vm363_vm4 = vweird.f32 %v354_v42  ;;  %v367_v58 = vand.u32 2147483647, %v354_v42 }
 0x51e   :  { %2848 = vpow2.f32 %v683_v43 }
 0x51f   :  { %v370_v63 = vor.u32 1.1754944e-38, %v369_v57  ;;  %vm368_vm6 = vcmp.eq.f32.partialorder %v367_v58, 8.507059e+37  ;;  %v604_v57 = vld [vmem:[#allocation7 + $0x30] sm:$0xff] }
 0x521   :  { %v680_v44 = vpop.xlane.xlu2 %679 }
 0x522   :  { %v682_v46 = vsub.f32 %v673_v28, %v680_v44 }
 0x523   :  { %v2847_v45 = vpop.eup %2846 }
 0x524   :  { %v359_v47 = vmul.f32 %v2847_v45, %v354_v42  ;;  %v3212_v48 = vpop.eup %2848  ;;  %v685_v49 = vmul.f32 1.442695, %v682_v46  ;;  %vm364_vm3 = vweird.f32 %v2847_v45 }
 0x525   :  { %v687_v51 = vsel %vm216_vm9, %v3212_v48, 0.0  ;;  %vm365_vm5 = vmor %vm363_vm4, %vm364_vm3 }
 0x526   :  { %v360_v50 = vsub.f32 1.0, %v359_v47  ;;  %2850 = vpow2.f32 %v685_v49  ;;  %688 = vadd.xlane.f32.xlu1 %v687_v51  ;;  %v423_v49 = vld [vmem:[#allocation7 + $0x28] sm:$0xff] }
 0x527   :  { %445 = vmatpush.msra.mxu0 %v423_v49 }
 0x528   :  { %v361_v52 = vmul.f32 %v2847_v45, %v360_v50 }
 0x529   :  { %v357_v53 = vpop.xlane.xlu2 %356  ;;  %626 = vmatpush.msrb.mxu0 %v604_v57  ;;  %v81_v57 = vld [vmem:[#allocation7 + $0x98] sm:$0xff] }
 0x52a   :  { %2852 = vrcp.f32 %v357_v53  ;;  %v362_v54 = vadd.f32 %v2847_v45, %v361_v52  ;;  %v383_v12 = vand.u32 2147483648, %v357_v53  ;;  %v381_v19 = vand.u32 2147483647, %v357_v53  ;;  %892 = vmatpush.msrb.mxu1 %v81_v57 }
 0x52b   :  { %vm377_vm10 = vweird.f32 %v357_v53 }
 0x52c   :  { %v535_v55 = vpop.xlane.xlu0 %534  ;;  %v3216_v56 = vpop.eup %2850  ;;  %v366_v61 = vsel %vm365_vm5, %v2847_v45, %v362_v54  ;;  %v384_v21 = vor.u32 1.1754944e-38, %v383_v12  ;;  %vm382_vm12 = vcmp.eq.f32.partialorder %v381_v19, 8.507059e+37 }
 0x52d   :  { %2854 = vrcp.f32 %v535_v55  ;;  %v690_v59 = vsel %vm216_vm9, %v3216_v56, 0.0  ;;  %v371_v8 = vsel %vm368_vm6, %v370_v63, %v366_v61  ;;  %v550_v60 = vand.u32 2147483648, %v535_v55 }
 0x52e   :  { %691 = vadd.xlane.f32.xlu1 %v690_v59  ;;  %v386_v18 = vmul.f32 %v3190_v24, %v371_v8  ;;  %vm544_vm14 = vweird.f32 %v535_v55  ;;  %v548_v31 = vand.u32 2147483647, %v535_v55 }
 0x52f   :  { %v551_v35 = vor.u32 1.1754944e-38, %v550_v60 }
 0x530   :  { %v2853_v62 = vpop.eup %2852  ;;  %vm549_vm1 = vcmp.eq.f32.partialorder %v548_v31, 8.507059e+37  ;;  %v2803_v31 = vld [vmem:[#allocation7 + $0xa4] ss:$0 sm:$0xff] }
 0x531   :  { %v373_v3 = vmul.f32 %v2853_v62, %v357_v53  ;;  %v2747_v4 = vpop.permute.xlu2 %2746  ;;  %vm378_vm7 = vweird.f32 %v2853_v62 }
 0x532   :  { %v2748_v7 = vunpack.i.l.bf16 %v2747_v4  ;;  %v2749_v16 = vunpack.i.h.bf16 %v2747_v4  ;;  %vm379_vm11 = vmor %vm377_vm10, %vm378_vm7 }
 0x533   :  { %v2855_v5 = vpop.eup %2854  ;;  %v374_v9 = vsub.f32 1.0, %v373_v3 }
 0x534   :  { %v538_v11 = vpop.xlane.xlu0 %537  ;;  %v540_v13 = vmul.f32 %v2855_v5, %v535_v55  ;;  %414 = vmatpush.msrb.mxu2 %v2748_v7  ;;  %vm545_vm13 = vweird.f32 %v2855_v5 }
 0x535   :  { %2856 = vrcp.f32 %v538_v11  ;;  %v375_v17 = vmul.f32 %v2853_v62, %v374_v9  ;;  %vm546_vm15 = vmor %vm544_vm14, %vm545_vm13  ;;  %v564_v40 = vand.u32 2147483648, %v538_v11  ;;  %vm558_vm3 = vweird.f32 %v538_v11 }
 0x536   :  { %415 = vmatpush.msrb.mxu2 %v2749_v16  ;;  %v541_v22 = vsub.f32 1.0, %v540_v13  ;;  %v562_v43 = vand.u32 2147483647, %v538_v11 }
 0x537   :  { %2618 = vmatmul.msk.f32.vlgmr.msrb.gmra.mxu2 %vm216_vm9, %v386_v18  ;;  %v376_v20 = vadd.f32 %v2853_v62, %v375_v17  ;;  %v565_v45 = vor.u32 1.1754944e-38, %v564_v40 }
 0x538   :  { %v542_v27 = vmul.f32 %v2855_v5, %v541_v22  ;;  %vm563_vm5 = vcmp.eq.f32.partialorder %v562_v43, 8.507059e+37 }
 0x539   :  { %v380_v23 = vsel %vm379_vm11, %v2853_v62, %v376_v20 }
 0x53a   :  { %v385_v26 = vsel %vm382_vm12, %v384_v21, %v380_v23  ;;  %v543_v24 = vadd.f32 %v2855_v5, %v542_v27  ;;  %v758_v23 = vld [vmem:[#allocation7 + $0x38] sm:$0xff] }
 0x53b   :  { %v2857_v25 = vpop.eup %2856  ;;  %v387_v29 = vmul.f32 %v3196_v32, %v385_v26 }
 0x53c   :  { %v554_v28 = vmul.f32 %v2857_v25, %v538_v11  ;;  %v547_v33 = vsel %vm546_vm15, %v2855_v5, %v543_v24  ;;  %vm559_vm2 = vweird.f32 %v2857_v25 }
 0x53d   :  { %v552_v2 = vsel %vm549_vm1, %v551_v35, %v547_v33  ;;  %vm560_vm4 = vmor %vm558_vm3, %vm559_vm2 }
 0x53e   :  { %v555_v30 = vsub.f32 1.0, %v554_v28  ;;  %v567_v42 = vmul.f32 %v3200_v36, %v552_v2 }
 0x53f   :  { %2619 = vmatmul.msk.f32.gmra.mxu2 %vm216_vm9, %v387_v29 }
 0x540   :  { %v556_v34 = vmul.f32 %v2857_v25, %v555_v30 }
 0x542   :  { %v557_v32 = vadd.f32 %v2857_v25, %v556_v34 }
 0x544   :  { %v561_v44 = vsel %vm560_vm4, %v2857_v25, %v557_v32 }
 0x545   :  { %v566_v46 = vsel %vm563_vm5, %v565_v45, %v561_v44 }
 0x546   :  { %v568_v47 = vmul.f32 %v3204_v38, %v566_v46 }
 0x547   :  { %v2757_v37 = vpop.permute.xlu0 %2756  ;;  %2751 = vrot.lane.b32.xlu1 %v3142_v6, %s3068_s9 }
 0x548   :  { %v2758_v39 = vunpack.i.l.bf16 %v2757_v37  ;;  %v2759_v41 = vunpack.i.h.bf16 %v2757_v37 }
 0x54a   :  { %595 = vmatpush.msra.mxu2 %v2758_v39 }
 0x54c   :  { %596 = vmatpush.msra.mxu2 %v2759_v41 }
 0x54d   :  { %2628 = vmatmul.msk.f32.vlgmr.msra.gmra.mxu2 %vm216_vm9, %v567_v42 }
 0x54e   :  { %780 = vmatpush.msrb.mxu2 %v758_v23 }
 0x555   :  { %2629 = vmatmul.msk.f32.gmra.mxu2 %vm216_vm9, %v568_v47 }
 0x599   :  { %v689_v6 = vpop.xlane.xlu1 %688 }
 0x59a   :  { %2858 = vrcp.f32 %v689_v6  ;;  %v704_v38 = vand.u32 2147483648, %v689_v6  ;;  %vm698_vm7 = vweird.f32 %v689_v6  ;;  %v702_v61 = vand.u32 2147483647, %v689_v6 }
 0x59c   :  { %v705_v3 = vor.u32 1.1754944e-38, %v704_v38  ;;  %vm703_vm11 = vcmp.eq.f32.partialorder %v702_v61, 8.507059e+37 }
 0x5a0   :  { %v2859_v51 = vpop.eup %2858 }
 0x5a1   :  { %v692_v50 = vpop.xlane.xlu1 %691  ;;  %v694_v36 = vmul.f32 %v2859_v51, %v689_v6  ;;  %vm699_vm6 = vweird.f32 %v2859_v51 }
 0x5a2   :  { %2860 = vrcp.f32 %v692_v50  ;;  %vm700_vm10 = vmor %vm698_vm7, %vm699_vm6  ;;  %v718_v11 = vand.u32 2147483648, %v692_v50  ;;  %vm712_vm13 = vweird.f32 %v692_v50  ;;  %v716_v16 = vand.u32 2147483647, %v692_v50 }
 0x5a3   :  { %v695_v52 = vsub.f32 1.0, %v694_v36  ;;  %v71_v36 = vld [vmem:[#allocation7 + $0x48] sm:$0xff]  ;;  %vm877_vm7 = vcmask 523264  }
 0x5a4   :  { %v719_v18 = vor.u32 1.1754944e-38, %v718_v11  ;;  %vm717_vm15 = vcmp.eq.f32.partialorder %v716_v16, 8.507059e+37  ;;  %v2804_v16 = vld [vmem:[#allocation7 + $0xa5] ss:$0 sm:$0xff] }
 0x5a5   :  { %v696_v54 = vmul.f32 %v2859_v51, %v695_v52  ;;  %v70_v52 = vld [vmem:[#allocation7 + $0x40] sm:$0xff] }
 0x5a7   :  { %v697_v58 = vadd.f32 %v2859_v51, %v696_v54 }
 0x5a8   :  { %v2861_v53 = vpop.eup %2860 }
 0x5a9   :  { %v708_v55 = vmul.f32 %v2861_v53, %v692_v50  ;;  %v701_v62 = vsel %vm700_vm10, %v2859_v51, %v697_v58  ;;  %vm713_vm12 = vweird.f32 %v2861_v53  ;;  %v73_v50 = vld [vmem:[#allocation7 + $0x58] sm:$0xff]  ;;  %v72_v51 = vld [vmem:[#allocation7 + $0x50] sm:$0xff] }
 0x5aa   :  { %v706_v5 = vsel %vm703_vm11, %v705_v3, %v701_v62  ;;  %vm714_vm14 = vmor %vm712_vm13, %vm713_vm12  ;;  %v80_v58 = vld [vmem:[#allocation7 + $0x90] sm:$0xff]  ;;  %v78_v62 = vld [vmem:[#allocation7 + $0x80] sm:$0xff] }
 0x5ab   :  { %v709_v59 = vsub.f32 1.0, %v708_v55  ;;  %v721_v13 = vmul.f32 %v3212_v48, %v706_v5  ;;  %893 = vmatpush.msrb.mxu1 %v80_v58 }
 0x5ad   :  { %v710_v63 = vmul.f32 %v2861_v53, %v709_v59  ;;  %v79_v59 = vld [vmem:[#allocation7 + $0x88] sm:$0xff] }
 0x5ae   :  { %894 = vmatpush.msrb.mxu1 %v79_v59 }
 0x5af   :  { %v711_v9 = vadd.f32 %v2861_v53, %v710_v63 }
 0x5b0   :  { %895 = vmatpush.msrb.mxu1 %v78_v62 }
 0x5b1   :  { %v715_v17 = vsel %vm714_vm14, %v2861_v53, %v711_v9 }
 0x5b2   :  { %v720_v20 = vsel %vm717_vm15, %v719_v18, %v715_v17 }
 0x5b3   :  { %v722_v21 = vmul.f32 %v3216_v56, %v720_v20  ;;  %v2805_v20 = vld [vmem:[#allocation7 + $0xa6] ss:$0 sm:$0xff] }
 0x5b9   :  { %v2752_v4 = vpop.permute.xlu1 %2751 }
 0x5ba   :  { %v2753_v7 = vunpack.i.l.bf16 %v2752_v4  ;;  %v417_v8 = vpop.f32.mrf.mxu2  ;;  %v2754_v12 = vunpack.i.h.bf16 %v2752_v4  ;;  %v77_v4 = vld [vmem:[#allocation7 + $0x78] sm:$0xff] }
 0x5bb   :  { %2620 = vmatmul.msk.f32.vlgmr.msra.gmra.mxu0 %vm184_vm8, %v417_v8  ;;  %896 = vmatpush.msrb.mxu1 %v77_v4 }
 0x5bc   :  { %749 = vmatpush.msra.mxu3 %v2753_v7  ;;  %864 = vmatpush.msra.mxu0 %v73_v50 }
 0x5be   :  { %750 = vmatpush.msra.mxu3 %v2754_v12  ;;  %865 = vmatpush.msra.mxu0 %v72_v51 }
 0x5bf   :  { %2636 = vmatmul.msk.f32.vlgmr.msra.gmra.mxu3 %vm216_vm9, %v721_v13 }
 0x5c0   :  { %866 = vmatpush.msra.mxu0 %v71_v36 }
 0x5c2   :  { %v420_v19 = vpop.f32.mrf.mxu2  ;;  %867 = vmatpush.msra.mxu0 %v70_v52  ;;  %v916_v52 = vld [vmem:[#allocation7 + $0xc0] sm:$0xff] }
 0x5c3   :  { %2621 = vmatmul.msk.f32.gmra.mxu0 %vm184_vm8, %v420_v19  ;;  %1006 = vmatpush.msrb.mxu3 %v916_v52 }
 0x5c7   :  { %2637 = vmatmul.msk.f32.gmra.mxu3 %vm216_vm9, %v722_v21 }
 0x5d0   :  { %v598_v22 = vpop.f32.mrf.mxu2 }
 0x5d1   :  { %2630 = vmatmul.msk.f32.vlgmr.msrb.gmra.mxu0 %vm184_vm8, %v598_v22 }
 0x5d8   :  { %v601_v48 = vpop.f32.mrf.mxu2 }
 0x5d9   :  { %2631 = vmatmul.msk.f32.gmra.mxu0 %vm184_vm8, %v601_v48 }
 0x638   :  { %v447_v27 = vpop.f32.mrf.mxu0 }
 0x639   :  { %v477_v56 = vadd.f32 %v3184_v14, %v447_v27 }
 0x640   :  { %v450_v28 = vpop.f32.mrf.mxu0 }
 0x641   :  { %v480_v35 = vadd.f32 %v3186_v15, %v450_v28 }
 0x642   :  { %v752_v25 = vpop.f32.mrf.mxu3 }
 0x643   :  { %2638 = vmatmul.msk.f32.vlgmr.msrb.gmra.mxu2 %vm184_vm8, %v752_v25 }
 0x64a   :  { %v755_v26 = vpop.f32.mrf.mxu3 }
 0x64b   :  { %2639 = vmatmul.msk.f32.gmra.mxu2 %vm184_vm8, %v755_v26 }
 0x64e   :  { %v628_v29 = vpop.f32.mrf.mxu0 }
 0x64f   :  { %v634_v24 = vadd.f32 %v628_v29, %v477_v56  ;;  %v76_v56 = vld [vmem:[#allocation7 + $0x70] sm:$0xff] }
 0x650   :  { %897 = vmatpush.msrb.mxu1 %v76_v56 }
 0x656   :  { %v631_v34 = vpop.f32.mrf.mxu0 }
 0x657   :  { %v635_v2 = vadd.f32 %v631_v34, %v480_v35 }
 0x6c6   :  { %v782_v30 = vpop.f32.mrf.mxu2 }
 0x6c7   :  { %v788_v60 = vadd.f32 %v782_v30, %v634_v24  ;;  %v75_v24 = vld [vmem:[#allocation7 + $0x68] sm:$0xff]  ;;  %v74_v30 = vld [vmem:[#allocation7 + $0x60] sm:$0xff] }
 0x6c8   :  { %898 = vmatpush.msrb.mxu1 %v75_v24 }
 0x6c9   :  { %v790_v33 = vadd.f32 %v788_v60, %v3108_v0  ;;  %v2806_v60 = vld [vmem:[#allocation7 + $0xa1] ss:$0 sm:$0xff] }
 0x6ca   :  { %899 = vmatpush.msrb.mxu1 %v74_v30 }
 0x6cb   :  { %v3243_v37 = vadd.f32 %v2803_v31, %v790_v33 }
 0x6cd   :  { %v795_v39 = vsel %vm90_vm0, %v3243_v37, 0.0 }
 0x6ce   :  { %796 = vadd.xlane.f32.xlu2 %v795_v39  ;;  %v785_v32 = vpop.f32.mrf.mxu2 }
 0x6cf   :  { %v789_v40 = vadd.f32 %v785_v32, %v635_v2  ;;  %v2807_v32 = vld [vmem:[#allocation7 + $0xa7] ss:$0 sm:$0xff] }
 0x6d1   :  { %v791_v14 = vadd.f32 %v789_v40, %v3110_v1 }
 0x6d3   :  { %v3248_v41 = vadd.f32 %v2803_v31, %v791_v14 }
 0x6d5   :  { %v798_v42 = vsel %vm90_vm0, %v3248_v41, 0.0 }
 0x6d6   :  { %799 = vadd.xlane.f32.xlu0 %v798_v42 }
 0x741   :  { %v797_v0 = vpop.xlane.xlu2 %796 }
 0x742   :  { %v801_v15 = vmul.f32 %v797_v0, %v3116_v10 }
 0x744   :  { %v803_v43 = vsub.f32 %v3243_v37, %v801_v15 }
 0x746   :  { %v805_v44 = vmul.f32 %v803_v43, %v803_v43 }
 0x748   :  { %v807_v45 = vsel %vm90_vm0, %v805_v44, 0.0 }
 0x749   :  { %808 = vadd.xlane.f32.xlu1 %v807_v45  ;;  %v800_v46 = vpop.xlane.xlu0 %799 }
 0x74a   :  { %v802_v47 = vmul.f32 %v800_v46, %v3116_v10 }
 0x74c   :  { %v804_v1 = vsub.f32 %v3248_v41, %v802_v47 }
 0x74e   :  { %v806_v6 = vmul.f32 %v804_v1, %v804_v1 }
 0x750   :  { %v810_v49 = vsel %vm90_vm0, %v806_v6, 0.0 }
 0x751   :  { %811 = vadd.xlane.f32.xlu2 %v810_v49 }
 0x7bc   :  { %v809_v53 = vpop.xlane.xlu1 %808 }
 0x7bd   :  { %v813_v54 = vmul.f32 %v809_v53, %v3116_v10  ;;  %v915_v53 = vld [vmem:[#allocation7 + $0xb8] sm:$0xff] }
 0x7be   :  { %1007 = vmatpush.msrb.mxu3 %v915_v53 }
 0x7bf   :  { %v815_v55 = vadd.f32 1e-05, %v813_v54  ;;  %v914_v54 = vld [vmem:[#allocation7 + $0xb0] sm:$0xff] }
 0x7c0   :  { %1008 = vmatpush.msrb.mxu3 %v914_v54  ;;  %v1137_v54 = vld [vmem:[#allocation7 + $0xc8] sm:$0xff] }
 0x7c1   :  { %2862 = vrsqrt.f32 %v815_v55  ;;  %vm823_vm2 = vweird.f32 %v815_v55 }
 0x7c4   :  { %v812_v38 = vpop.xlane.xlu2 %811 }
 0x7c5   :  { %v814_v61 = vmul.f32 %v812_v38, %v3116_v10 }
 0x7c7   :  { %v2863_v63 = vpop.eup %2862  ;;  %v816_v3 = vadd.f32 1e-05, %v814_v61 }
 0x7c8   :  { %v818_v5 = vmul.f32 %v2863_v63, %v815_v55  ;;  %vm824_vm1 = vweird.f32 %v2863_v63  ;;  %v913_v55 = vld [vmem:[#allocation7 + $0xa8] sm:$0xff] }
 0x7c9   :  { %2864 = vrsqrt.f32 %v816_v3  ;;  %vm825_vm3 = vmor %vm823_vm2, %vm824_vm1  ;;  %vm833_vm5 = vweird.f32 %v816_v3  ;;  %1009 = vmatpush.msrb.mxu3 %v913_v55 }
 0x7ca   :  { %v819_v7 = vmul.f32 %v2863_v63, %v818_v5 }
 0x7cc   :  { %v820_v8 = vmul.f32 0.5, %v819_v7 }
 0x7ce   :  { %v821_v9 = vsub.f32 1.5, %v820_v8 }
 0x7cf   :  { %v2865_v11 = vpop.eup %2864 }
 0x7d0   :  { %v822_v12 = vmul.f32 %v2863_v63, %v821_v9  ;;  %v828_v13 = vmul.f32 %v2865_v11, %v816_v3  ;;  %vm834_vm4 = vweird.f32 %v2865_v11 }
 0x7d1   :  { %vm835_vm6 = vmor %vm833_vm5, %vm834_vm4 }
 0x7d2   :  { %v826_v17 = vsel %vm825_vm3, %v2863_v63, %v822_v12  ;;  %v829_v18 = vmul.f32 %v2865_v11, %v828_v13  ;;  %v2808_v12 = vld [vmem:[#allocation7 + $0x14a] ss:$0 sm:$0xff] }
 0x7d3   :  { %v837_v19 = vmul.f32 %v826_v17, %v803_v43 }
 0x7d4   :  { %v830_v21 = vmul.f32 0.5, %v829_v18  ;;  %v2809_v18 = vld [vmem:[#allocation7 + $0x14b] ss:$0 sm:$0xff] }
 0x7d5   :  { %v840_v22 = vmul.f32 %v2804_v16, %v837_v19 }
 0x7d6   :  { %v831_v48 = vsub.f32 1.5, %v830_v21 }
 0x7d7   :  { %v843_v23 = vadd.f32 %v2805_v20, %v840_v22 }
 0x7d8   :  { %v832_v25 = vmul.f32 %v2865_v11, %v831_v48 }
 0x7d9   :  { %2640 = vmatmul.msk.f32.vlgmr.msra.gmra.mxu0 %vm90_vm0, %v843_v23 }
 0x7da   :  { %v836_v26 = vsel %vm835_vm6, %v2865_v11, %v832_v25 }
 0x7db   :  { %v838_v27 = vmul.f32 %v836_v26, %v804_v1 }
 0x7dd   :  { %v841_v28 = vmul.f32 %v2804_v16, %v838_v27 }
 0x7df   :  { %v844_v29 = vadd.f32 %v2805_v20, %v841_v28  ;;  %v2810_v28 = vld [vmem:[#allocation7 + $0x148] ss:$0 sm:$0xff] }
 0x7e1   :  { %2641 = vmatmul.msk.f32.gmra.mxu0 %vm90_vm0, %v844_v29 }
 0x856   :  { %v869_v31 = vpop.f32.mrf.mxu0 }
 0x857   :  { %v870_v33 = vadd.f32 %v2806_v60, %v869_v31 }
 0x859   :  { %v875_v34 = vmax.f32 %v870_v33, 0.0 }
 0x85b   :  { %2642 = vmatmul.msk.f32.vlgmr.msrb.gmra.mxu1 %vm877_vm7, %v875_v34 }
 0x85e   :  { %v872_v35 = vpop.f32.mrf.mxu0 }
 0x85f   :  { %v873_v2 = vadd.f32 %v2806_v60, %v872_v35 }
 0x861   :  { %v876_v39 = vmax.f32 %v873_v2, 0.0 }
 0x863   :  { %2643 = vmatmul.msk.f32.gmra.mxu1 %vm877_vm7, %v876_v39 }
 0x8d8   :  { %v901_v40 = vpop.f32.mrf.mxu1 }
 0x8d9   :  { %v907_v14 = vadd.f32 %v901_v40, %v3243_v37 }
 0x8db   :  { %v3265_v42 = vadd.f32 %v2807_v32, %v907_v14 }
 0x8dd   :  { %v937_v0 = vsel %vm90_vm0, %v3265_v42, 0.0 }
 0x8de   :  { %938 = vadd.xlane.f32.xlu2 %v937_v0 }
 0x8e0   :  { %v904_v15 = vpop.f32.mrf.mxu1 }
 0x8e1   :  { %v908_v43 = vadd.f32 %v904_v15, %v3248_v41  ;;  %v3304_v15 = vld [vmem:[#allocation5 + $0x8] sm:$0xff] }
 0x8e3   :  { %v3270_v44 = vadd.f32 %v2807_v32, %v908_v43  ;;  %v3300_v32 = vld [vmem:[#allocation5] sm:$0xff] }
 0x8e5   :  { %v940_v45 = vsel %vm90_vm0, %v3270_v44, 0.0 }
 0x8e6   :  { %941 = vadd.xlane.f32.xlu0 %v940_v45 }
 0x951   :  { %v939_v46 = vpop.xlane.xlu2 %938 }
 0x952   :  { %v943_v47 = vmul.f32 %v939_v46, %v3116_v10 }
 0x954   :  { %v945_v37 = vsub.f32 %v3265_v42, %v943_v47 }
 0x956   :  { %v947_v1 = vmul.f32 %v945_v37, %v945_v37 }
 0x958   :  { %v949_v6 = vsel %vm90_vm0, %v947_v1, 0.0 }
 0x959   :  { %v942_v49 = vpop.xlane.xlu0 %941  ;;  %950 = vadd.xlane.f32.xlu1 %v949_v6 }
 0x95a   :  { %v944_v50 = vmul.f32 %v942_v49, %v3116_v10 }
 0x95c   :  { %v946_v41 = vsub.f32 %v3270_v44, %v944_v50 }
 0x95e   :  { %v948_v51 = vmul.f32 %v946_v41, %v946_v41 }
 0x960   :  { %v952_v36 = vsel %vm90_vm0, %v948_v51, 0.0 }
 0x961   :  { %953 = vadd.xlane.f32.xlu2 %v952_v36 }
 0x9cc   :  { %v951_v57 = vpop.xlane.xlu1 %950 }
 0x9cd   :  { %v955_v58 = vmul.f32 %v951_v57, %v3116_v10 }
 0x9cf   :  { %v957_v59 = vadd.f32 1e-05, %v955_v58 }
 0x9d1   :  { %2866 = vrsqrt.f32 %v957_v59  ;;  %vm965_vm11 = vweird.f32 %v957_v59 }
 0x9d4   :  { %v954_v38 = vpop.xlane.xlu2 %953 }
 0x9d5   :  { %v956_v61 = vmul.f32 %v954_v38, %v3116_v10 }
 0x9d7   :  { %v2867_v62 = vpop.eup %2866  ;;  %v958_v63 = vadd.f32 1e-05, %v956_v61 }
 0x9d8   :  { %v960_v3 = vmul.f32 %v2867_v62, %v957_v59  ;;  %vm966_vm10 = vweird.f32 %v2867_v62 }
 0x9d9   :  { %2868 = vrsqrt.f32 %v958_v63  ;;  %vm967_vm12 = vmor %vm965_vm11, %vm966_vm10  ;;  %vm975_vm14 = vweird.f32 %v958_v63 }
 0x9da   :  { %v961_v4 = vmul.f32 %v2867_v62, %v960_v3 }
 0x9dc   :  { %v962_v5 = vmul.f32 0.5, %v961_v4 }
 0x9de   :  { %v963_v7 = vsub.f32 1.5, %v962_v5 }
 0x9df   :  { %v2869_v8 = vpop.eup %2868 }
 0x9e0   :  { %v964_v9 = vmul.f32 %v2867_v62, %v963_v7  ;;  %v970_v11 = vmul.f32 %v2869_v8, %v958_v63  ;;  %vm976_vm13 = vweird.f32 %v2869_v8 }
 0x9e1   :  { %vm977_vm15 = vmor %vm975_vm14, %vm976_vm13 }
 0x9e2   :  { %v968_v13 = vsel %vm967_vm12, %v2867_v62, %v964_v9  ;;  %v971_v16 = vmul.f32 %v2869_v8, %v970_v11 }
 0x9e3   :  { %v979_v17 = vmul.f32 %v968_v13, %v945_v37 }
 0x9e4   :  { %v972_v19 = vmul.f32 0.5, %v971_v16 }
 0x9e5   :  { %v982_v20 = vmul.f32 %v2808_v12, %v979_v17 }
 0x9e6   :  { %v973_v21 = vsub.f32 1.5, %v972_v19 }
 0x9e7   :  { %v985_v22 = vadd.f32 %v2809_v18, %v982_v20 }
 0x9e8   :  { %v974_v48 = vmul.f32 %v2869_v8, %v973_v21 }
 0x9e9   :  { %2644 = vmatmul.msk.f32.vlgmr.msrb.gmra.mxu3 %vm90_vm0, %v985_v22 }
 0x9ea   :  { %v978_v23 = vsel %vm977_vm15, %v2869_v8, %v974_v48 }
 0x9eb   :  { %v980_v25 = vmul.f32 %v978_v23, %v946_v41 }
 0x9ed   :  { %v983_v26 = vmul.f32 %v2808_v12, %v980_v25 }
 0x9ef   :  { %v986_v27 = vadd.f32 %v2809_v18, %v983_v26 }
 0x9f1   :  { %2645 = vmatmul.msk.f32.gmra.mxu3 %vm90_vm0, %v986_v27 }
 0xa6c   :  { %v1011_v29 = vpop.f32.mrf.mxu3 }
 0xa6d   :  { %v1012_v56 = vadd.f32 %v2810_v28, %v1011_v29 }
 0xa6f   :  { %1019 = vrot.lane.b32.xlu1 %v1012_v56, %s3058_s2 }
 0xa74   :  { %v1014_v24 = vpop.f32.mrf.mxu3 }
 0xa75   :  { %v1015_v30 = vadd.f32 %v2810_v28, %v1014_v24 }
 0xa77   :  { %1021 = vrot.lane.b32.xlu0 %v1015_v30, %s3058_s2  ;;  %v3286_v60 = vpack.i.bf16 %v1012_v56, %v1015_v30 }
 0xa79   :  { %2761 = vrot.lane.b32.xlu1 %v3286_v60, %s3059_s27 }
 0xa81   :  { %1142 = vrot.lane.b32.xlu1 %v1012_v56, %s3060_s28 }
 0xa89   :  { %1138 = vrot.lane.b32.xlu1 %v1012_v56, %s3061_s29 }
 0xa91   :  { %1140 = vrot.lane.b32.xlu1 %v1015_v30, %s3061_s29 }
 0xa99   :  { %1323 = vrot.lane.b32.xlu1 %v1012_v56, %s3062_s30 }
 0xaa1   :  { %1477 = vrot.lane.b32.xlu1 %v1012_v56, %s3065_s6 }
 0xaa9   :  { %1473 = vrot.lane.b32.xlu1 %v1012_v56, %s3064_s5 }
 0xae1   :  { %v1020_v31 = vpop.permute.xlu1 %1019 }
 0xae9   :  { %v1022_v33 = vpop.permute.xlu0 %1021 }
 0xaea   :  { %2646 = vmatpush.xpose.msk.msra.mxu2 %vm184_vm8, %v1022_v33 }
 0xaeb   :  { %v2762_v34 = vpop.permute.xlu1 %2761 }
 0xaec   :  { %v2763_v35 = vunpack.i.l.bf16 %v2762_v34  ;;  %v2764_v2 = vunpack.i.h.bf16 %v2762_v34 }
 0xaee   :  { %2647 = vmatpush.xpose.msk.msra.mxu2 %vm184_vm8, %v1020_v31  ;;  %1128 = vmatpush.msrb.mxu0 %v2763_v35 }
 0xaf0   :  { %1129 = vmatpush.msrb.mxu0 %v2764_v2 }
 0xaf1   :  { %2648 = vmatmul.msk.f32.vlgmr.msra.gmra.mxu2 %vm184_vm8, %v1012_v56 }
 0xaf2   :  { %1311 = vmatpush.msra.mxu0 %v1137_v54 }
 0xaf3   :  { %v1143_v52 = vpop.permute.xlu1 %1142 }
 0xaf9   :  { %2649 = vmatmul.msk.f32.gmra.mxu2 %vm184_vm8, %v1015_v30 }
 0xafb   :  { %v1139_v55 = vpop.permute.xlu1 %1138 }
 0xb03   :  { %v1141_v7 = vpop.permute.xlu1 %1140 }
 0xb0b   :  { %v1324_v25 = vpop.permute.xlu1 %1323 }
 0xb13   :  { %v1478_v28 = vpop.permute.xlu1 %1477 }
 0xb74   :  { %v1048_v39 = vpop.f32.mrf.mxu2 }
 0xb75   :  { %v1049_v40 = vadd.f32 %v3300_v32, %v1048_v39 }
 0xb77   :  { %v1054_v14 = vsel %vm216_vm9, %v1049_v40, -inf }
 0xb78   :  { %1055 = vmax.xlane.f32.xlu2 %v1054_v14 }
 0xb7c   :  { %v1051_v0 = vpop.f32.mrf.mxu2 }
 0xb7d   :  { %v1052_v43 = vadd.f32 %v3304_v15, %v1051_v0 }
 0xb7f   :  { %v1057_v45 = vsel %vm216_vm9, %v1052_v43, -inf }
 0xb80   :  { %1058 = vmax.xlane.f32.xlu2 %v1057_v45 }
 0xbeb   :  { %v1056_v46 = vpop.xlane.xlu2 %1055 }
 0xbec   :  { %v1060_v47 = vsub.f32 %v1049_v40, %v1056_v46  ;;  %v1474_v40 = vpop.permute.xlu1 %1473 }
 0xbee   :  { %v1062_v37 = vmul.f32 1.442695, %v1060_v47 }
 0xbf0   :  { %2870 = vpow2.f32 %v1062_v37 }
 0xbf3   :  { %v1059_v1 = vpop.xlane.xlu2 %1058 }
 0xbf4   :  { %v1061_v6 = vsub.f32 %v1052_v43, %v1059_v1 }
 0xbf6   :  { %v2871_v49 = vpop.eup %2870  ;;  %v1064_v50 = vmul.f32 1.442695, %v1061_v6 }
 0xbf7   :  { %v1066_v41 = vsel %vm216_vm9, %v2871_v49, 0.0 }
 0xbf8   :  { %2872 = vpow2.f32 %v1064_v50  ;;  %1067 = vadd.xlane.f32.xlu0 %v1066_v41 }
 0xbfe   :  { %v2873_v51 = vpop.eup %2872 }
 0xbff   :  { %v1069_v36 = vsel %vm216_vm9, %v2873_v51, 0.0 }
 0xc00   :  { %1070 = vadd.xlane.f32.xlu2 %v1069_v36 }
 0xc0c   :  { %1319 = vrot.lane.b32.xlu0 %v1012_v56, %s3063_s4 }
 0xc18   :  { %1144 = vrot.lane.b32.xlu2 %v1015_v30, %s3060_s28 }
 0xc20   :  { %1325 = vrot.lane.b32.xlu2 %v1015_v30, %s3062_s30 }
 0xc28   :  { %1479 = vrot.lane.b32.xlu2 %v1015_v30, %s3065_s6 }
 0xc30   :  { %1321 = vrot.lane.b32.xlu2 %v1015_v30, %s3063_s4 }
 0xc38   :  { %1475 = vrot.lane.b32.xlu2 %v1015_v30, %s3064_s5 }
 0xc6b   :  { %v1068_v53 = vpop.xlane.xlu0 %1067 }
 0xc6c   :  { %2874 = vrcp.f32 %v1068_v53  ;;  %v1083_v61 = vand.u32 2147483648, %v1068_v53  ;;  %v1081_v63 = vand.u32 2147483647, %v1068_v53  ;;  %vm1077_vm2 = vweird.f32 %v1068_v53 }
 0xc6e   :  { %v1084_v5 = vor.u32 1.1754944e-38, %v1083_v61  ;;  %vm1082_vm4 = vcmp.eq.f32.partialorder %v1081_v63, 8.507059e+37 }
 0xc72   :  { %v2875_v57 = vpop.eup %2874 }
 0xc73   :  { %v1073_v58 = vmul.f32 %v2875_v57, %v1068_v53  ;;  %v1071_v59 = vpop.xlane.xlu2 %1070  ;;  %vm1078_vm1 = vweird.f32 %v2875_v57 }
 0xc74   :  { %2876 = vrcp.f32 %v1071_v59  ;;  %vm1079_vm3 = vmor %vm1077_vm2, %vm1078_vm1  ;;  %v1097_v17 = vand.u32 2147483648, %v1071_v59  ;;  %v1095_v19 = vand.u32 2147483647, %v1071_v59  ;;  %vm1091_vm6 = vweird.f32 %v1071_v59 }
 0xc75   :  { %v1074_v38 = vsub.f32 1.0, %v1073_v58 }
 0xc76   :  { %v1098_v21 = vor.u32 1.1754944e-38, %v1097_v17  ;;  %vm1096_vm11 = vcmp.eq.f32.partialorder %v1095_v19, 8.507059e+37 }
 0xc77   :  { %v1075_v62 = vmul.f32 %v2875_v57, %v1074_v38 }
 0xc79   :  { %v1076_v3 = vadd.f32 %v2875_v57, %v1075_v62 }
 0xc7a   :  { %v2877_v4 = vpop.eup %2876 }
 0xc7b   :  { %v1080_v8 = vsel %vm1079_vm3, %v2875_v57, %v1076_v3  ;;  %v1087_v9 = vmul.f32 %v2877_v4, %v1071_v59  ;;  %v1145_v11 = vpop.permute.xlu2 %1144  ;;  %vm1092_vm5 = vweird.f32 %v2877_v4 }
 0xc7c   :  { %v1085_v12 = vsel %vm1082_vm4, %v1084_v5, %v1080_v8  ;;  %2652 = vmatpush.xpose.msk.msra.mxu1 %vm184_vm8, %v1145_v11  ;;  %vm1093_vm10 = vmor %vm1091_vm6, %vm1092_vm5 }
 0xc7d   :  { %v1088_v13 = vsub.f32 1.0, %v1087_v9  ;;  %v1100_v16 = vmul.f32 %v2871_v49, %v1085_v12 }
 0xc7e   :  { %v1320_v29 = vpop.permute.xlu0 %1319 }
 0xc7f   :  { %v1089_v18 = vmul.f32 %v2877_v4, %v1088_v13  ;;  %2650 = vmatmul.msk.f32.vlgmr.msrb.gmra.mxu0 %vm216_vm9, %v1100_v16 }
 0xc80   :  { %2653 = vmatpush.xpose.msk.msra.mxu1 %vm184_vm8, %v1143_v52 }
 0xc81   :  { %v1090_v20 = vadd.f32 %v2877_v4, %v1089_v18 }
 0xc83   :  { %2654 = vmatmul.msk.f32.vlgmr.msra.gmra.mxu1 %vm184_vm8, %v1139_v55  ;;  %v1326_v22 = vpop.permute.xlu2 %1325  ;;  %v1094_v48 = vsel %vm1093_vm10, %v2877_v4, %v1090_v20 }
 0xc84   :  { %2662 = vmatpush.xpose.msk.msrb.mxu1 %vm184_vm8, %v1326_v22  ;;  %v1099_v23 = vsel %vm1096_vm11, %v1098_v21, %v1094_v48 }
 0xc85   :  { %v1101_v26 = vmul.f32 %v2873_v51, %v1099_v23 }
 0xc87   :  { %2651 = vmatmul.msk.f32.gmra.mxu0 %vm216_vm9, %v1101_v26 }
 0xc88   :  { %2663 = vmatpush.xpose.msk.msrb.mxu1 %vm184_vm8, %v1324_v25 }
 0xc8b   :  { %2655 = vmatmul.msk.f32.gmra.mxu1 %vm184_vm8, %v1141_v7  ;;  %v1480_v27 = vpop.permute.xlu2 %1479 }
 0xc8c   :  { %2670 = vmatpush.xpose.msk.msrb.mxu0 %vm184_vm8, %v1480_v27 }
 0xc90   :  { %2671 = vmatpush.xpose.msk.msrb.mxu0 %vm184_vm8, %v1478_v28 }
 0xc93   :  { %2664 = vmatmul.msk.f32.vlgmr.msrb.gmra.mxu1 %vm184_vm8, %v1320_v29  ;;  %v1322_v56 = vpop.permute.xlu2 %1321 }
 0xc9b   :  { %2665 = vmatmul.msk.f32.gmra.mxu1 %vm184_vm8, %v1322_v56  ;;  %v1476_v45 = vpop.permute.xlu2 %1475 }
 0xcfc   :  { %v1131_v24 = vpop.f32.mrf.mxu0 }
 0xcfd   :  { %2660 = vmatmul.msk.f32.vlgmr.msra.gmra.mxu0 %vm184_vm8, %v1131_v24 }
 0xd00   :  { %v1171_v30 = vpop.f32.mrf.mxu1 }
 0xd01   :  { %v1172_v31 = vadd.f32 %v3300_v32, %v1171_v30 }
 0xd03   :  { %v1177_v33 = vsel %vm216_vm9, %v1172_v31, -inf }
 0xd04   :  { %v1134_v34 = vpop.f32.mrf.mxu0  ;;  %1178 = vmax.xlane.f32.xlu0 %v1177_v33 }
 0xd05   :  { %2661 = vmatmul.msk.f32.gmra.mxu0 %vm184_vm8, %v1134_v34 }
 0xd08   :  { %v1174_v35 = vpop.f32.mrf.mxu1 }
 0xd09   :  { %v1175_v2 = vadd.f32 %v3304_v15, %v1174_v35 }
 0xd0b   :  { %v1180_v39 = vsel %vm216_vm9, %v1175_v2, -inf }
 0xd0c   :  { %1181 = vmax.xlane.f32.xlu1 %v1180_v39 }
 0xd0d   :  { %2672 = vmatmul.msk.f32.vlgmr.msrb.gmra.mxu0 %vm184_vm8, %v1474_v40 }
 0xd10   :  { %v1352_v14 = vpop.f32.mrf.mxu1 }
 0xd11   :  { %v1353_v0 = vadd.f32 %v3300_v32, %v1352_v14 }
 0xd13   :  { %v1358_v43 = vsel %vm216_vm9, %v1353_v0, -inf }
 0xd14   :  { %1359 = vmax.xlane.f32.xlu2 %v1358_v43 }
 0xd15   :  { %2673 = vmatmul.msk.f32.gmra.mxu0 %vm184_vm8, %v1476_v45 }
 0xd18   :  { %v1355_v46 = vpop.f32.mrf.mxu1 }
 0xd19   :  { %v1356_v47 = vadd.f32 %v3304_v15, %v1355_v46 }
 0xd1b   :  { %v1361_v37 = vsel %vm216_vm9, %v1356_v47, -inf }
 0xd1c   :  { %1362 = vmax.xlane.f32.xlu0 %v1361_v37 }
 0xd77   :  { %v1179_v1 = vpop.xlane.xlu0 %1178 }
 0xd78   :  { %v1183_v6 = vsub.f32 %v1172_v31, %v1179_v1 }
 0xd7a   :  { %v1185_v49 = vmul.f32 1.442695, %v1183_v6  ;;  %v3340_v50 = vpop.f32.mrf.mxu0 }
 0xd7c   :  { %2878 = vpow2.f32 %v1185_v49 }
 0xd7f   :  { %v1182_v41 = vpop.xlane.xlu1 %1181 }
 0xd80   :  { %v1184_v53 = vsub.f32 %v1175_v2, %v1182_v41 }
 0xd82   :  { %v3342_v51 = vpop.eup %2878  ;;  %v3344_v36 = vpop.f32.mrf.mxu0  ;;  %v1187_v54 = vmul.f32 1.442695, %v1184_v53 }
 0xd83   :  { %v1189_v52 = vsel %vm216_vm9, %v3342_v51, 0.0 }
 0xd84   :  { %1190 = vadd.xlane.f32.xlu0 %v1189_v52  ;;  %2880 = vpow2.f32 %v1187_v54 }
 0xd87   :  { %v1360_v55 = vpop.xlane.xlu2 %1359 }
 0xd88   :  { %v1364_v58 = vsub.f32 %v1353_v0, %v1360_v55  ;;  %v1260_v55 = vld [vmem:[#allocation7 + $0xd0] sm:$0xff] }
 0xd89   :  { %1282 = vmatpush.msrb.mxu2 %v1260_v55 }
 0xd8a   :  { %v1506_v57 = vpop.f32.mrf.mxu0  ;;  %v1366_v61 = vmul.f32 1.442695, %v1364_v58  ;;  %v3350_v3 = vpop.eup %2880 }
 0xd8b   :  { %v1507_v59 = vadd.f32 %v3300_v32, %v1506_v57  ;;  %v1192_v8 = vsel %vm216_vm9, %v3350_v3, 0.0 }
 0xd8c   :  { %2882 = vpow2.f32 %v1366_v61 }
 0xd8d   :  { %v1512_v38 = vsel %vm216_vm9, %v1507_v59, -inf }
 0xd8e   :  { %1513 = vmax.xlane.f32.xlu1 %v1512_v38 }
 0xd8f   :  { %v1363_v62 = vpop.xlane.xlu0 %1362 }
 0xd90   :  { %v1365_v63 = vsub.f32 %v1356_v47, %v1363_v62 }
 0xd92   :  { %v1368_v4 = vmul.f32 1.442695, %v1365_v63  ;;  %v1509_v5 = vpop.f32.mrf.mxu0  ;;  %v3358_v11 = vpop.eup %2882 }
 0xd93   :  { %v1510_v7 = vadd.f32 %v3304_v15, %v1509_v5  ;;  %v1370_v16 = vsel %vm216_vm9, %v3358_v11, 0.0 }
 0xd94   :  { %2884 = vpow2.f32 %v1368_v4 }
 0xd95   :  { %v1515_v9 = vsel %vm216_vm9, %v1510_v7, -inf }
 0xd96   :  { %1193 = vadd.xlane.f32.xlu1 %v1192_v8  ;;  %1516 = vmax.xlane.f32.xlu2 %v1515_v9 }
 0xd98   :  { %2766 = vrot.lane.b32.xlu0 %v3286_v60, %s3066_s7 }
 0xd9a   :  { %v3360_v12 = vpop.eup %2884 }
 0xd9b   :  { %v1373_v13 = vsel %vm216_vm9, %v3360_v12, 0.0 }
 0xd9e   :  { %1374 = vadd.xlane.f32.xlu1 %v1373_v13  ;;  %1371 = vadd.xlane.f32.xlu2 %v1370_v16 }
 0xdf7   :  { %v1191_v17 = vpop.xlane.xlu0 %1190 }
 0xdf8   :  { %2886 = vrcp.f32 %v1191_v17  ;;  %v1206_v26 = vand.u32 2147483648, %v1191_v17  ;;  %vm1200_vm13 = vweird.f32 %v1191_v17  ;;  %v1204_v27 = vand.u32 2147483647, %v1191_v17 }
 0xdfa   :  { %v1207_v29 = vor.u32 1.1754944e-38, %v1206_v26  ;;  %vm1205_vm15 = vcmp.eq.f32.partialorder %v1204_v27, 8.507059e+37 }
 0xdfe   :  { %v2887_v18 = vpop.eup %2886 }
 0xdff   :  { %v1196_v19 = vmul.f32 %v2887_v18, %v1191_v17  ;;  %vm1201_vm12 = vweird.f32 %v2887_v18 }
 0xe00   :  { %vm1202_vm14 = vmor %vm1200_vm13, %vm1201_vm12 }
 0xe01   :  { %v1197_v20 = vsub.f32 1.0, %v1196_v19  ;;  %v1514_v21 = vpop.xlane.xlu1 %1513 }
 0xe02   :  { %v1518_v22 = vsub.f32 %v1507_v59, %v1514_v21 }
 0xe03   :  { %v1198_v48 = vmul.f32 %v2887_v18, %v1197_v20 }
 0xe04   :  { %v1520_v23 = vmul.f32 1.442695, %v1518_v22 }
 0xe05   :  { %v1199_v25 = vadd.f32 %v2887_v18, %v1198_v48 }
 0xe06   :  { %2888 = vpow2.f32 %v1520_v23 }
 0xe07   :  { %v1203_v28 = vsel %vm1202_vm14, %v2887_v18, %v1199_v25 }
 0xe08   :  { %v1208_v33 = vsel %vm1205_vm15, %v1207_v29, %v1203_v28 }
 0xe09   :  { %v1194_v56 = vpop.xlane.xlu1 %1193  ;;  %v1517_v24 = vpop.xlane.xlu2 %1516  ;;  %v1223_v14 = vmul.f32 %v3342_v51, %v1208_v33 }
 0xe0a   :  { %2890 = vrcp.f32 %v1194_v56  ;;  %v1519_v30 = vsub.f32 %v1510_v7, %v1517_v24  ;;  %v2767_v31 = vpop.permute.xlu0 %2766  ;;  %v1220_v47 = vand.u32 2147483648, %v1194_v56  ;;  %v1218_v6 = vand.u32 2147483647, %v1194_v56 }
 0xe0b   :  { %v2768_v34 = vunpack.i.l.bf16 %v2767_v31  ;;  %v2769_v39 = vunpack.i.h.bf16 %v2767_v31  ;;  %vm1214_vm2 = vweird.f32 %v1194_v56 }
 0xe0c   :  { %v3366_v35 = vpop.eup %2888  ;;  %v1522_v2 = vmul.f32 1.442695, %v1519_v30  ;;  %v1221_v41 = vor.u32 1.1754944e-38, %v1220_v47  ;;  %vm1219_vm4 = vcmp.eq.f32.partialorder %v1218_v6, 8.507059e+37 }
 0xe0d   :  { %1251 = vmatpush.msra.mxu3 %v2768_v34  ;;  %v1524_v40 = vsel %vm216_vm9, %v3366_v35, 0.0 }
 0xe0e   :  { %2892 = vpow2.f32 %v1522_v2  ;;  %1525 = vadd.xlane.f32.xlu2 %v1524_v40 }
 0xe0f   :  { %1252 = vmatpush.msra.mxu3 %v2769_v39 }
 0xe10   :  { %v2891_v0 = vpop.eup %2890  ;;  %2656 = vmatmul.msk.f32.vlgmr.msra.gmra.mxu3 %vm216_vm9, %v1223_v14 }
 0xe11   :  { %v1210_v43 = vmul.f32 %v2891_v0, %v1194_v56  ;;  %vm1215_vm1 = vweird.f32 %v2891_v0  ;;  %v1372_v54 = vpop.xlane.xlu2 %1371  ;;  %v1375_v57 = vpop.xlane.xlu1 %1374 }
 0xe12   :  { %vm1216_vm3 = vmor %vm1214_vm2, %vm1215_vm1  ;;  %2894 = vrcp.f32 %v1372_v54  ;;  %v1387_v7 = vand.u32 2147483648, %v1372_v54  ;;  %vm1381_vm6 = vweird.f32 %v1372_v54  ;;  %v1385_v8 = vand.u32 2147483647, %v1372_v54 }
 0xe13   :  { %v1211_v45 = vsub.f32 1.0, %v1210_v43  ;;  %2896 = vrcp.f32 %v1375_v57  ;;  %v1401_v22 = vand.u32 2147483648, %v1375_v57  ;;  %vm1395_vm13 = vweird.f32 %v1375_v57 }
 0xe14   :  { %v3372_v46 = vpop.eup %2892  ;;  %v1388_v13 = vor.u32 1.1754944e-38, %v1387_v7  ;;  %vm1386_vm11 = vcmp.eq.f32.partialorder %v1385_v8, 8.507059e+37  ;;  %v1399_v25 = vand.u32 2147483647, %v1375_v57  ;;  %v2811_v8 = vld [vmem:[#allocation7 + $0x14c] ss:$0 sm:$0xff] }
 0xe15   :  { %v1212_v37 = vmul.f32 %v2891_v0, %v1211_v45  ;;  %v1527_v1 = vsel %vm216_vm9, %v3372_v46, 0.0  ;;  %v1402_v28 = vor.u32 1.1754944e-38, %v1401_v22 }
 0xe16   :  { %1528 = vadd.xlane.f32.xlu1 %v1527_v1  ;;  %vm1400_vm15 = vcmp.eq.f32.partialorder %v1399_v25, 8.507059e+37 }
 0xe17   :  { %v1213_v49 = vadd.f32 %v2891_v0, %v1212_v37 }
 0xe18   :  { %v2895_v58 = vpop.eup %2894 }
 0xe19   :  { %v1217_v51 = vsel %vm1216_vm3, %v2891_v0, %v1213_v49  ;;  %v1377_v59 = vmul.f32 %v2895_v58, %v1372_v54  ;;  %v2897_v61 = vpop.eup %2896  ;;  %vm1382_vm5 = vweird.f32 %v2895_v58 }
 0xe1a   :  { %v1222_v52 = vsel %vm1219_vm4, %v1221_v41, %v1217_v51  ;;  %v1391_v62 = vmul.f32 %v2897_v61, %v1375_v57  ;;  %vm1383_vm10 = vmor %vm1381_vm6, %vm1382_vm5  ;;  %vm1396_vm12 = vweird.f32 %v2897_v61  ;;  %v1441_v57 = vld [vmem:[#allocation7 + $0xd8] sm:$0xff] }
 0xe1b   :  { %v1224_v53 = vmul.f32 %v3350_v3, %v1222_v52  ;;  %v1378_v38 = vsub.f32 1.0, %v1377_v59  ;;  %vm1397_vm14 = vmor %vm1395_vm13, %vm1396_vm12  ;;  %1463 = vmatpush.msra.mxu2 %v1441_v57 }
 0xe1c   :  { %v1392_v4 = vsub.f32 1.0, %v1391_v62 }
 0xe1d   :  { %2657 = vmatmul.msk.f32.gmra.mxu3 %vm216_vm9, %v1224_v53  ;;  %v1379_v63 = vmul.f32 %v2895_v58, %v1378_v38 }
 0xe1f   :  { %v1380_v5 = vadd.f32 %v2895_v58, %v1379_v63 }
 0xe21   :  { %v1384_v9 = vsel %vm1383_vm10, %v2895_v58, %v1380_v5  ;;  %v1595_v58 = vld [vmem:[#allocation7 + $0xe0] sm:$0xff] }
 0xe22   :  { %v1389_v17 = vsel %vm1386_vm11, %v1388_v13, %v1384_v9 }
 0xe23   :  { %v1404_v23 = vmul.f32 %v3358_v11, %v1389_v17 }
 0xe26   :  { %2771 = vrot.lane.b32.xlu2 %v3286_v60, %s3067_s8 }
 0xe2f   :  { %2776 = vrot.lane.b32.xlu1 %v3286_v60, %s3068_s9  ;;  %v1393_v60 = vmul.f32 %v2897_v61, %v1392_v4 }
 0xe31   :  { %v1394_v21 = vadd.f32 %v2897_v61, %v1393_v60 }
 0xe33   :  { %v1398_v27 = vsel %vm1397_vm14, %v2897_v61, %v1394_v21 }
 0xe34   :  { %v1403_v24 = vsel %vm1400_vm15, %v1402_v28, %v1398_v27 }
 0xe35   :  { %v1405_v31 = vmul.f32 %v3360_v12, %v1403_v24  ;;  %v919_v24 = vld [vmem:[#allocation7 + $0xf8] sm:$0xff] }
 0xe81   :  { %v1526_v3 = vpop.xlane.xlu2 %1525 }
 0xe82   :  { %2898 = vrcp.f32 %v1526_v3  ;;  %v1541_v39 = vand.u32 2147483648, %v1526_v3  ;;  %vm1535_vm2 = vweird.f32 %v1526_v3  ;;  %v1539_v40 = vand.u32 2147483647, %v1526_v3 }
 0xe84   :  { %v1542_v43 = vor.u32 1.1754944e-38, %v1541_v39  ;;  %vm1540_vm4 = vcmp.eq.f32.partialorder %v1539_v40, 8.507059e+37  ;;  %v927_v39 = vld [vmem:[#allocation7 + $0x138] sm:$0xff]  ;;  %v926_v40 = vld [vmem:[#allocation7 + $0x130] sm:$0xff] }
 0xe88   :  { %v2899_v20 = vpop.eup %2898 }
 0xe89   :  { %v2772_v16 = vpop.permute.xlu2 %2771  ;;  %v1529_v18 = vpop.xlane.xlu1 %1528  ;;  %v1531_v26 = vmul.f32 %v2899_v20, %v1526_v3  ;;  %vm1536_vm1 = vweird.f32 %v2899_v20 }
 0xe8a   :  { %v2773_v19 = vunpack.i.l.bf16 %v2772_v16  ;;  %v2774_v48 = vunpack.i.h.bf16 %v2772_v16  ;;  %2900 = vrcp.f32 %v1529_v18  ;;  %vm1537_vm3 = vmor %vm1535_vm2, %vm1536_vm1  ;;  %v1555_v6 = vand.u32 2147483648, %v1529_v18 }
 0xe8b   :  { %v1532_v29 = vsub.f32 1.0, %v1531_v26  ;;  %vm1549_vm6 = vweird.f32 %v1529_v18  ;;  %v1553_v51 = vand.u32 2147483647, %v1529_v18 }
 0xe8c   :  { %1432 = vmatpush.msrb.mxu3 %v2773_v19  ;;  %v1556_v53 = vor.u32 1.1754944e-38, %v1555_v6 }
 0xe8d   :  { %v1533_v33 = vmul.f32 %v2899_v20, %v1532_v29  ;;  %vm1554_vm11 = vcmp.eq.f32.partialorder %v1553_v51, 8.507059e+37 }
 0xe8e   :  { %1433 = vmatpush.msrb.mxu3 %v2774_v48 }
 0xe8f   :  { %2666 = vmatmul.msk.f32.vlgmr.msrb.gmra.mxu3 %vm216_vm9, %v1404_v23  ;;  %v1534_v11 = vadd.f32 %v2899_v20, %v1533_v33 }
 0xe90   :  { %v2901_v30 = vpop.eup %2900  ;;  %1617 = vmatpush.msra.mxu3 %v1595_v58  ;;  %v2813_v58 = vld [vmem:[#allocation7 + $0x14e] ss:$0 sm:$0xff] }
 0xe91   :  { %v1545_v34 = vmul.f32 %v2901_v30, %v1529_v18  ;;  %v1538_v14 = vsel %vm1537_vm3, %v2899_v20, %v1534_v11  ;;  %vm1550_vm5 = vweird.f32 %v2901_v30 }
 0xe92   :  { %v1543_v12 = vsel %vm1540_vm4, %v1542_v43, %v1538_v14  ;;  %vm1551_vm10 = vmor %vm1549_vm6, %vm1550_vm5  ;;  %v925_v43 = vld [vmem:[#allocation7 + $0x128] sm:$0xff] }
 0xe93   :  { %v1254_v56 = vpop.f32.mrf.mxu3  ;;  %v1546_v2 = vsub.f32 1.0, %v1545_v34  ;;  %v1558_v41 = vmul.f32 %v3366_v35, %v1543_v12  ;;  %v924_v12 = vld [vmem:[#allocation7 + $0x120] sm:$0xff] }
 0xe94   :  { %2658 = vmatmul.msk.f32.vlgmr.msrb.gmra.mxu2 %vm184_vm8, %v1254_v56  ;;  %v920_v56 = vld [vmem:[#allocation7 + $0x100] sm:$0xff] }
 0xe95   :  { %v1547_v0 = vmul.f32 %v2901_v30, %v1546_v2  ;;  %1701 = vmatpush.msrb.mxu2 %v920_v56  ;;  %v928_v2 = vld [vmem:[#allocation7 + $0x140] sm:$0xff] }
 0xe96   :  { %1728 = vmatpush.msra.mxu0 %v928_v2  ;;  %v1750_v2 = vld [vmem:[#allocation7 + $0x158] sm:$0xff] }
 0xe97   :  { %2667 = vmatmul.msk.f32.gmra.mxu3 %vm216_vm9, %v1405_v31  ;;  %v1548_v1 = vadd.f32 %v2901_v30, %v1547_v0  ;;  %1702 = vmatpush.msrb.mxu2 %v919_v24  ;;  %v917_v31 = vld [vmem:[#allocation7 + $0xe8] sm:$0xff] }
 0xe98   :  { %1729 = vmatpush.msra.mxu0 %v927_v39  ;;  %v1749_v39 = vld [vmem:[#allocation7 + $0x150] sm:$0xff] }
 0xe99   :  { %v1552_v52 = vsel %vm1551_vm10, %v2901_v30, %v1548_v1  ;;  %v918_v30 = vld [vmem:[#allocation7 + $0xf0] sm:$0xff] }
 0xe9a   :  { %v1557_v54 = vsel %vm1554_vm11, %v1556_v53, %v1552_v52  ;;  %1703 = vmatpush.msrb.mxu2 %v918_v30  ;;  %1730 = vmatpush.msra.mxu0 %v926_v40  ;;  %v2812_v53 = vld [vmem:[#allocation7 + $0x14d] ss:$0 sm:$0xff] }
 0xe9b   :  { %v1559_v55 = vmul.f32 %v3372_v46, %v1557_v54 }
 0xe9c   :  { %1704 = vmatpush.msrb.mxu2 %v917_v31  ;;  %1731 = vmatpush.msra.mxu0 %v925_v43 }
 0xe9e   :  { %1732 = vmatpush.msra.mxu0 %v924_v12 }
 0xea0   :  { %v1257_v45 = vpop.f32.mrf.mxu3 }
 0xea1   :  { %2659 = vmatmul.msk.f32.gmra.mxu2 %vm184_vm8, %v1257_v45  ;;  %v2777_v47 = vpop.permute.xlu1 %2776 }
 0xea2   :  { %v2778_v37 = vunpack.i.l.bf16 %v2777_v47  ;;  %v2779_v49 = vunpack.i.h.bf16 %v2777_v47 }
 0xea4   :  { %1586 = vmatpush.msra.mxu1 %v2778_v37 }
 0xea6   :  { %1587 = vmatpush.msra.mxu1 %v2779_v49 }
 0xea7   :  { %2674 = vmatmul.msk.f32.vlgmr.msra.gmra.mxu1 %vm216_vm9, %v1558_v41 }
 0xeaf   :  { %2675 = vmatmul.msk.f32.gmra.mxu1 %vm216_vm9, %v1559_v55 }
 0xf12   :  { %v1435_v59 = vpop.f32.mrf.mxu3 }
 0xf13   :  { %2668 = vmatmul.msk.f32.vlgmr.msra.gmra.mxu2 %vm184_vm8, %v1435_v59 }
 0xf17   :  { %v1284_v62 = vpop.f32.mrf.mxu2 }
 0xf18   :  { %v1314_v3 = vadd.f32 %v3340_v50, %v1284_v62 }
 0xf1a   :  { %v1438_v35 = vpop.f32.mrf.mxu3 }
 0xf1b   :  { %2669 = vmatmul.msk.f32.gmra.mxu2 %vm184_vm8, %v1438_v35 }
 0xf24   :  { %v1589_v38 = vpop.f32.mrf.mxu1  ;;  %v1287_v46 = vpop.f32.mrf.mxu2 }
 0xf25   :  { %2676 = vmatmul.msk.f32.vlgmr.msra.gmra.mxu3 %vm184_vm8, %v1589_v38  ;;  %v1317_v13 = vadd.f32 %v3344_v36, %v1287_v46 }
 0xf2c   :  { %v1592_v61 = vpop.f32.mrf.mxu1 }
 0xf2d   :  { %2677 = vmatmul.msk.f32.gmra.mxu3 %vm184_vm8, %v1592_v61 }
 0xf96   :  { %v1465_v63 = vpop.f32.mrf.mxu2 }
 0xf97   :  { %v1471_v4 = vadd.f32 %v1465_v63, %v1314_v3 }
 0xf9e   :  { %v1468_v9 = vpop.f32.mrf.mxu2 }
 0xf9f   :  { %v1472_v17 = vadd.f32 %v1468_v9, %v1317_v13 }
 0xfa8   :  { %v1619_v5 = vpop.f32.mrf.mxu3 }
 0xfa9   :  { %v1625_v7 = vadd.f32 %v1619_v5, %v1471_v4  ;;  %v923_v5 = vld [vmem:[#allocation7 + $0x118] sm:$0xff] }
 0xfaa   :  { %1733 = vmatpush.msra.mxu0 %v923_v5  ;;  %v2818_v5 = vld [vmem:[#allocation7 + $0x1f0] ss:$0 sm:$0xff] }
 0xfab   :  { %v1627_v60 = vadd.f32 %v1625_v7, %v3265_v42  ;;  %v922_v7 = vld [vmem:[#allocation7 + $0x110] sm:$0xff] }
 0xfac   :  { %1734 = vmatpush.msra.mxu0 %v922_v7 }
 0xfad   :  { %v3399_v16 = vadd.f32 %v2811_v8, %v1627_v60  ;;  %v2814_v60 = vld [vmem:[#allocation7 + $0x149] ss:$0 sm:$0xff] }
 0xfaf   :  { %v1632_v18 = vsel %vm90_vm0, %v3399_v16, 0.0 }
 0xfb0   :  { %1633 = vadd.xlane.f32.xlu0 %v1632_v18  ;;  %v1622_v19 = vpop.f32.mrf.mxu3 }
 0xfb1   :  { %v1626_v20 = vadd.f32 %v1622_v19, %v1472_v17 }
 0xfb3   :  { %v1628_v50 = vadd.f32 %v1626_v20, %v3270_v44 }
 0xfb5   :  { %v3404_v21 = vadd.f32 %v2811_v8, %v1628_v50  ;;  %v921_v8 = vld [vmem:[#allocation7 + $0x108] sm:$0xff] }
 0xfb6   :  { %1735 = vmatpush.msra.mxu0 %v921_v8  ;;  %v2815_v50 = vld [vmem:[#allocation7 + $0x14f] ss:$0 sm:$0xff] }
 0xfb7   :  { %v1635_v22 = vsel %vm90_vm0, %v3404_v21, 0.0 }
 0xfb8   :  { %1636 = vadd.xlane.f32.xlu2 %v1635_v22 }
0x1023   :  { %v1634_v42 = vpop.xlane.xlu0 %1633 }
0x1024   :  { %v1638_v36 = vmul.f32 %v1634_v42, %v3116_v10 }
0x1026   :  { %v1640_v48 = vsub.f32 %v3399_v16, %v1638_v36 }
0x1028   :  { %v1642_v23 = vmul.f32 %v1640_v48, %v1640_v48 }
0x102a   :  { %v1644_v25 = vsel %vm90_vm0, %v1642_v23, 0.0 }
0x102b   :  { %1645 = vadd.xlane.f32.xlu1 %v1644_v25  ;;  %v1637_v26 = vpop.xlane.xlu2 %1636 }
0x102c   :  { %v1639_v27 = vmul.f32 %v1637_v26, %v3116_v10 }
0x102e   :  { %v1641_v44 = vsub.f32 %v3404_v21, %v1639_v27 }
0x1030   :  { %v1643_v28 = vmul.f32 %v1641_v44, %v1641_v44 }
0x1032   :  { %v1647_v29 = vsel %vm90_vm0, %v1643_v28, 0.0 }
0x1033   :  { %1648 = vadd.xlane.f32.xlu0 %v1647_v29 }
0x109e   :  { %v1646_v33 = vpop.xlane.xlu1 %1645 }
0x109f   :  { %v1650_v34 = vmul.f32 %v1646_v33, %v3116_v10 }
0x10a1   :  { %v1652_v11 = vadd.f32 1e-05, %v1650_v34  ;;  %v1752_v34 = vld [vmem:[#allocation7 + $0x168] sm:$0xff] }
0x10a2   :  { %1842 = vmatpush.msrb.mxu1 %v1752_v34 }
0x10a3   :  { %2902 = vrsqrt.f32 %v1652_v11  ;;  %vm1660_vm13 = vweird.f32 %v1652_v11 }
0x10a6   :  { %v1649_v14 = vpop.xlane.xlu0 %1648 }
0x10a7   :  { %v1651_v0 = vmul.f32 %v1649_v14, %v3116_v10 }
0x10a9   :  { %v2903_v45 = vpop.eup %2902  ;;  %v1653_v47 = vadd.f32 1e-05, %v1651_v0 }
0x10aa   :  { %v1655_v37 = vmul.f32 %v2903_v45, %v1652_v11  ;;  %vm1661_vm12 = vweird.f32 %v2903_v45  ;;  %v1751_v11 = vld [vmem:[#allocation7 + $0x160] sm:$0xff] }
0x10ab   :  { %2904 = vrsqrt.f32 %v1653_v47  ;;  %vm1662_vm14 = vmor %vm1660_vm13, %vm1661_vm12  ;;  %vm1670_vm1 = vweird.f32 %v1653_v47  ;;  %1843 = vmatpush.msrb.mxu1 %v1751_v11 }
0x10ac   :  { %v1656_v1 = vmul.f32 %v2903_v45, %v1655_v37 }
0x10ad   :  { %1844 = vmatpush.msrb.mxu1 %v1750_v2 }
0x10ae   :  { %v1657_v6 = vmul.f32 0.5, %v1656_v1 }
0x10af   :  { %1845 = vmatpush.msrb.mxu1 %v1749_v39 }
0x10b0   :  { %v1658_v49 = vsub.f32 1.5, %v1657_v6 }
0x10b1   :  { %v2905_v41 = vpop.eup %2904 }
0x10b2   :  { %v1659_v51 = vmul.f32 %v2903_v45, %v1658_v49  ;;  %v1665_v52 = vmul.f32 %v2905_v41, %v1653_v47  ;;  %vm1671_vm15 = vweird.f32 %v2905_v41 }
0x10b3   :  { %vm1672_vm2 = vmor %vm1670_vm1, %vm1671_vm15 }
0x10b4   :  { %v1663_v54 = vsel %vm1662_vm14, %v2903_v45, %v1659_v51  ;;  %v1666_v55 = vmul.f32 %v2905_v41, %v1665_v52 }
0x10b5   :  { %v1674_v57 = vmul.f32 %v1663_v54, %v1640_v48 }
0x10b6   :  { %v1667_v59 = vmul.f32 0.5, %v1666_v55 }
0x10b7   :  { %v1677_v35 = vmul.f32 %v2812_v53, %v1674_v57 }
0x10b8   :  { %v1668_v38 = vsub.f32 1.5, %v1667_v59 }
0x10b9   :  { %v1680_v61 = vadd.f32 %v2813_v58, %v1677_v35 }
0x10ba   :  { %v1669_v62 = vmul.f32 %v2905_v41, %v1668_v38 }
0x10bb   :  { %2678 = vmatmul.msk.f32.vlgmr.msrb.gmra.mxu2 %vm90_vm0, %v1680_v61 }
0x10bc   :  { %v1673_v46 = vsel %vm1672_vm2, %v2905_v41, %v1669_v62 }
0x10bd   :  { %v1675_v63 = vmul.f32 %v1673_v46, %v1641_v44 }
0x10bf   :  { %v1678_v3 = vmul.f32 %v2812_v53, %v1675_v63  ;;  %v2816_v53 = vld [vmem:[#allocation7 + $0x1f2] ss:$0 sm:$0xff] }
0x10c1   :  { %v1681_v4 = vadd.f32 %v2813_v58, %v1678_v3  ;;  %v2817_v58 = vld [vmem:[#allocation7 + $0x1f3] ss:$0 sm:$0xff] }
0x10c3   :  { %2679 = vmatmul.msk.f32.gmra.mxu2 %vm90_vm0, %v1681_v4 }
0x113e   :  { %v1706_v9 = vpop.f32.mrf.mxu2 }
0x113f   :  { %v1707_v13 = vadd.f32 %v2814_v60, %v1706_v9 }
0x1141   :  { %v1712_v17 = vmax.f32 %v1707_v13, 0.0 }
0x1143   :  { %2680 = vmatmul.msk.f32.vlgmr.msra.gmra.mxu0 %vm877_vm7, %v1712_v17 }
0x1146   :  { %v1709_v18 = vpop.f32.mrf.mxu2 }
0x1147   :  { %v1710_v19 = vadd.f32 %v2814_v60, %v1709_v18 }
0x1149   :  { %v1713_v20 = vmax.f32 %v1710_v19, 0.0 }
0x114b   :  { %2681 = vmatmul.msk.f32.gmra.mxu0 %vm877_vm7, %v1713_v20 }
0x11c0   :  { %v1737_v22 = vpop.f32.mrf.mxu0 }
0x11c1   :  { %v1743_v42 = vadd.f32 %v1737_v22, %v3399_v16 }
0x11c3   :  { %v3421_v36 = vadd.f32 %v2815_v50, %v1743_v42 }
0x11c5   :  { %v1773_v48 = vsel %vm90_vm0, %v3421_v36, 0.0 }
0x11c6   :  { %1774 = vadd.xlane.f32.xlu0 %v1773_v48 }
0x11c8   :  { %v1740_v23 = vpop.f32.mrf.mxu0 }
0x11c9   :  { %v1744_v25 = vadd.f32 %v1740_v23, %v3404_v21 }
0x11cb   :  { %v3426_v26 = vadd.f32 %v2815_v50, %v1744_v25 }
0x11cd   :  { %v1776_v27 = vsel %vm90_vm0, %v3426_v26, 0.0 }
0x11ce   :  { %1777 = vadd.xlane.f32.xlu2 %v1776_v27 }
0x1239   :  { %v1775_v44 = vpop.xlane.xlu0 %1774 }
0x123a   :  { %v1779_v28 = vmul.f32 %v1775_v44, %v3116_v10 }
0x123c   :  { %v1781_v16 = vsub.f32 %v3421_v36, %v1779_v28 }
0x123e   :  { %v1783_v29 = vmul.f32 %v1781_v16, %v1781_v16 }
0x1240   :  { %v1785_v56 = vsel %vm90_vm0, %v1783_v29, 0.0 }
0x1241   :  { %v1778_v24 = vpop.xlane.xlu2 %1777  ;;  %1786 = vadd.xlane.f32.xlu0 %v1785_v56 }
0x1242   :  { %v1780_v30 = vmul.f32 %v1778_v24, %v3116_v10 }
0x1244   :  { %v1782_v21 = vsub.f32 %v3426_v26, %v1780_v30 }
0x1246   :  { %v1784_v31 = vmul.f32 %v1782_v21, %v1782_v21 }
0x1248   :  { %v1788_v33 = vsel %vm90_vm0, %v1784_v31, 0.0 }
0x1249   :  { %1789 = vadd.xlane.f32.xlu1 %v1788_v33 }
0x12b4   :  { %v1787_v40 = vpop.xlane.xlu0 %1786 }
0x12b5   :  { %v1791_v14 = vmul.f32 %v1787_v40, %v3116_v10 }
0x12b7   :  { %v1793_v0 = vadd.f32 1e-05, %v1791_v14 }
0x12b9   :  { %2906 = vrsqrt.f32 %v1793_v0  ;;  %vm1801_vm4 = vweird.f32 %v1793_v0 }
0x12bc   :  { %v1790_v43 = vpop.xlane.xlu1 %1789 }
0x12bd   :  { %v1792_v45 = vmul.f32 %v1790_v43, %v3116_v10 }
0x12bf   :  { %v2907_v47 = vpop.eup %2906  ;;  %v1794_v12 = vadd.f32 1e-05, %v1792_v45 }
0x12c0   :  { %v1796_v37 = vmul.f32 %v2907_v47, %v1793_v0  ;;  %vm1802_vm3 = vweird.f32 %v2907_v47 }
0x12c1   :  { %2908 = vrsqrt.f32 %v1794_v12  ;;  %vm1803_vm5 = vmor %vm1801_vm4, %vm1802_vm3  ;;  %vm1811_vm10 = vweird.f32 %v1794_v12 }
0x12c2   :  { %v1797_v1 = vmul.f32 %v2907_v47, %v1796_v37 }
0x12c4   :  { %v1798_v6 = vmul.f32 0.5, %v1797_v1 }
0x12c6   :  { %v1799_v49 = vsub.f32 1.5, %v1798_v6 }
0x12c7   :  { %v2909_v41 = vpop.eup %2908 }
0x12c8   :  { %v1800_v51 = vmul.f32 %v2907_v47, %v1799_v49  ;;  %v1806_v52 = vmul.f32 %v2909_v41, %v1794_v12  ;;  %vm1812_vm6 = vweird.f32 %v2909_v41 }
0x12c9   :  { %vm1813_vm11 = vmor %vm1811_vm10, %vm1812_vm6 }
0x12ca   :  { %v1804_v54 = vsel %vm1803_vm5, %v2907_v47, %v1800_v51  ;;  %v1807_v55 = vmul.f32 %v2909_v41, %v1806_v52 }
0x12cb   :  { %v1815_v57 = vmul.f32 %v1804_v54, %v1781_v16 }
0x12cc   :  { %v1808_v59 = vmul.f32 0.5, %v1807_v55 }
0x12cd   :  { %v1818_v35 = vmul.f32 %v2816_v53, %v1815_v57 }
0x12ce   :  { %v1809_v38 = vsub.f32 1.5, %v1808_v59 }
0x12cf   :  { %v1821_v61 = vadd.f32 %v2817_v58, %v1818_v35 }
0x12d0   :  { %v1810_v62 = vmul.f32 %v2909_v41, %v1809_v38 }
0x12d1   :  { %2682 = vmatmul.msk.f32.vlgmr.msrb.gmra.mxu1 %vm90_vm0, %v1821_v61 }
0x12d2   :  { %v1814_v46 = vsel %vm1813_vm11, %v2909_v41, %v1810_v62 }
0x12d3   :  { %v1816_v63 = vmul.f32 %v1814_v46, %v1782_v21 }
0x12d5   :  { %v1819_v3 = vmul.f32 %v2816_v53, %v1816_v63 }
0x12d7   :  { %v1822_v4 = vadd.f32 %v2817_v58, %v1819_v3 }
0x12d9   :  { %2683 = vmatmul.msk.f32.gmra.mxu1 %vm90_vm0, %v1822_v4 }
0x134e   :  { %v1847_v7 = vpop.f32.mrf.mxu1 }
0x134f   :  { %v1848_v8 = vadd.f32 %v2818_v5, %v1847_v7 }
0x1351   :  { %1855 = vrot.lane.b32.xlu0 %v1848_v8, %s3058_s2 }
0x1356   :  { %v1850_v60 = vpop.f32.mrf.mxu1 }
0x1357   :  { %v1851_v9 = vadd.f32 %v2818_v5, %v1850_v60 }
0x1359   :  { %1857 = vrot.lane.b32.xlu2 %v1851_v9, %s3058_s2  ;;  %v3442_v13 = vpack.i.bf16 %v1848_v8, %v1851_v9 }
0x1361   :  { %2781 = vrot.lane.b32.xlu2 %v3442_v13, %s3059_s27 }
0x1369   :  { %1978 = vrot.lane.b32.xlu2 %v1848_v8, %s3060_s28 }
0x1371   :  { %1974 = vrot.lane.b32.xlu2 %v1848_v8, %s3061_s29 }
0x1379   :  { %1976 = vrot.lane.b32.xlu2 %v1851_v9, %s3061_s29 }
0x1381   :  { %2315 = vrot.lane.b32.xlu2 %v1851_v9, %s3065_s6 }
0x1389   :  { %2155 = vrot.lane.b32.xlu2 %v1848_v8, %s3063_s4 }
0x1391   :  { %2157 = vrot.lane.b32.xlu2 %v1851_v9, %s3063_s4 }
0x13b3   :  { %v1858_v17 = vpop.permute.xlu2 %1857 }
0x13b4   :  { %2684 = vmatpush.xpose.msk.msrb.mxu3 %vm184_vm8, %v1858_v17  ;;  %v2948_v17 = vld [vmem:[#allocation5] sm:$0xff] }
0x13bb   :  { %v2782_v18 = vpop.permute.xlu2 %2781 }
0x13bc   :  { %v2783_v19 = vunpack.i.l.bf16 %v2782_v18  ;;  %v2784_v20 = vunpack.i.h.bf16 %v2782_v18 }
0x13be   :  { %1964 = vmatpush.msra.mxu2 %v2783_v19 }
0x13c0   :  { %1965 = vmatpush.msra.mxu2 %v2784_v20 }
0x13c3   :  { %v1856_v50 = vpop.permute.xlu0 %1855  ;;  %v1979_v33 = vpop.permute.xlu2 %1978 }
0x13c4   :  { %2685 = vmatpush.xpose.msk.msrb.mxu3 %vm184_vm8, %v1856_v50  ;;  %v2949_v50 = vld [vmem:[#allocation5 + $0x8] sm:$0xff] }
0x13c7   :  { %2686 = vmatmul.msk.f32.vlgmr.msrb.gmra.mxu3 %vm184_vm8, %v1848_v8 }
0x13cb   :  { %v1975_v34 = vpop.permute.xlu2 %1974 }
0x13cf   :  { %2687 = vmatmul.msk.f32.gmra.mxu3 %vm184_vm8, %v1851_v9 }
0x13d3   :  { %v1977_v14 = vpop.permute.xlu2 %1976 }
0x13db   :  { %v2316_v54 = vpop.permute.xlu2 %2315 }
0x13e3   :  { %v2156_v4 = vpop.permute.xlu2 %2155 }
0x13eb   :  { %v2158_v5 = vpop.permute.xlu2 %2157 }
0x144a   :  { %v1884_v22 = vpop.f32.mrf.mxu3 }
0x144b   :  { %v1885_v42 = vadd.f32 %v3300_v32, %v1884_v22 }
0x144d   :  { %v1890_v48 = vsel %vm216_vm9, %v1885_v42, -inf }
0x144e   :  { %1891 = vmax.xlane.f32.xlu1 %v1890_v48 }
0x1452   :  { %v1887_v23 = vpop.f32.mrf.mxu3 }
0x1453   :  { %v1888_v25 = vadd.f32 %v3304_v15, %v1887_v23  ;;  %v1973_v15 = vld [vmem:[#allocation7 + $0x170] sm:$0xff] }
0x1454   :  { %2147 = vmatpush.msrb.mxu2 %v1973_v15 }
0x1455   :  { %v1893_v27 = vsel %vm216_vm9, %v1888_v25, -inf }
0x1456   :  { %1894 = vmax.xlane.f32.xlu1 %v1893_v27 }
0x14c1   :  { %v1892_v44 = vpop.xlane.xlu1 %1891 }
0x14c2   :  { %v1896_v28 = vsub.f32 %v1885_v42, %v1892_v44 }
0x14c4   :  { %v1898_v16 = vmul.f32 1.442695, %v1896_v28 }
0x14c6   :  { %2910 = vpow2.f32 %v1898_v16 }
0x14c9   :  { %v1895_v29 = vpop.xlane.xlu1 %1894 }
0x14ca   :  { %v1897_v56 = vsub.f32 %v1888_v25, %v1895_v29 }
0x14cc   :  { %v2911_v24 = vpop.eup %2910  ;;  %v1900_v30 = vmul.f32 1.442695, %v1897_v56 }
0x14cd   :  { %v1902_v21 = vsel %vm216_vm9, %v2911_v24, 0.0 }
0x14ce   :  { %2912 = vpow2.f32 %v1900_v30  ;;  %1903 = vadd.xlane.f32.xlu0 %v1902_v21 }
0x14d4   :  { %v2913_v32 = vpop.eup %2912 }
0x14d5   :  { %v1905_v31 = vsel %vm216_vm9, %v2913_v32, 0.0 }
0x14d6   :  { %1906 = vadd.xlane.f32.xlu1 %v1905_v31 }
0x14e2   :  { %2159 = vrot.lane.b32.xlu0 %v1848_v8, %s3062_s30 }
0x14ef   :  { %1980 = vrot.lane.b32.xlu1 %v1851_v9, %s3060_s28 }
0x14f7   :  { %2161 = vrot.lane.b32.xlu1 %v1851_v9, %s3062_s30 }
0x14ff   :  { %2313 = vrot.lane.b32.xlu1 %v1848_v8, %s3065_s6 }
0x1507   :  { %2309 = vrot.lane.b32.xlu1 %v1848_v8, %s3064_s5 }
0x150f   :  { %2311 = vrot.lane.b32.xlu1 %v1851_v9, %s3064_s5 }
0x1541   :  { %v1904_v11 = vpop.xlane.xlu0 %1903 }
0x1542   :  { %2914 = vrcp.f32 %v1904_v11  ;;  %v1919_v43 = vand.u32 2147483648, %v1904_v11  ;;  %v1917_v47 = vand.u32 2147483647, %v1904_v11  ;;  %vm1913_vm13 = vweird.f32 %v1904_v11 }
0x1544   :  { %v1920_v1 = vor.u32 1.1754944e-38, %v1919_v43  ;;  %vm1918_vm15 = vcmp.eq.f32.partialorder %v1917_v47, 8.507059e+37 }
0x1548   :  { %v2915_v2 = vpop.eup %2914 }
0x1549   :  { %v1909_v39 = vmul.f32 %v2915_v2, %v1904_v11  ;;  %v1907_v40 = vpop.xlane.xlu1 %1906  ;;  %vm1914_vm12 = vweird.f32 %v2915_v2 }
0x154a   :  { %2916 = vrcp.f32 %v1907_v40  ;;  %vm1915_vm14 = vmor %vm1913_vm13, %vm1914_vm12  ;;  %v1933_v53 = vand.u32 2147483648, %v1907_v40  ;;  %v1931_v57 = vand.u32 2147483647, %v1907_v40  ;;  %vm1927_vm2 = vweird.f32 %v1907_v40 }
0x154b   :  { %v1910_v0 = vsub.f32 1.0, %v1909_v39 }
0x154c   :  { %v1934_v59 = vor.u32 1.1754944e-38, %v1933_v53  ;;  %vm1932_vm4 = vcmp.eq.f32.partialorder %v1931_v57, 8.507059e+37 }
0x154d   :  { %v1911_v45 = vmul.f32 %v2915_v2, %v1910_v0 }
0x154f   :  { %v1912_v12 = vadd.f32 %v2915_v2, %v1911_v45 }
0x1550   :  { %v2917_v37 = vpop.eup %2916 }
0x1551   :  { %v1916_v6 = vsel %vm1915_vm14, %v2915_v2, %v1912_v12  ;;  %v1923_v49 = vmul.f32 %v2917_v37, %v1907_v40  ;;  %vm1928_vm1 = vweird.f32 %v2917_v37 }
0x1552   :  { %v1921_v41 = vsel %vm1918_vm15, %v1920_v1, %v1916_v6  ;;  %vm1929_vm3 = vmor %vm1927_vm2, %vm1928_vm1 }
0x1553   :  { %v1924_v51 = vsub.f32 1.0, %v1923_v49  ;;  %v1936_v52 = vmul.f32 %v2911_v24, %v1921_v41 }
0x1554   :  { %v2160_v63 = vpop.permute.xlu0 %2159 }
0x1555   :  { %v1925_v55 = vmul.f32 %v2917_v37, %v1924_v51  ;;  %2688 = vmatmul.msk.f32.vlgmr.msra.gmra.mxu2 %vm216_vm9, %v1936_v52 }
0x1556   :  { %2708 = vmatpush.xpose.msk.msra.mxu2 %vm184_vm8, %v2316_v54 }
0x1557   :  { %v1926_v58 = vadd.f32 %v2917_v37, %v1925_v55 }
0x1559   :  { %v1930_v35 = vsel %vm1929_vm3, %v2917_v37, %v1926_v58 }
0x155a   :  { %v1935_v38 = vsel %vm1932_vm4, %v1934_v59, %v1930_v35 }
0x155b   :  { %v1937_v61 = vmul.f32 %v2913_v32, %v1935_v38 }
0x155d   :  { %2689 = vmatmul.msk.f32.gmra.mxu2 %vm216_vm9, %v1937_v61 }
0x1561   :  { %v1981_v62 = vpop.permute.xlu1 %1980 }
0x1562   :  { %2690 = vmatpush.xpose.msk.msrb.mxu0 %vm184_vm8, %v1981_v62 }
0x1566   :  { %2691 = vmatpush.xpose.msk.msrb.mxu0 %vm184_vm8, %v1979_v33 }
0x1569   :  { %2692 = vmatmul.msk.f32.vlgmr.msrb.gmra.mxu0 %vm184_vm8, %v1975_v34  ;;  %v2162_v46 = vpop.permute.xlu1 %2161 }
0x156a   :  { %2700 = vmatpush.xpose.msk.msra.mxu0 %vm184_vm8, %v2162_v46 }
0x156e   :  { %2701 = vmatpush.xpose.msk.msra.mxu0 %vm184_vm8, %v2160_v63 }
0x1571   :  { %2693 = vmatmul.msk.f32.gmra.mxu0 %vm184_vm8, %v1977_v14  ;;  %v2314_v3 = vpop.permute.xlu1 %2313 }
0x1572   :  { %2709 = vmatpush.xpose.msk.msra.mxu2 %vm184_vm8, %v2314_v3 }
0x1579   :  { %2702 = vmatmul.msk.f32.vlgmr.msra.gmra.mxu0 %vm184_vm8, %v2156_v4  ;;  %v2310_v60 = vpop.permute.xlu1 %2309 }
0x1581   :  { %2703 = vmatmul.msk.f32.gmra.mxu0 %vm184_vm8, %v2158_v5  ;;  %v2312_v42 = vpop.permute.xlu1 %2311 }
0x15d8   :  { %v1967_v7 = vpop.f32.mrf.mxu2 }
0x15d9   :  { %2698 = vmatmul.msk.f32.vlgmr.msrb.gmra.mxu2 %vm184_vm8, %v1967_v7 }
0x15e0   :  { %v1970_v8 = vpop.f32.mrf.mxu2 }
0x15e1   :  { %2699 = vmatmul.msk.f32.gmra.mxu2 %vm184_vm8, %v1970_v8 }
0x15e6   :  { %v2007_v9 = vpop.f32.mrf.mxu0 }
0x15e7   :  { %v2008_v18 = vadd.f32 %v2948_v17, %v2007_v9 }
0x15e9   :  { %2710 = vmatmul.msk.f32.vlgmr.msra.gmra.mxu2 %vm184_vm8, %v2310_v60  ;;  %v2013_v19 = vsel %vm216_vm9, %v2008_v18, -inf }
0x15ea   :  { %2014 = vmax.xlane.f32.xlu2 %v2013_v19 }
0x15ee   :  { %v2010_v20 = vpop.f32.mrf.mxu0 }
0x15ef   :  { %v2011_v22 = vadd.f32 %v2949_v50, %v2010_v20 }
0x15f1   :  { %2711 = vmatmul.msk.f32.gmra.mxu2 %vm184_vm8, %v2312_v42  ;;  %v2016_v48 = vsel %vm216_vm9, %v2011_v22, -inf }
0x15f2   :  { %2017 = vmax.xlane.f32.xlu0 %v2016_v48 }
0x15f6   :  { %v2188_v23 = vpop.f32.mrf.mxu0 }
0x15f7   :  { %v2189_v25 = vadd.f32 %v2948_v17, %v2188_v23 }
0x15f9   :  { %v2194_v27 = vsel %vm216_vm9, %v2189_v25, -inf }
0x15fa   :  { %2195 = vmax.xlane.f32.xlu1 %v2194_v27 }
0x15fe   :  { %v2191_v44 = vpop.f32.mrf.mxu0 }
0x15ff   :  { %v2192_v28 = vadd.f32 %v2949_v50, %v2191_v44 }
0x1601   :  { %v2197_v16 = vsel %vm216_vm9, %v2192_v28, -inf }
0x1602   :  { %2198 = vmax.xlane.f32.xlu2 %v2197_v16 }
0x165c   :  { %v3488_v29 = vpop.f32.mrf.mxu2 }
0x165d   :  { %v2015_v56 = vpop.xlane.xlu2 %2014 }
0x165e   :  { %v2019_v24 = vsub.f32 %v2008_v18, %v2015_v56 }
0x1660   :  { %v2021_v30 = vmul.f32 1.442695, %v2019_v24 }
0x1662   :  { %2918 = vpow2.f32 %v2021_v30 }
0x1664   :  { %v3490_v21 = vpop.f32.mrf.mxu2 }
0x1665   :  { %v2018_v32 = vpop.xlane.xlu0 %2017 }
0x1666   :  { %v2020_v31 = vsub.f32 %v2011_v22, %v2018_v32 }
0x1668   :  { %v3492_v15 = vpop.eup %2918  ;;  %v2023_v34 = vmul.f32 1.442695, %v2020_v31 }
0x1669   :  { %v2025_v33 = vsel %vm216_vm9, %v3492_v15, 0.0 }
0x166a   :  { %2026 = vadd.xlane.f32.xlu1 %v2025_v33  ;;  %2920 = vpow2.f32 %v2023_v34 }
0x166c   :  { %v2342_v11 = vpop.f32.mrf.mxu2 }
0x166d   :  { %v2343_v2 = vadd.f32 %v2948_v17, %v2342_v11  ;;  %v2196_v39 = vpop.xlane.xlu1 %2195 }
0x166e   :  { %v2200_v40 = vsub.f32 %v2189_v25, %v2196_v39 }
0x166f   :  { %v2348_v14 = vsel %vm216_vm9, %v2343_v2, -inf }
0x1670   :  { %2349 = vmax.xlane.f32.xlu0 %v2348_v14  ;;  %v2202_v0 = vmul.f32 1.442695, %v2200_v40  ;;  %v3497_v43 = vpop.eup %2920 }
0x1671   :  { %v2028_v1 = vsel %vm216_vm9, %v3497_v43, 0.0 }
0x1672   :  { %2922 = vpow2.f32 %v2202_v0 }
0x1674   :  { %v2345_v45 = vpop.f32.mrf.mxu2 }
0x1675   :  { %v2346_v47 = vadd.f32 %v2949_v50, %v2345_v45  ;;  %v2199_v12 = vpop.xlane.xlu2 %2198 }
0x1676   :  { %v2201_v37 = vsub.f32 %v2192_v28, %v2199_v12 }
0x1677   :  { %v2351_v6 = vsel %vm216_vm9, %v2346_v47, -inf }
0x1678   :  { %v2204_v49 = vmul.f32 1.442695, %v2201_v37  ;;  %2029 = vadd.xlane.f32.xlu0 %v2028_v1  ;;  %2352 = vmax.xlane.f32.xlu2 %v2351_v6  ;;  %v3502_v41 = vpop.eup %2922 }
0x1679   :  { %v2206_v51 = vsel %vm216_vm9, %v3502_v41, 0.0 }
0x167a   :  { %2924 = vpow2.f32 %v2204_v49 }
0x1680   :  { %v3506_v52 = vpop.eup %2924  ;;  %2207 = vadd.xlane.f32.xlu2 %v2206_v51 }
0x1681   :  { %v2209_v53 = vsel %vm216_vm9, %v3506_v52, 0.0 }
0x1682   :  { %2210 = vadd.xlane.f32.xlu0 %v2209_v53 }
0x1683   :  { %2786 = vrot.lane.b32.xlu1 %v3442_v13, %s3066_s7 }
0x16dd   :  { %v2027_v54 = vpop.xlane.xlu1 %2026 }
0x16de   :  { %2926 = vrcp.f32 %v2027_v54  ;;  %v2042_v8 = vand.u32 2147483648, %v2027_v54  ;;  %vm2036_vm6 = vweird.f32 %v2027_v54  ;;  %v2040_v9 = vand.u32 2147483647, %v2027_v54 }
0x16e0   :  { %v2043_v19 = vor.u32 1.1754944e-38, %v2042_v8  ;;  %vm2041_vm11 = vcmp.eq.f32.partialorder %v2040_v9, 8.507059e+37 }
0x16e3   :  { %v2350_v55 = vpop.xlane.xlu0 %2349 }
0x16e4   :  { %v2927_v57 = vpop.eup %2926  ;;  %v2354_v58 = vsub.f32 %v2343_v2, %v2350_v55  ;;  %v2096_v2 = vld [vmem:[#allocation7 + $0x178] sm:$0xff] }
0x16e5   :  { %v2032_v59 = vmul.f32 %v2927_v57, %v2027_v54  ;;  %vm2037_vm5 = vweird.f32 %v2927_v57  ;;  %2118 = vmatpush.msra.mxu3 %v2096_v2 }
0x16e6   :  { %v2356_v35 = vmul.f32 1.442695, %v2354_v58  ;;  %vm2038_vm10 = vmor %vm2036_vm6, %vm2037_vm5 }
0x16e7   :  { %v2033_v38 = vsub.f32 1.0, %v2032_v59 }
0x16e8   :  { %2928 = vpow2.f32 %v2356_v35 }
0x16e9   :  { %v2034_v46 = vmul.f32 %v2927_v57, %v2033_v38 }
0x16eb   :  { %v2030_v61 = vpop.xlane.xlu0 %2029  ;;  %v2353_v62 = vpop.xlane.xlu2 %2352  ;;  %v2035_v7 = vadd.f32 %v2927_v57, %v2034_v46 }
0x16ec   :  { %2930 = vrcp.f32 %v2030_v61  ;;  %v2355_v63 = vsub.f32 %v2346_v47, %v2353_v62  ;;  %v2056_v27 = vand.u32 2147483648, %v2030_v61  ;;  %vm2050_vm13 = vweird.f32 %v2030_v61 }
0x16ed   :  { %v2039_v18 = vsel %vm2038_vm10, %v2927_v57, %v2035_v7  ;;  %v2054_v56 = vand.u32 2147483647, %v2030_v61 }
0x16ee   :  { %v3512_v3 = vpop.eup %2928  ;;  %v2358_v4 = vmul.f32 1.442695, %v2355_v63  ;;  %v2044_v42 = vsel %vm2041_vm11, %v2043_v19, %v2039_v18  ;;  %v2057_v30 = vor.u32 1.1754944e-38, %v2056_v27 }
0x16ef   :  { %v2360_v5 = vsel %vm216_vm9, %v3512_v3, 0.0  ;;  %v2059_v16 = vmul.f32 %v3492_v15, %v2044_v42  ;;  %vm2055_vm15 = vcmp.eq.f32.partialorder %v2054_v56, 8.507059e+37 }
0x16f0   :  { %2932 = vpow2.f32 %v2358_v4  ;;  %2361 = vadd.xlane.f32.xlu2 %v2360_v5 }
0x16f2   :  { %v2931_v60 = vpop.eup %2930 }
0x16f3   :  { %v2046_v17 = vmul.f32 %v2931_v60, %v2030_v61  ;;  %vm2051_vm12 = vweird.f32 %v2931_v60  ;;  %v2208_v15 = vpop.xlane.xlu2 %2207 }
0x16f4   :  { %vm2052_vm14 = vmor %vm2050_vm13, %vm2051_vm12  ;;  %2934 = vrcp.f32 %v2208_v15  ;;  %v2223_v12 = vand.u32 2147483648, %v2208_v15  ;;  %vm2217_vm2 = vweird.f32 %v2208_v15 }
0x16f5   :  { %v2047_v20 = vsub.f32 1.0, %v2046_v17  ;;  %v2787_v50 = vpop.permute.xlu1 %2786  ;;  %v2211_v33 = vpop.xlane.xlu0 %2210 }
0x16f6   :  { %v3516_v22 = vpop.eup %2932  ;;  %v2788_v23 = vunpack.i.l.bf16 %v2787_v50  ;;  %v2789_v44 = vunpack.i.h.bf16 %v2787_v50  ;;  %2936 = vrcp.f32 %v2211_v33  ;;  %v2224_v49 = vor.u32 1.1754944e-38, %v2223_v12 }
0x16f7   :  { %v2048_v48 = vmul.f32 %v2931_v60, %v2047_v20  ;;  %v2363_v25 = vsel %vm216_vm9, %v3516_v22, 0.0  ;;  %v2237_v59 = vand.u32 2147483648, %v2211_v33  ;;  %vm2231_vm6 = vweird.f32 %v2211_v33 }
0x16f8   :  { %2364 = vadd.xlane.f32.xlu0 %v2363_v25  ;;  %2087 = vmatpush.msra.mxu1 %v2788_v23  ;;  %v2235_v61 = vand.u32 2147483647, %v2211_v33 }
0x16f9   :  { %v2049_v28 = vadd.f32 %v2931_v60, %v2048_v48  ;;  %v2238_v63 = vor.u32 1.1754944e-38, %v2237_v59 }
0x16fa   :  { %2088 = vmatpush.msra.mxu1 %v2789_v44  ;;  %v2935_v34 = vpop.eup %2934  ;;  %vm2236_vm11 = vcmp.eq.f32.partialorder %v2235_v61, 8.507059e+37 }
0x16fb   :  { %2694 = vmatmul.msk.f32.vlgmr.msra.gmra.mxu1 %vm216_vm9, %v2059_v16  ;;  %v2053_v24 = vsel %vm2052_vm14, %v2931_v60, %v2049_v28  ;;  %v2213_v11 = vmul.f32 %v2935_v34, %v2208_v15  ;;  %vm2218_vm1 = vweird.f32 %v2935_v34 }
0x16fc   :  { %v2058_v32 = vsel %vm2055_vm15, %v2057_v30, %v2053_v24  ;;  %v2937_v40 = vpop.eup %2936  ;;  %vm2219_vm3 = vmor %vm2217_vm2, %vm2218_vm1 }
0x16fd   :  { %v2060_v31 = vmul.f32 %v3497_v43, %v2058_v32  ;;  %v2214_v39 = vsub.f32 1.0, %v2213_v11  ;;  %v2227_v0 = vmul.f32 %v2937_v40, %v2211_v33  ;;  %vm2232_vm5 = vweird.f32 %v2937_v40  ;;  %v2431_v33 = vld [vmem:[#allocation7 + $0x188] sm:$0xff] }
0x16fe   :  { %vm2233_vm10 = vmor %vm2231_vm6, %vm2232_vm5 }
0x16ff   :  { %v2215_v14 = vmul.f32 %v2935_v34, %v2214_v39  ;;  %v2228_v47 = vsub.f32 1.0, %v2227_v0 }
0x1701   :  { %v2216_v45 = vadd.f32 %v2935_v34, %v2215_v14  ;;  %v2229_v1 = vmul.f32 %v2937_v40, %v2228_v47  ;;  %v2819_v47 = vld [vmem:[#allocation7 + $0x1f4] ss:$0 sm:$0xff] }
0x1703   :  { %2695 = vmatmul.msk.f32.gmra.mxu1 %vm216_vm9, %v2060_v31  ;;  %v2220_v37 = vsel %vm2219_vm3, %v2935_v34, %v2216_v45  ;;  %v2230_v58 = vadd.f32 %v2937_v40, %v2229_v1 }
0x1705   :  { %v2234_v46 = vsel %vm2233_vm10, %v2937_v40, %v2230_v58 }
0x1706   :  { %v2239_v5 = vsel %vm2236_vm11, %v2238_v63, %v2234_v46  ;;  %v1756_v46 = vld [vmem:[#allocation7 + $0x1a8] sm:$0xff]  ;;  %v1755_v63 = vld [vmem:[#allocation7 + $0x1a0] sm:$0xff] }
0x1707   :  { %v2241_v60 = vmul.f32 %v3506_v52, %v2239_v5  ;;  %v1753_v5 = vld [vmem:[#allocation7 + $0x190] sm:$0xff] }
0x1708   :  { %2791 = vrot.lane.b32.xlu2 %v3442_v13, %s3067_s8 }
0x170c   :  { %2796 = vrot.lane.b32.xlu0 %v3442_v13, %s3068_s9  ;;  %v2221_v13 = vand.u32 2147483647, %v2208_v15  ;;  %v2277_v15 = vld [vmem:[#allocation7 + $0x180] sm:$0xff] }
0x170d   :  { %2299 = vmatpush.msrb.mxu3 %v2277_v15 }
0x170e   :  { %vm2222_vm4 = vcmp.eq.f32.partialorder %v2221_v13, 8.507059e+37 }
0x170f   :  { %v2225_v53 = vsel %vm2222_vm4, %v2224_v49, %v2220_v37 }
0x1710   :  { %v2240_v38 = vmul.f32 %v3502_v41, %v2225_v53 }
0x1763   :  { %v2362_v43 = vpop.xlane.xlu2 %2361 }
0x1764   :  { %2938 = vrcp.f32 %v2362_v43  ;;  %v2377_v41 = vand.u32 2147483648, %v2362_v43  ;;  %vm2371_vm13 = vweird.f32 %v2362_v43  ;;  %v2375_v19 = vand.u32 2147483647, %v2362_v43 }
0x1766   :  { %v2378_v42 = vor.u32 1.1754944e-38, %v2377_v41  ;;  %vm2376_vm15 = vcmp.eq.f32.partialorder %v2375_v19, 8.507059e+37 }
0x176a   :  { %v2939_v6 = vpop.eup %2938 }
0x176b   :  { %v2792_v51 = vpop.permute.xlu2 %2791  ;;  %v2365_v54 = vpop.xlane.xlu0 %2364  ;;  %v2367_v57 = vmul.f32 %v2939_v6, %v2362_v43  ;;  %vm2372_vm12 = vweird.f32 %v2939_v6 }
0x176c   :  { %v2793_v55 = vunpack.i.l.bf16 %v2792_v51  ;;  %2940 = vrcp.f32 %v2365_v54  ;;  %v2794_v35 = vunpack.i.h.bf16 %v2792_v51  ;;  %vm2373_vm14 = vmor %vm2371_vm13, %vm2372_vm12  ;;  %v2391_v44 = vand.u32 2147483648, %v2365_v54 }
0x176d   :  { %v2368_v62 = vsub.f32 1.0, %v2367_v57  ;;  %vm2385_vm2 = vweird.f32 %v2365_v54  ;;  %v2389_v56 = vand.u32 2147483647, %v2365_v54 }
0x176e   :  { %2268 = vmatpush.msrb.mxu1 %v2793_v55  ;;  %v2392_v30 = vor.u32 1.1754944e-38, %v2391_v44 }
0x176f   :  { %v2369_v7 = vmul.f32 %v2939_v6, %v2368_v62  ;;  %vm2390_vm4 = vcmp.eq.f32.partialorder %v2389_v56, 8.507059e+37  ;;  %v2820_v56 = vld [vmem:[#allocation7 + $0x1f5] ss:$0 sm:$0xff] }
0x1770   :  { %2269 = vmatpush.msrb.mxu1 %v2794_v35 }
0x1771   :  { %2704 = vmatmul.msk.f32.vlgmr.msrb.gmra.mxu1 %vm216_vm9, %v2240_v38  ;;  %v2370_v9 = vadd.f32 %v2939_v6, %v2369_v7 }
0x1772   :  { %v2941_v4 = vpop.eup %2940  ;;  %2453 = vmatpush.msra.mxu1 %v2431_v33 }
0x1773   :  { %v2381_v8 = vmul.f32 %v2941_v4, %v2365_v54  ;;  %v2374_v20 = vsel %vm2373_vm14, %v2939_v6, %v2370_v9  ;;  %vm2386_vm1 = vweird.f32 %v2941_v4  ;;  %v1764_v9 = vld [vmem:[#allocation7 + $0x1e8] sm:$0xff] }
0x1774   :  { %v2379_v23 = vsel %vm2376_vm15, %v2378_v42, %v2374_v20  ;;  %vm2387_vm3 = vmor %vm2385_vm2, %vm2386_vm1  ;;  %2564 = vmatpush.msrb.mxu2 %v1764_v9  ;;  %v1761_v20 = vld [vmem:[#allocation7 + $0x1d0] sm:$0xff] }
0x1775   :  { %v2382_v17 = vsub.f32 1.0, %v2381_v8  ;;  %v2394_v16 = vmul.f32 %v3512_v3, %v2379_v23 }
0x1777   :  { %v2383_v50 = vmul.f32 %v2941_v4, %v2382_v17  ;;  %v1763_v17 = vld [vmem:[#allocation7 + $0x1e0] sm:$0xff] }
0x1778   :  { %v2090_v18 = vpop.f32.mrf.mxu1  ;;  %2565 = vmatpush.msrb.mxu2 %v1763_v17 }
0x1779   :  { %2705 = vmatmul.msk.f32.gmra.mxu1 %vm216_vm9, %v2241_v60  ;;  %2696 = vmatmul.msk.f32.vlgmr.msra.gmra.mxu3 %vm184_vm8, %v2090_v18  ;;  %v2384_v27 = vadd.f32 %v2941_v4, %v2383_v50  ;;  %v1762_v18 = vld [vmem:[#allocation7 + $0x1d8] sm:$0xff] }
0x177a   :  { %2537 = vmatpush.msra.mxu3 %v1756_v46  ;;  %2566 = vmatpush.msrb.mxu2 %v1762_v18 }
0x177b   :  { %v2388_v24 = vsel %vm2387_vm3, %v2941_v4, %v2384_v27  ;;  %v1754_v4 = vld [vmem:[#allocation7 + $0x198] sm:$0xff] }
0x177c   :  { %v2393_v32 = vsel %vm2390_vm4, %v2392_v30, %v2388_v24  ;;  %2538 = vmatpush.msra.mxu3 %v1755_v63  ;;  %2567 = vmatpush.msrb.mxu2 %v1761_v20 }
0x177d   :  { %v2395_v31 = vmul.f32 %v3516_v22, %v2393_v32  ;;  %v2821_v32 = vld [vmem:[#allocation7 + $0x1f6] ss:$0 sm:$0xff] }
0x177e   :  { %v2797_v48 = vpop.permute.xlu0 %2796  ;;  %2539 = vmatpush.msra.mxu3 %v1754_v4 }
0x177f   :  { %v2798_v25 = vunpack.i.l.bf16 %v2797_v48  ;;  %v2799_v28 = vunpack.i.h.bf16 %v2797_v48  ;;  %v1760_v48 = vld [vmem:[#allocation7 + $0x1c8] sm:$0xff] }
0x1780   :  { %v2093_v52 = vpop.f32.mrf.mxu1  ;;  %2540 = vmatpush.msra.mxu3 %v1753_v5  ;;  %2568 = vmatpush.msrb.mxu2 %v1760_v48 }
0x1781   :  { %2697 = vmatmul.msk.f32.gmra.mxu3 %vm184_vm8, %v2093_v52  ;;  %2422 = vmatpush.msrb.mxu0 %v2798_v25 }
0x1783   :  { %2423 = vmatpush.msrb.mxu0 %v2799_v28 }
0x1784   :  { %2712 = vmatmul.msk.f32.vlgmr.msrb.gmra.mxu0 %vm216_vm9, %v2394_v16 }
0x178c   :  { %2713 = vmatmul.msk.f32.gmra.mxu0 %vm216_vm9, %v2395_v31 }
0x17ee   :  { %v2271_v34 = vpop.f32.mrf.mxu1 }
0x17ef   :  { %2706 = vmatmul.msk.f32.vlgmr.msrb.gmra.mxu3 %vm184_vm8, %v2271_v34 }
0x17f6   :  { %v2274_v3 = vpop.f32.mrf.mxu1 }
0x17f7   :  { %2707 = vmatmul.msk.f32.gmra.mxu3 %vm184_vm8, %v2274_v3 }
0x17fc   :  { %v2120_v39 = vpop.f32.mrf.mxu3 }
0x17fd   :  { %v2150_v14 = vadd.f32 %v3488_v29, %v2120_v39 }
0x1801   :  { %v2425_v11 = vpop.f32.mrf.mxu0 }
0x1802   :  { %2714 = vmatmul.msk.f32.vlgmr.msra.gmra.mxu1 %vm184_vm8, %v2425_v11 }
0x1804   :  { %v2123_v22 = vpop.f32.mrf.mxu3 }
0x1805   :  { %v2153_v37 = vadd.f32 %v3490_v21, %v2123_v22 }
0x1809   :  { %v2428_v2 = vpop.f32.mrf.mxu0 }
0x180a   :  { %2715 = vmatmul.msk.f32.gmra.mxu1 %vm184_vm8, %v2428_v2 }
0x1872   :  { %v2301_v40 = vpop.f32.mrf.mxu3 }
0x1873   :  { %v2307_v0 = vadd.f32 %v2301_v40, %v2150_v14  ;;  %v1759_v40 = vld [vmem:[#allocation7 + $0x1c0] sm:$0xff]  ;;  %v1758_v14 = vld [vmem:[#allocation7 + $0x1b8] sm:$0xff] }
0x1874   :  { %2569 = vmatpush.msrb.mxu2 %v1759_v40 }
0x1876   :  { %2570 = vmatpush.msrb.mxu2 %v1758_v14 }
0x187a   :  { %v2304_v13 = vpop.f32.mrf.mxu3 }
0x187b   :  { %v2308_v6 = vadd.f32 %v2304_v13, %v2153_v37 }
0x187f   :  { %v2455_v43 = vpop.f32.mrf.mxu1 }
0x1880   :  { %v2461_v45 = vadd.f32 %v2455_v43, %v2307_v0  ;;  %v1757_v0 = vld [vmem:[#allocation7 + $0x1b0] sm:$0xff] }
0x1881   :  { %2571 = vmatpush.msrb.mxu2 %v1757_v0  ;;  %v2822_v43 = vld [vmem:[#allocation7 + $0x1f1] ss:$0 sm:$0xff] }
0x1882   :  { %v2463_v12 = vadd.f32 %v2461_v45, %v3421_v36 }
0x1884   :  { %v3545_v1 = vadd.f32 %v2819_v47, %v2463_v12 }
0x1886   :  { %v2468_v49 = vsel %vm90_vm0, %v3545_v1, 0.0 }
0x1887   :  { %v2458_v51 = vpop.f32.mrf.mxu1  ;;  %2469 = vadd.xlane.f32.xlu1 %v2468_v49  ;;  %v2823_v49 = vld [vmem:[#allocation7 + $0x1f7] ss:$0 sm:$0xff] }
0x1888   :  { %v2462_v53 = vadd.f32 %v2458_v51, %v2308_v6 }
0x188a   :  { %v2464_v29 = vadd.f32 %v2462_v53, %v3426_v26 }
0x188c   :  { %v3550_v54 = vadd.f32 %v2819_v47, %v2464_v29 }
0x188e   :  { %v2471_v55 = vsel %vm90_vm0, %v3550_v54, 0.0 }
0x188f   :  { %2472 = vadd.xlane.f32.xlu0 %v2471_v55 }
0x18fa   :  { %v2470_v36 = vpop.xlane.xlu1 %2469 }
0x18fb   :  { %v2474_v21 = vmul.f32 %v2470_v36, %v3116_v10 }
0x18fd   :  { %v2476_v57 = vsub.f32 %v3545_v1, %v2474_v21 }
0x18ff   :  { %v2478_v58 = vmul.f32 %v2476_v57, %v2476_v57 }
0x1901   :  { %v2480_v59 = vsel %vm90_vm0, %v2478_v58, 0.0 }
0x1902   :  { %2481 = vadd.xlane.f32.xlu2 %v2480_v59  ;;  %v2473_v35 = vpop.xlane.xlu0 %2472 }
0x1903   :  { %v2475_v38 = vmul.f32 %v2473_v35, %v3116_v10 }
0x1905   :  { %v2477_v26 = vsub.f32 %v3550_v54, %v2475_v38 }
0x1907   :  { %v2479_v61 = vmul.f32 %v2477_v26, %v2477_v26 }
0x1909   :  { %v2483_v62 = vsel %vm90_vm0, %v2479_v61, 0.0 }
0x190a   :  { %2484 = vadd.xlane.f32.xlu1 %v2483_v62 }
0x1975   :  { %v2482_v7 = vpop.xlane.xlu2 %2481 }
0x1976   :  { %v2486_v8 = vmul.f32 %v2482_v7, %v3116_v10 }
0x1978   :  { %v2488_v60 = vadd.f32 1e-05, %v2486_v8 }
0x197a   :  { %2942 = vrsqrt.f32 %v2488_v60  ;;  %vm2496_vm9 = vweird.f32 %v2488_v60 }
0x197d   :  { %v2485_v41 = vpop.xlane.xlu1 %2484 }
0x197e   :  { %v2487_v19 = vmul.f32 %v2485_v41, %v3116_v10 }
0x1980   :  { %v2943_v50 = vpop.eup %2942  ;;  %v2489_v42 = vadd.f32 1e-05, %v2487_v19 }
0x1981   :  { %v2491_v23 = vmul.f32 %v2943_v50, %v2488_v60  ;;  %vm2497_vm8 = vweird.f32 %v2943_v50 }
0x1982   :  { %2944 = vrsqrt.f32 %v2489_v42  ;;  %vm2498_vm5 = vmor %vm2496_vm9, %vm2497_vm8  ;;  %vm2506_vm10 = vweird.f32 %v2489_v42 }
0x1983   :  { %v2492_v25 = vmul.f32 %v2943_v50, %v2491_v23 }
0x1985   :  { %v2493_v52 = vmul.f32 0.5, %v2492_v25 }
0x1987   :  { %v2494_v27 = vsub.f32 1.5, %v2493_v52 }
0x1988   :  { %v2945_v44 = vpop.eup %2944 }
0x1989   :  { %v2495_v28 = vmul.f32 %v2943_v50, %v2494_v27  ;;  %v2501_v16 = vmul.f32 %v2945_v44, %v2489_v42  ;;  %vm2507_vm6 = vweird.f32 %v2945_v44 }
0x198a   :  { %vm2508_vm11 = vmor %vm2506_vm10, %vm2507_vm6 }
0x198b   :  { %v2499_v10 = vsel %vm2498_vm5, %v2943_v50, %v2495_v28  ;;  %v2502_v24 = vmul.f32 %v2945_v44, %v2501_v16 }
0x198c   :  { %v2510_v30 = vmul.f32 %v2499_v10, %v2476_v57 }
0x198d   :  { %v2503_v31 = vmul.f32 0.5, %v2502_v24 }
0x198e   :  { %v2513_v15 = vmul.f32 %v2820_v56, %v2510_v30 }
0x198f   :  { %v2504_v33 = vsub.f32 1.5, %v2503_v31 }
0x1990   :  { %v2516_v34 = vadd.f32 %v2821_v32, %v2513_v15 }
0x1991   :  { %v2505_v3 = vmul.f32 %v2945_v44, %v2504_v33 }
0x1992   :  { %2716 = vmatmul.msk.f32.vlgmr.msra.gmra.mxu3 %vm90_vm0, %v2516_v34 }
0x1993   :  { %v2509_v11 = vsel %vm2508_vm11, %v2945_v44, %v2505_v3 }
0x1994   :  { %v2511_v2 = vmul.f32 %v2509_v11, %v2477_v26 }
0x1996   :  { %v2514_v39 = vmul.f32 %v2820_v56, %v2511_v2 }
0x1998   :  { %v2517_v22 = vadd.f32 %v2821_v32, %v2514_v39 }
0x199a   :  { %2717 = vmatmul.msk.f32.gmra.mxu3 %vm90_vm0, %v2517_v22 }
0x1a15   :  { %v2542_v45 = vpop.f32.mrf.mxu3 }
0x1a16   :  { %v2543_v47 = vadd.f32 %v2822_v43, %v2542_v45 }
0x1a18   :  { %v2548_v12 = vmax.f32 %v2543_v47, 0.0 }
0x1a1a   :  { %2718 = vmatmul.msk.f32.vlgmr.msrb.gmra.mxu2 %vm877_vm7, %v2548_v12 }
0x1a1d   :  { %v2545_v13 = vpop.f32.mrf.mxu3 }
0x1a1e   :  { %v2546_v37 = vadd.f32 %v2822_v43, %v2545_v13 }
0x1a20   :  { %v2549_v6 = vmax.f32 %v2546_v37, 0.0 }
0x1a22   :  { %2719 = vmatmul.msk.f32.gmra.mxu2 %vm877_vm7, %v2549_v6 }
0x1a9d   :  { %v2573_v51 = vpop.f32.mrf.mxu2 }
0x1a9e   :  { %v2579_v53 = vadd.f32 %v2573_v51, %v3545_v1 }
0x1aa0   :  { %v2582_v29 = vadd.f32 %v2823_v49, %v2579_v53 }
0x1aa2   :  { %2584 = vst.msk [vmem:[#allocation8] sm:$0xff] %vm90_vm0, %v2582_v29 }
0x1aa5   :  { %v2576_v55 = vpop.f32.mrf.mxu2 }
0x1aa6   :  { %v2580_v36 = vadd.f32 %v2576_v55, %v3550_v54 }
0x1aa8   :  { %v2583_v21 = vadd.f32 %v2823_v49, %v2580_v36 }
0x1aaa   :  { %2585 = vst.msk [vmem:[#allocation8 + $0x8] sm:$0xff] %vm90_vm0, %v2583_v21 }
0x1aab   :  { %2598 = dma.vmem_to_hbm [thread:$0]  %s2591_s11, 256, %s2593_s14, [#allocation4], %s3053_s20, %s3053_s20, %s3054_s21  }
0x1aac   :  { %3050 = dma.done.wait [#allocation4], 256  }
0x1aad   :  { %3051 = vsyncadd [#allocation4], 4294967040 }
0x1aae   :  { %2603 = vsyncpa [#allocation3], 1 }
0x1aaf   :  { %2604 = vsyncpa [#allocation6], 1 }
0x1ab0   :  { %2605 = vsyncpa [#allocation4], 1 }

</bundles_post_ra>
